<compile_context>
chip_gen: v7x
topology: tpu7x:2x2x1
jax: 0.10.0
libtpu: 0.0.40
codegen_flags: <defaults>
</compile_context>

<pallas_src>
import jax
import jax.numpy as jnp
from jax.experimental import pallas as pl
from jax.experimental.pallas import tpu as pltpu

C = 64          # channel width of every ResBlock (in == out == 64)
K = 3           # 3x3 convs
N_BLOCKS = 10


def _im2col_patches(pad_ref, H, W):
    """Build the (H*W, 9*C) bf16 im2col buffer from a padded (H+2, W+2, C) ref.

    Returns (patches, centre_tap) where centre_tap is the (H, W, C) dy=dx=1
    slice (reused for the 1x1 identity conv).  The cast to bf16 happens once
    on the whole padded buffer so the 9 slices / concat shuffle half the bytes.
    """
    v = pad_ref[...].astype(jnp.bfloat16)                     # cast once
    cols = [v[dy:dy + H, dx:dx + W, :] for dy in range(K) for dx in range(K)]
    patches = jnp.concatenate(cols, axis=-1).reshape(H * W, K * K * C)
    return patches, cols[K * K // 2]


def fused_recon_kernel(x_ref, w1_ref, b1_ref, w2_ref, b2_ref, wm_ref, bm_ref,
                       out_ref, xpad, hpad):
    """All 10 ResBlocks for a single batch element.

    x_ref  : (1, H, W, C)        f32  un-padded input
    w1_ref : (NB, 9*C, C)        bf16 conv1 weights (tap-major contraction dim)
    b1_ref : (NB, 1, C)          f32
    w2_ref : (NB, 9*C, C)        bf16 conv2 weights
    b2_ref : (NB, 1, C)          f32
    wm_ref : (NB, C, C)          bf16 1x1 match_channels weights
    bm_ref : (NB, 1, C)          f32
    out_ref: (1, H, W, C)        f32
    xpad, hpad : VMEM (H+2, W+2, C) f32 scratch (block input / intermediate)
    """
    H = x_ref.shape[1]
    W = x_ref.shape[2]
    NB = w1_ref.shape[0]

    # Zero the padded scratches ONCE per batch element (grid step), not per
    # block: the 1-px halo must stay zero; the interiors are fully overwritten
    # by every block.  (Zeroed every grid step rather than only on
    # program_id==0 so megacore grid splitting on v7x stays correct.)
    xpad[...] = jnp.zeros(xpad.shape, xpad.dtype)
    hpad[...] = jnp.zeros(hpad.shape, hpad.dtype)
    xpad[1:1 + H, 1:1 + W, :] = x_ref[0]

    def block_step(b, carry):
        w1 = w1_ref[b]          # (9C, C) bf16
        b1 = b1_ref[b]          # (1, C)  f32
        w2 = w2_ref[b]
        b2 = b2_ref[b]
        wm = wm_ref[b]          # (C, C)  bf16
        bm = bm_ref[b]

        patches1, centre = _im2col_patches(xpad, H, W)

        # identity path: 1x1 conv == centre tap @ wm  (reuses the im2col slice)
        identity = jnp.dot(centre.reshape(H * W, C), wm,
                           preferred_element_type=jnp.float32) + bm

        # conv1: 3x3 pad=1 as one 576-deep bf16 MXU contraction, f32 acc, ReLU
        h1 = jnp.maximum(
            jnp.dot(patches1, w1, preferred_element_type=jnp.float32) + b1,
            0.0)
        hpad[1:1 + H, 1:1 + W, :] = h1.reshape(H, W, C)

        # conv2: 3x3 pad=1 + residual add + ReLU
        patches2, _ = _im2col_patches(hpad, H, W)
        out = jnp.maximum(
            jnp.dot(patches2, w2, preferred_element_type=jnp.float32)
            + b2 + identity, 0.0)
        xpad[1:1 + H, 1:1 + W, :] = out.reshape(H, W, C)
        return carry

    jax.lax.fori_loop(0, NB, block_step, 0)

    out_ref[0] = xpad[1:1 + H, 1:1 + W, :].astype(out_ref.dtype)


def reconstruction_module_pallas(x_nhwc, packed):
    """Run the whole ReconstructionModule. x_nhwc: (N, H, W, C) f32."""
    w1, b1, w2, b2, wm, bm = packed
    N, H, W, _ = x_nhwc.shape
    NB = w1.shape[0]

    return pl.pallas_call(
        fused_recon_kernel,
        out_shape=jax.ShapeDtypeStruct((N, H, W, C), x_nhwc.dtype),
        grid_spec=pltpu.PrefetchScalarGridSpec(
            num_scalar_prefetch=0,
            grid=(N,),
            in_specs=[
                pl.BlockSpec((1, H, W, C), lambda n: (n, 0, 0, 0)),       # x
                pl.BlockSpec((NB, K * K * C, C), lambda n: (0, 0, 0)),    # w1
                pl.BlockSpec((NB, 1, C), lambda n: (0, 0, 0)),            # b1
                pl.BlockSpec((NB, K * K * C, C), lambda n: (0, 0, 0)),    # w2
                pl.BlockSpec((NB, 1, C), lambda n: (0, 0, 0)),            # b2
                pl.BlockSpec((NB, C, C), lambda n: (0, 0, 0)),            # wm
                pl.BlockSpec((NB, 1, C), lambda n: (0, 0, 0)),            # bm
            ],
            out_specs=pl.BlockSpec((1, H, W, C), lambda n: (n, 0, 0, 0)),
            scratch_shapes=[
                pltpu.VMEM((H + 2, W + 2, C), jnp.float32),   # block input
                pltpu.VMEM((H + 2, W + 2, C), jnp.float32),   # intermediate
            ],
        ),
        compiler_params=pltpu.CompilerParams(
            dimension_semantics=("parallel",)),
    )(x_nhwc, w1, b1, w2, b2, wm, bm)


reconstruction_module = jax.jit(reconstruction_module_pallas)


# ----------------------------- parameter handling -----------------------------
def init_params(key, n_blocks=N_BLOCKS):
    """Per-block params in (9, Cin, Cout) tap-major form (f32)."""
    params = []
    for i in range(n_blocks):
        ks = jax.random.split(jax.random.fold_in(key, i), 6)
        w1 = jax.random.normal(ks[0], (K * K, C, C), jnp.float32) / jnp.sqrt(K * K * C)
        b1 = jax.random.normal(ks[1], (1, C), jnp.float32) * 0.01
        w2 = jax.random.normal(ks[2], (K * K, C, C), jnp.float32) / jnp.sqrt(K * K * C)
        b2 = jax.random.normal(ks[3], (1, C), jnp.float32) * 0.01
        wm = jax.random.normal(ks[4], (C, C), jnp.float32) / jnp.sqrt(C)
        bm = jax.random.normal(ks[5], (1, C), jnp.float32) * 0.01
        params.append((w1, b1, w2, b2, wm, bm))
    return params


def pack_params(params):
    """Stack per-block params for the fused kernel; cast matmul weights to bf16."""
    w1 = jnp.stack([p[0].reshape(K * K * C, C) for p in params]).astype(jnp.bfloat16)
    b1 = jnp.stack([p[1] for p in params])                      # (NB, 1, C) f32
    w2 = jnp.stack([p[2].reshape(K * K * C, C) for p in params]).astype(jnp.bfloat16)
    b2 = jnp.stack([p[3] for p in params])
    wm = jnp.stack([p[4] for p in params]).astype(jnp.bfloat16)  # (NB, C, C)
    bm = jnp.stack([p[5] for p in params])
    return w1, b1, w2, b2, wm, bm


# ----------------------- pure-JAX reference (for checking) -----------------------
def _conv3x3_ref(x, w, b):
    w4 = w.reshape(K, K, C, C)  # HWIO
    y = jax.lax.conv_general_dilated(
        x, w4, window_strides=(1, 1), padding="SAME",
        dimension_numbers=("NHWC", "HWIO", "NHWC"),
        precision=jax.lax.Precision.HIGHEST)
    return y + b.reshape(1, 1, 1, C)


def _resblock_ref(x, params):
    w1, b1, w2, b2, wm, bm = params
    identity = jnp.einsum("nhwc,co->nhwo", x, wm,
                          precision=jax.lax.Precision.HIGHEST) + bm.reshape(1, 1, 1, C)
    h = jax.nn.relu(_conv3x3_ref(x, w1, b1))
    out = jax.nn.relu(_conv3x3_ref(h, w2, b2) + identity)
    return out


def _module_ref(x, all_params):
    for p in all_params:
        x = _resblock_ref(x, p)
    return x


if __name__ == "__main__":
    key = jax.random.PRNGKey(0)
    k_x, k_p = jax.random.split(key)

    N, H, W = 2, 16, 16
    # PyTorch-style NCHW input, transposed to the kernel's NHWC layout.
    x_nchw = jax.random.normal(k_x, (N, C, H, W), jnp.float32)
    x_nhwc = jnp.transpose(x_nchw, (0, 2, 3, 1))

    params = init_params(k_p)
    packed = pack_params(params)

    y = reconstruction_module(x_nhwc, packed)
    y = jax.block_until_ready(y)

    y_ref = _module_ref(x_nhwc, params)
    assert y.shape == (N, H, W, C)
    max_err = float(jnp.max(jnp.abs(y - y_ref)))
    # Kernel matmul operands are bf16 (TPU-native MXU precision) with f32
    # accumulation across 10 stacked blocks; the reference runs at
    # Precision.HIGHEST, so allow a correspondingly looser tolerance.
    assert jnp.allclose(y, y_ref, atol=5e-2, rtol=5e-2), (
        f"mismatch vs reference, max abs diff = {max_err}")

    print("KERNEL_OK")
</pallas_src>

<mosaic_0001>
module attributes {stable_mosaic.version = 11 : i64} {
  func.func @fused_recon_kernel(%arg0: i32, %arg1: memref<1x16x16x64xf32, #tpu.memory_space<vmem>>, %arg2: memref<10x576x64xbf16, #tpu.memory_space<vmem>>, %arg3: memref<10x1x64xf32, #tpu.memory_space<vmem>>, %arg4: memref<10x576x64xbf16, #tpu.memory_space<vmem>>, %arg5: memref<10x1x64xf32, #tpu.memory_space<vmem>>, %arg6: memref<10x64x64xbf16, #tpu.memory_space<vmem>>, %arg7: memref<10x1x64xf32, #tpu.memory_space<vmem>>, %arg8: memref<1x16x16x64xf32, #tpu.memory_space<vmem>>, %arg9: memref<18x18x64xf32, #tpu.memory_space<vmem>>, %arg10: memref<18x18x64xf32, #tpu.memory_space<vmem>>) attributes {dimension_semantics = [#tpu.dimension_semantics<parallel>], iteration_bounds = array<i64: 2>, scalar_prefetch = 0 : i64, scratch_operands = 2 : i64, tpu.core_type = #tpu.core_type<tc>, window_params = [{transform_indices = @transform_0, window_bounds = array<i64: 1, 16, 16, 64>}, {pipeline_mode = #tpu.pipeline_mode<synchronous>, transform_indices = @transform_1, window_bounds = array<i64: 10, 576, 64>}, {pipeline_mode = #tpu.pipeline_mode<synchronous>, transform_indices = @transform_2, window_bounds = array<i64: 10, 1, 64>}, {pipeline_mode = #tpu.pipeline_mode<synchronous>, transform_indices = @transform_3, window_bounds = array<i64: 10, 576, 64>}, {pipeline_mode = #tpu.pipeline_mode<synchronous>, transform_indices = @transform_4, window_bounds = array<i64: 10, 1, 64>}, {pipeline_mode = #tpu.pipeline_mode<synchronous>, transform_indices = @transform_5, window_bounds = array<i64: 10, 64, 64>}, {pipeline_mode = #tpu.pipeline_mode<synchronous>, transform_indices = @transform_6, window_bounds = array<i64: 10, 1, 64>}, {transform_indices = @transform_7, window_bounds = array<i64: 1, 16, 16, 64>}]} {
    %cst = arith.constant 0.000000e+00 : f32
    %0 = vector.broadcast %cst : f32 to vector<18x18x64xf32>
    %c0 = arith.constant 0 : index
    %c0_0 = arith.constant 0 : index
    %c0_1 = arith.constant 0 : index
    %1 = vector.load %arg9[%c0, %c0_0, %c0_1] : memref<18x18x64xf32, #tpu.memory_space<vmem>>, vector<18x18x64xf32>
    tpu.vector_store %arg9[%c0, %c0_0, %c0_1], %0 {strides = array<i32>} : memref<18x18x64xf32, #tpu.memory_space<vmem>>, vector<18x18x64xf32>,
    %cst_2 = arith.constant 0.000000e+00 : f32
    %2 = vector.broadcast %cst_2 : f32 to vector<18x18x64xf32>
    %c0_3 = arith.constant 0 : index
    %c0_4 = arith.constant 0 : index
    %c0_5 = arith.constant 0 : index
    %3 = vector.load %arg10[%c0_3, %c0_4, %c0_5] : memref<18x18x64xf32, #tpu.memory_space<vmem>>, vector<18x18x64xf32>
    tpu.vector_store %arg10[%c0_3, %c0_4, %c0_5], %2 {strides = array<i32>} : memref<18x18x64xf32, #tpu.memory_space<vmem>>, vector<18x18x64xf32>,
    %c0_6 = arith.constant 0 : index
    %c0_7 = arith.constant 0 : index
    %c0_8 = arith.constant 0 : index
    %c0_9 = arith.constant 0 : index
    %4 = vector.load %arg1[%c0_6, %c0_7, %c0_8, %c0_9] : memref<1x16x16x64xf32, #tpu.memory_space<vmem>>, vector<1x16x16x64xf32>
    %5 = vector.shape_cast %4 : vector<1x16x16x64xf32> to vector<16x16x64xf32>
    %c1 = arith.constant 1 : index
    %c1_10 = arith.constant 1 : index
    %c0_11 = arith.constant 0 : index
    %6 = vector.load %arg9[%c1, %c1_10, %c0_11] : memref<18x18x64xf32, #tpu.memory_space<vmem>>, vector<16x16x64xf32>
    tpu.vector_store %arg9[%c1, %c1_10, %c0_11], %5 {strides = array<i32>} : memref<18x18x64xf32, #tpu.memory_space<vmem>>, vector<16x16x64xf32>,
    %c0_i32 = arith.constant 0 : i32
    %c10_i32 = arith.constant 10 : i32
    %7 = arith.addi %c0_i32, %c10_i32 : i32
    %c1_i32 = arith.constant 1 : i32
    scf.for %arg11 = %c0_i32 to %7 step %c1_i32  : i32 {
      %12 = arith.index_cast %arg11 : i32 to index
      %c0_20 = arith.constant 0 : index
      %c0_21 = arith.constant 0 : index
      %13 = vector.load %arg2[%12, %c0_20, %c0_21] : memref<10x576x64xbf16, #tpu.memory_space<vmem>>, vector<1x576x64xbf16>
      %14 = vector.shape_cast %13 : vector<1x576x64xbf16> to vector<576x64xbf16>
      %15 = arith.index_cast %arg11 : i32 to index
      %c0_22 = arith.constant 0 : index
      %c0_23 = arith.constant 0 : index
      %16 = vector.load %arg3[%15, %c0_22, %c0_23] : memref<10x1x64xf32, #tpu.memory_space<vmem>>, vector<1x1x64xf32>
      %17 = vector.shape_cast %16 : vector<1x1x64xf32> to vector<1x64xf32>
      %18 = arith.index_cast %arg11 : i32 to index
      %c0_24 = arith.constant 0 : index
      %c0_25 = arith.constant 0 : index
      %19 = vector.load %arg4[%18, %c0_24, %c0_25] : memref<10x576x64xbf16, #tpu.memory_space<vmem>>, vector<1x576x64xbf16>
      %20 = vector.shape_cast %19 : vector<1x576x64xbf16> to vector<576x64xbf16>
      %21 = arith.index_cast %arg11 : i32 to index
      %c0_26 = arith.constant 0 : index
      %c0_27 = arith.constant 0 : index
      %22 = vector.load %arg5[%21, %c0_26, %c0_27] : memref<10x1x64xf32, #tpu.memory_space<vmem>>, vector<1x1x64xf32>
      %23 = vector.shape_cast %22 : vector<1x1x64xf32> to vector<1x64xf32>
      %24 = arith.index_cast %arg11 : i32 to index
      %c0_28 = arith.constant 0 : index
      %c0_29 = arith.constant 0 : index
      %25 = vector.load %arg6[%24, %c0_28, %c0_29] : memref<10x64x64xbf16, #tpu.memory_space<vmem>>, vector<1x64x64xbf16>
      %26 = vector.shape_cast %25 : vector<1x64x64xbf16> to vector<64x64xbf16>
      %27 = arith.index_cast %arg11 : i32 to index
      %c0_30 = arith.constant 0 : index
      %c0_31 = arith.constant 0 : index
      %28 = vector.load %arg7[%27, %c0_30, %c0_31] : memref<10x1x64xf32, #tpu.memory_space<vmem>>, vector<1x1x64xf32>
      %29 = vector.shape_cast %28 : vector<1x1x64xf32> to vector<1x64xf32>
      %c0_32 = arith.constant 0 : index
      %c0_33 = arith.constant 0 : index
      %c0_34 = arith.constant 0 : index
      %30 = vector.load %arg9[%c0_32, %c0_33, %c0_34] : memref<18x18x64xf32, #tpu.memory_space<vmem>>, vector<18x18x64xf32>
      %31 = arith.truncf %30 : vector<18x18x64xf32> to vector<18x18x64xbf16>
      %32 = vector.extract_strided_slice %31 {offsets = [0, 0, 0], sizes = [16, 16, 64], strides = [1, 1, 1]} : vector<18x18x64xbf16> to vector<16x16x64xbf16>
      %33 = vector.extract_strided_slice %31 {offsets = [0, 1, 0], sizes = [16, 16, 64], strides = [1, 1, 1]} : vector<18x18x64xbf16> to vector<16x16x64xbf16>
      %34 = vector.extract_strided_slice %31 {offsets = [0, 2, 0], sizes = [16, 16, 64], strides = [1, 1, 1]} : vector<18x18x64xbf16> to vector<16x16x64xbf16>
      %35 = vector.extract_strided_slice %31 {offsets = [1, 0, 0], sizes = [16, 16, 64], strides = [1, 1, 1]} : vector<18x18x64xbf16> to vector<16x16x64xbf16>
      %36 = vector.extract_strided_slice %31 {offsets = [1, 1, 0], sizes = [16, 16, 64], strides = [1, 1, 1]} : vector<18x18x64xbf16> to vector<16x16x64xbf16>
      %37 = vector.extract_strided_slice %31 {offsets = [1, 2, 0], sizes = [16, 16, 64], strides = [1, 1, 1]} : vector<18x18x64xbf16> to vector<16x16x64xbf16>
      %38 = vector.extract_strided_slice %31 {offsets = [2, 0, 0], sizes = [16, 16, 64], strides = [1, 1, 1]} : vector<18x18x64xbf16> to vector<16x16x64xbf16>
      %39 = vector.extract_strided_slice %31 {offsets = [2, 1, 0], sizes = [16, 16, 64], strides = [1, 1, 1]} : vector<18x18x64xbf16> to vector<16x16x64xbf16>
      %40 = vector.extract_strided_slice %31 {offsets = [2, 2, 0], sizes = [16, 16, 64], strides = [1, 1, 1]} : vector<18x18x64xbf16> to vector<16x16x64xbf16>
      %41 = tpu.concatenate %32, %33, %34, %35, %36, %37, %38, %39, %40 in 2 : vector<16x16x64xbf16>, vector<16x16x64xbf16>, vector<16x16x64xbf16>, vector<16x16x64xbf16>, vector<16x16x64xbf16>, vector<16x16x64xbf16>, vector<16x16x64xbf16>, vector<16x16x64xbf16>, vector<16x16x64xbf16> -> vector<16x16x576xbf16>
      %42 = vector.shape_cast %41 : vector<16x16x576xbf16> to vector<256x576xbf16>
      %43 = vector.shape_cast %36 : vector<16x16x64xbf16> to vector<256x64xbf16>
      %cst_35 = arith.constant dense<0.000000e+00> : vector<256x64xf32>
      %44 = tpu.matmul %43, %26, %cst_35 {dimension_numbers = #tpu.dot_dimension_numbers<[1], [0], [0], [1], [0, 0, 1, 1], [], []>} : vector<256x64xbf16>, vector<64x64xbf16>, vector<256x64xf32> -> vector<256x64xf32>
      %45 = vector.broadcast %29 : vector<1x64xf32> to vector<256x64xf32>
      %46 = arith.addf %44, %45 : vector<256x64xf32>
      %cst_36 = arith.constant dense<0.000000e+00> : vector<256x64xf32>
      %47 = tpu.matmul %42, %14, %cst_36 {dimension_numbers = #tpu.dot_dimension_numbers<[1], [0], [0], [1], [0, 0, 1, 1], [], []>} : vector<256x576xbf16>, vector<576x64xbf16>, vector<256x64xf32> -> vector<256x64xf32>
      %48 = vector.broadcast %17 : vector<1x64xf32> to vector<256x64xf32>
      %49 = arith.addf %47, %48 : vector<256x64xf32>
      %cst_37 = arith.constant 0.000000e+00 : f32
      %50 = vector.broadcast %cst_37 : f32 to vector<256x64xf32>
      %51 = arith.maximumf %49, %50 : vector<256x64xf32>
      %52 = vector.shape_cast %51 : vector<256x64xf32> to vector<16x16x64xf32>
      %c1_38 = arith.constant 1 : index
      %c1_39 = arith.constant 1 : index
      %c0_40 = arith.constant 0 : index
      %53 = vector.load %arg10[%c1_38, %c1_39, %c0_40] : memref<18x18x64xf32, #tpu.memory_space<vmem>>, vector<16x16x64xf32>
      tpu.vector_store %arg10[%c1_38, %c1_39, %c0_40], %52 {strides = array<i32>} : memref<18x18x64xf32, #tpu.memory_space<vmem>>, vector<16x16x64xf32>,
      %c0_41 = arith.constant 0 : index
      %c0_42 = arith.constant 0 : index
      %c0_43 = arith.constant 0 : index
      %54 = vector.load %arg10[%c0_41, %c0_42, %c0_43] : memref<18x18x64xf32, #tpu.memory_space<vmem>>, vector<18x18x64xf32>
      %55 = arith.truncf %54 : vector<18x18x64xf32> to vector<18x18x64xbf16>
      %56 = vector.extract_strided_slice %55 {offsets = [0, 0, 0], sizes = [16, 16, 64], strides = [1, 1, 1]} : vector<18x18x64xbf16> to vector<16x16x64xbf16>
      %57 = vector.extract_strided_slice %55 {offsets = [0, 1, 0], sizes = [16, 16, 64], strides = [1, 1, 1]} : vector<18x18x64xbf16> to vector<16x16x64xbf16>
      %58 = vector.extract_strided_slice %55 {offsets = [0, 2, 0], sizes = [16, 16, 64], strides = [1, 1, 1]} : vector<18x18x64xbf16> to vector<16x16x64xbf16>
      %59 = vector.extract_strided_slice %55 {offsets = [1, 0, 0], sizes = [16, 16, 64], strides = [1, 1, 1]} : vector<18x18x64xbf16> to vector<16x16x64xbf16>
      %60 = vector.extract_strided_slice %55 {offsets = [1, 1, 0], sizes = [16, 16, 64], strides = [1, 1, 1]} : vector<18x18x64xbf16> to vector<16x16x64xbf16>
      %61 = vector.extract_strided_slice %55 {offsets = [1, 2, 0], sizes = [16, 16, 64], strides = [1, 1, 1]} : vector<18x18x64xbf16> to vector<16x16x64xbf16>
      %62 = vector.extract_strided_slice %55 {offsets = [2, 0, 0], sizes = [16, 16, 64], strides = [1, 1, 1]} : vector<18x18x64xbf16> to vector<16x16x64xbf16>
      %63 = vector.extract_strided_slice %55 {offsets = [2, 1, 0], sizes = [16, 16, 64], strides = [1, 1, 1]} : vector<18x18x64xbf16> to vector<16x16x64xbf16>
      %64 = vector.extract_strided_slice %55 {offsets = [2, 2, 0], sizes = [16, 16, 64], strides = [1, 1, 1]} : vector<18x18x64xbf16> to vector<16x16x64xbf16>
      %65 = tpu.concatenate %56, %57, %58, %59, %60, %61, %62, %63, %64 in 2 : vector<16x16x64xbf16>, vector<16x16x64xbf16>, vector<16x16x64xbf16>, vector<16x16x64xbf16>, vector<16x16x64xbf16>, vector<16x16x64xbf16>, vector<16x16x64xbf16>, vector<16x16x64xbf16>, vector<16x16x64xbf16> -> vector<16x16x576xbf16>
      %66 = vector.shape_cast %65 : vector<16x16x576xbf16> to vector<256x576xbf16>
      %cst_44 = arith.constant dense<0.000000e+00> : vector<256x64xf32>
      %67 = tpu.matmul %66, %20, %cst_44 {dimension_numbers = #tpu.dot_dimension_numbers<[1], [0], [0], [1], [0, 0, 1, 1], [], []>} : vector<256x576xbf16>, vector<576x64xbf16>, vector<256x64xf32> -> vector<256x64xf32>
      %68 = vector.broadcast %23 : vector<1x64xf32> to vector<256x64xf32>
      %69 = arith.addf %67, %68 : vector<256x64xf32>
      %70 = arith.addf %69, %46 : vector<256x64xf32>
      %cst_45 = arith.constant 0.000000e+00 : f32
      %71 = vector.broadcast %cst_45 : f32 to vector<256x64xf32>
      %72 = arith.maximumf %70, %71 : vector<256x64xf32>
      %73 = vector.shape_cast %72 : vector<256x64xf32> to vector<16x16x64xf32>
      %c1_46 = arith.constant 1 : index
      %c1_47 = arith.constant 1 : index
      %c0_48 = arith.constant 0 : index
      %74 = vector.load %arg9[%c1_46, %c1_47, %c0_48] : memref<18x18x64xf32, #tpu.memory_space<vmem>>, vector<16x16x64xf32>
      tpu.vector_store %arg9[%c1_46, %c1_47, %c0_48], %73 {strides = array<i32>} : memref<18x18x64xf32, #tpu.memory_space<vmem>>, vector<16x16x64xf32>,
    }
    %c10_i32_12 = arith.constant 10 : i32
    %c1_13 = arith.constant 1 : index
    %c1_14 = arith.constant 1 : index
    %c0_15 = arith.constant 0 : index
    %8 = vector.load %arg9[%c1_13, %c1_14, %c0_15] : memref<18x18x64xf32, #tpu.memory_space<vmem>>, vector<16x16x64xf32>
    %c0_16 = arith.constant 0 : index
    %c0_17 = arith.constant 0 : index
    %c0_18 = arith.constant 0 : index
    %c0_19 = arith.constant 0 : index
    %9 = vector.load %arg8[%c0_16, %c0_17, %c0_18, %c0_19] : memref<1x16x16x64xf32, #tpu.memory_space<vmem>>, vector<1x16x16x64xf32>
    %10 = vector.shape_cast %9 : vector<1x16x16x64xf32> to vector<16x16x64xf32>
    %11 = vector.shape_cast %8 : vector<16x16x64xf32> to vector<1x16x16x64xf32>
    tpu.vector_store %arg8[%c0_16, %c0_17, %c0_18, %c0_19], %11 {strides = array<i32>} : memref<1x16x16x64xf32, #tpu.memory_space<vmem>>, vector<1x16x16x64xf32>,
    return
  }
  func.func @transform_0(%arg0: i32) -> (i32, i32, i32, i32) {
    %c0_i32 = arith.constant 0 : i32
    %c0_i32_0 = arith.constant 0 : i32
    %c0_i32_1 = arith.constant 0 : i32
    %c0_i32_2 = arith.constant 0 : i32
    return %arg0, %c0_i32, %c0_i32_0, %c0_i32_1 : i32, i32, i32, i32
  }
  func.func @transform_1(%arg0: i32) -> (i32, i32, i32) {
    %c0_i32 = arith.constant 0 : i32
    %c0_i32_0 = arith.constant 0 : i32
    %c0_i32_1 = arith.constant 0 : i32
    %c0_i32_2 = arith.constant 0 : i32
    return %c0_i32, %c0_i32_0, %c0_i32_1 : i32, i32, i32
  }
  func.func @transform_2(%arg0: i32) -> (i32, i32, i32) {
    %c0_i32 = arith.constant 0 : i32
    %c0_i32_0 = arith.constant 0 : i32
    %c0_i32_1 = arith.constant 0 : i32
    %c0_i32_2 = arith.constant 0 : i32
    return %c0_i32, %c0_i32_0, %c0_i32_1 : i32, i32, i32
  }
  func.func @transform_3(%arg0: i32) -> (i32, i32, i32) {
    %c0_i32 = arith.constant 0 : i32
    %c0_i32_0 = arith.constant 0 : i32
    %c0_i32_1 = arith.constant 0 : i32
    %c0_i32_2 = arith.constant 0 : i32
    return %c0_i32, %c0_i32_0, %c0_i32_1 : i32, i32, i32
  }
  func.func @transform_4(%arg0: i32) -> (i32, i32, i32) {
    %c0_i32 = arith.constant 0 : i32
    %c0_i32_0 = arith.constant 0 : i32
    %c0_i32_1 = arith.constant 0 : i32
    %c0_i32_2 = arith.constant 0 : i32
    return %c0_i32, %c0_i32_0, %c0_i32_1 : i32, i32, i32
  }
  func.func @transform_5(%arg0: i32) -> (i32, i32, i32) {
    %c0_i32 = arith.constant 0 : i32
    %c0_i32_0 = arith.constant 0 : i32
    %c0_i32_1 = arith.constant 0 : i32
    %c0_i32_2 = arith.constant 0 : i32
    return %c0_i32, %c0_i32_0, %c0_i32_1 : i32, i32, i32
  }
  func.func @transform_6(%arg0: i32) -> (i32, i32, i32) {
    %c0_i32 = arith.constant 0 : i32
    %c0_i32_0 = arith.constant 0 : i32
    %c0_i32_1 = arith.constant 0 : i32
    %c0_i32_2 = arith.constant 0 : i32
    return %c0_i32, %c0_i32_0, %c0_i32_1 : i32, i32, i32
  }
  func.func @transform_7(%arg0: i32) -> (i32, i32, i32, i32) {
    %c0_i32 = arith.constant 0 : i32
    %c0_i32_0 = arith.constant 0 : i32
    %c0_i32_1 = arith.constant 0 : i32
    %c0_i32_2 = arith.constant 0 : i32
    return %arg0, %c0_i32, %c0_i32_0, %c0_i32_1 : i32, i32, i32, i32
  }
}

</mosaic_0001>

<bundles_post_ra>
// kernel: reconstruction_module_pallas.1
= control target key start
LH: loop header
LB: loop body
LE: loop exit
PB: predicated region body
PF: predicated region fallthrough
CT: control target
= control target key end

     0   :  { %12 = vsyncpa [#allocation5], 0  ;;  %s7251_s0 = inlined_call_operand.vmem [shape: f32[2,16,16,64], index: 0, kind: input, shape index: {}]   ;;  %s7252_s1 = inlined_call_operand.vmem [shape: bf16[10,576,64], index: 1, kind: input, shape index: {}]   ;;  %s7253_s2 = inlined_call_operand.vmem [shape: f32[10,1,64], index: 2, kind: input, shape index: {}]   ;;  %s7254_s3 = inlined_call_operand.vmem [shape: bf16[10,576,64], index: 3, kind: input, shape index: {}]   ;;  %s7255_s4 = inlined_call_operand.vmem [shape: f32[10,1,64], index: 4, kind: input, shape index: {}]   ;;  %s7256_s5 = inlined_call_operand.vmem [shape: bf16[10,64,64], index: 5, kind: input, shape index: {}]   ;;  %s7257_s6 = inlined_call_operand.vmem [shape: f32[10,1,64], index: 6, kind: input, shape index: {}]   ;;  %s7258_s7 = inlined_call_operand.hbm [shape: f32[2,16,16,64], index: 7, kind: output, shape index: {}]  }
   0x1   :  { %14 = vsyncpa [#allocation5 + $0x1], 0  ;;  %s5124_s24 = smov 0   ;;  %s5126_s25 = smov 0  }
   0x2   :  { %s5128_s26 = smov 0   ;;  %s5130_s27 = smov 0  }
   0x3 LB: > { %s5145_s28 = sadd.s32 4294967295, %s5073_s27   ;;  %s3999_s29 = sadd.s32 4294967294, %s5073_s27   ;;  %s5073_s27 = sphi %s5130_s27, %s7327_s27   ;;  %s5069_s26 = sphi %s5128_s26, %s7326_s26   ;;  %s5065_s25 = sphi %s5126_s25, %s7325_s25   ;;  %s5061_s24 = sphi %s5124_s24, %s7324_s24  }
   0x4   : > { %s5149_s30 = sadd.s32 1, %s5073_s27   ;;  %s179_s8 = sadd.s32 1, %s5069_s26 }
   0x5   : > { %s176_s9 = ssub.s32 %s5073_s27, %s5149_s30  ;;  %p189_p0 = scmp.ne.s32.totalorder %s5069_s26, %s5065_s25 }
   0x6   : > { %p177_p1 = scmp.eq.s32.totalorder %s176_s9, 0  ;;  %p190_p2 = scmp.eq.s32.totalorder %s5145_s28, 1 }
   0x7   : > { %p195_p3 = scmp.ne.s32.totalorder %s5065_s25, %s5061_s24  ;;  %p196_p4 = scmp.eq.s32.totalorder %s3999_s29, 1 }
   0x8   : > { %s5160_s10 = scalar_select %p177_p1, %s5069_s26, %s179_s8  }
   0x9   : > { %p5162_p5 = por %p190_p2, %p189_p0  ;;  %p5166_p6 = por %p196_p4, %p195_p3 }
   0xa   : > { %p4002_p7 = scmp.ge.s32.totalorder %s5073_s27, 1  ;;  %p240_p8 = scmp.lt.s32.totalorder %s5073_s27, 3 }
   0xc   : > { %p241_p9 = pnand %p4002_p7, %p240_p8 }
   0xd   : > { %vm278_vm0 = vcmask (!%p241_p9), 523264   ;;  %vm281_vm1 = vcmask (!%p241_p9), 517120   ;;  %s269_s13 = sand.u32 (!%p241_p9), 1, %s5065_s25   ;;  %p272_p10 = scmp.lt.s32.totalorder (!%p241_p9), %s5145_s28, 1  ;;  %v5079_v0 = vmov (!%p241_p9), 0.0  }
   0xe   : > { %244 = sbr.rel (%p241_p9) target bundleno = 1111 (0x457), region = 48  ;;  %283 = vst.msk [vmem:[#allocation2 + $0x18] sm:$0xff] (!%p241_p9), %vm278_vm0, %v5079_v0  ;;  %279 = vst.msk [vmem:[#allocation2] sm:$0xff] (!%p241_p9), %vm278_vm0, %v5079_v0  ;;  %s5392_s14 = sshll.u32 (!%p241_p9), %s269_s13, 8 }
   0xf   : > { %280 = vst.msk [vmem:[#allocation2 + $0x8] sm:$0xff] (!%p241_p9), %vm278_vm0, %v5079_v0  ;;  %284 = vst.msk [vmem:[#allocation2 + $0x20] sm:$0xff] (!%p241_p9), %vm278_vm0, %v5079_v0  ;;  %s5467_s20 = scalar_lea.vmem (!%p241_p9), [#allocation4], %s5392_s14  ;;  %s5469_s21 = smov (!%p241_p9), 0  }
  0x10   : > { %286 = vst.msk [vmem:[#allocation2 + $0x30] sm:$0xff] (!%p241_p9), %vm278_vm0, %v5079_v0  ;;  %287 = vst.msk [vmem:[#allocation2 + $0x38] sm:$0xff] (!%p241_p9), %vm278_vm0, %v5079_v0 }
  0x11   : > { %289 = vst.msk [vmem:[#allocation2 + $0x48] sm:$0xff] (!%p241_p9), %vm278_vm0, %v5079_v0  ;;  %290 = vst.msk [vmem:[#allocation2 + $0x50] sm:$0xff] (!%p241_p9), %vm278_vm0, %v5079_v0 }
  0x12   : > { %292 = vst.msk [vmem:[#allocation2 + $0x60] sm:$0xff] (!%p241_p9), %vm278_vm0, %v5079_v0  ;;  %293 = vst.msk [vmem:[#allocation2 + $0x68] sm:$0xff] (!%p241_p9), %vm278_vm0, %v5079_v0 }
  0x13   : > { %295 = vst.msk [vmem:[#allocation2 + $0x78] sm:$0xff] (!%p241_p9), %vm278_vm0, %v5079_v0  ;;  %296 = vst.msk [vmem:[#allocation2 + $0x80] sm:$0xff] (!%p241_p9), %vm278_vm0, %v5079_v0 }
  0x14   : > { %298 = vst.msk [vmem:[#allocation2 + $0x90] sm:$0xff] (!%p241_p9), %vm278_vm0, %v5079_v0  ;;  %299 = vst.msk [vmem:[#allocation2 + $0x98] sm:$0xff] (!%p241_p9), %vm278_vm0, %v5079_v0 }
  0x15   : > { %301 = vst.msk [vmem:[#allocation2 + $0xa8] sm:$0xff] %vm278_vm0, %v5079_v0  ;;  %302 = vst.msk [vmem:[#allocation2 + $0xb0] sm:$0xff] %vm278_vm0, %v5079_v0  ;;  %s273_s15 = scalar_select %p272_p10, %s5145_s28, 1 }
  0x16   : > { %304 = vst.msk [vmem:[#allocation2 + $0xc0] sm:$0xff] %vm278_vm0, %v5079_v0  ;;  %305 = vst.msk [vmem:[#allocation2 + $0xc8] sm:$0xff] %vm278_vm0, %v5079_v0 }
  0x17   : > { %307 = vst.msk [vmem:[#allocation2 + $0xd8] sm:$0xff] %vm278_vm0, %v5079_v0  ;;  %308 = vst.msk [vmem:[#allocation2 + $0xe0] sm:$0xff] %vm278_vm0, %v5079_v0  ;;  %s4142_s16 = sshll.u32 %s273_s15, 8 }
  0x18   : > { %310 = vst.msk [vmem:[#allocation2 + $0xf0] sm:$0xff] %vm278_vm0, %v5079_v0  ;;  %311 = vst.msk [vmem:[#allocation2 + $0xf8] sm:$0xff] %vm278_vm0, %v5079_v0  ;;  %s5400_s19 = scalar_lea.vmem %s7251_s0, %s4142_s16 }
  0x19   : > { %313 = vst.msk [vmem:[#allocation2 + $0x108] sm:$0xff] %vm278_vm0, %v5079_v0  ;;  %314 = vst.msk [vmem:[#allocation2 + $0x110] sm:$0xff] %vm278_vm0, %v5079_v0  ;;  %v388_v1 = vld [vmem:[%s5400_s19] sm:$0xff]  ;;  %v389_v2 = vld [vmem:[%s5400_s19 + $0x8] sm:$0xff] }
  0x1a   : > { %316 = vst.msk [vmem:[#allocation2 + $0x120] sm:$0xff] %vm278_vm0, %v5079_v0  ;;  %317 = vst.msk [vmem:[#allocation2 + $0x128] sm:$0xff] %vm278_vm0, %v5079_v0  ;;  %v390_v3 = vld [vmem:[%s5400_s19 + $0x10] sm:$0xff]  ;;  %v391_v4 = vld [vmem:[%s5400_s19 + $0x18] sm:$0xff] }
  0x1b   : > { %319 = vst.msk [vmem:[#allocation2 + $0x138] sm:$0xff] %vm278_vm0, %v5079_v0  ;;  %320 = vst.msk [vmem:[#allocation2 + $0x140] sm:$0xff] %vm278_vm0, %v5079_v0  ;;  %v392_v5 = vld [vmem:[%s5400_s19 + $0x20] sm:$0xff]  ;;  %v393_v6 = vld [vmem:[%s5400_s19 + $0x28] sm:$0xff] }
  0x1c   : > { %322 = vst.msk [vmem:[#allocation2 + $0x150] sm:$0xff] %vm278_vm0, %v5079_v0  ;;  %323 = vst.msk [vmem:[#allocation2 + $0x158] sm:$0xff] %vm278_vm0, %v5079_v0  ;;  %v394_v7 = vld [vmem:[%s5400_s19 + $0x30] sm:$0xff]  ;;  %v395_v8 = vld [vmem:[%s5400_s19 + $0x38] sm:$0xff] }
  0x1d   : > { %325 = vst.msk [vmem:[#allocation2 + $0x168] sm:$0xff] %vm278_vm0, %v5079_v0  ;;  %326 = vst.msk [vmem:[#allocation2 + $0x170] sm:$0xff] %vm278_vm0, %v5079_v0  ;;  %v396_v9 = vld [vmem:[%s5400_s19 + $0x40] sm:$0xff]  ;;  %v397_v10 = vld [vmem:[%s5400_s19 + $0x48] sm:$0xff] }
  0x1e   : > { %328 = vst.msk [vmem:[#allocation2 + $0x180] sm:$0xff] %vm278_vm0, %v5079_v0  ;;  %329 = vst.msk [vmem:[#allocation2 + $0x188] sm:$0xff] %vm278_vm0, %v5079_v0  ;;  %v398_v11 = vld [vmem:[%s5400_s19 + $0x50] sm:$0xff]  ;;  %v399_v12 = vld [vmem:[%s5400_s19 + $0x58] sm:$0xff] }
  0x1f   : > { %331 = vst.msk [vmem:[#allocation2 + $0x198] sm:$0xff] %vm278_vm0, %v5079_v0  ;;  %332 = vst.msk [vmem:[#allocation2 + $0x1a0] sm:$0xff] %vm278_vm0, %v5079_v0  ;;  %v400_v13 = vld [vmem:[%s5400_s19 + $0x60] sm:$0xff]  ;;  %v401_v14 = vld [vmem:[%s5400_s19 + $0x68] sm:$0xff] }
  0x20   : > { %334 = vst.msk [vmem:[#allocation3] sm:$0xff] %vm278_vm0, %v5079_v0  ;;  %335 = vst.msk [vmem:[#allocation3 + $0x8] sm:$0xff] %vm278_vm0, %v5079_v0  ;;  %v402_v15 = vld [vmem:[%s5400_s19 + $0x70] sm:$0xff]  ;;  %v403_v16 = vld [vmem:[%s5400_s19 + $0x78] sm:$0xff] }
  0x21   : > { %337 = vst.msk [vmem:[#allocation3 + $0x18] sm:$0xff] %vm278_vm0, %v5079_v0  ;;  %338 = vst.msk [vmem:[#allocation3 + $0x20] sm:$0xff] %vm278_vm0, %v5079_v0  ;;  %v404_v17 = vld [vmem:[%s5400_s19 + $0x80] sm:$0xff]  ;;  %v405_v18 = vld [vmem:[%s5400_s19 + $0x88] sm:$0xff] }
  0x22   : > { %340 = vst.msk [vmem:[#allocation3 + $0x30] sm:$0xff] %vm278_vm0, %v5079_v0  ;;  %341 = vst.msk [vmem:[#allocation3 + $0x38] sm:$0xff] %vm278_vm0, %v5079_v0  ;;  %v406_v19 = vld [vmem:[%s5400_s19 + $0x90] sm:$0xff]  ;;  %v407_v20 = vld [vmem:[%s5400_s19 + $0x98] sm:$0xff] }
  0x23   : > { %343 = vst.msk [vmem:[#allocation3 + $0x48] sm:$0xff] %vm278_vm0, %v5079_v0  ;;  %344 = vst.msk [vmem:[#allocation3 + $0x50] sm:$0xff] %vm278_vm0, %v5079_v0  ;;  %v408_v21 = vld [vmem:[%s5400_s19 + $0xa0] sm:$0xff]  ;;  %v409_v22 = vld [vmem:[%s5400_s19 + $0xa8] sm:$0xff] }
  0x24   : > { %346 = vst.msk [vmem:[#allocation3 + $0x60] sm:$0xff] %vm278_vm0, %v5079_v0  ;;  %347 = vst.msk [vmem:[#allocation3 + $0x68] sm:$0xff] %vm278_vm0, %v5079_v0  ;;  %v410_v23 = vld [vmem:[%s5400_s19 + $0xb0] sm:$0xff]  ;;  %v411_v24 = vld [vmem:[%s5400_s19 + $0xb8] sm:$0xff] }
  0x25   : > { %349 = vst.msk [vmem:[#allocation3 + $0x78] sm:$0xff] %vm278_vm0, %v5079_v0  ;;  %350 = vst.msk [vmem:[#allocation3 + $0x80] sm:$0xff] %vm278_vm0, %v5079_v0  ;;  %v412_v25 = vld [vmem:[%s5400_s19 + $0xc0] sm:$0xff]  ;;  %v413_v26 = vld [vmem:[%s5400_s19 + $0xc8] sm:$0xff] }
  0x26   : > { %352 = vst.msk [vmem:[#allocation3 + $0x90] sm:$0xff] %vm278_vm0, %v5079_v0  ;;  %353 = vst.msk [vmem:[#allocation3 + $0x98] sm:$0xff] %vm278_vm0, %v5079_v0  ;;  %v414_v27 = vld [vmem:[%s5400_s19 + $0xd0] sm:$0xff]  ;;  %v415_v28 = vld [vmem:[%s5400_s19 + $0xd8] sm:$0xff] }
  0x27   : > { %355 = vst.msk [vmem:[#allocation3 + $0xa8] sm:$0xff] %vm278_vm0, %v5079_v0  ;;  %356 = vst.msk [vmem:[#allocation3 + $0xb0] sm:$0xff] %vm278_vm0, %v5079_v0  ;;  %v416_v29 = vld [vmem:[%s5400_s19 + $0xe0] sm:$0xff]  ;;  %v417_v30 = vld [vmem:[%s5400_s19 + $0xe8] sm:$0xff] }
  0x28   : > { %358 = vst.msk [vmem:[#allocation3 + $0xc0] sm:$0xff] %vm278_vm0, %v5079_v0  ;;  %359 = vst.msk [vmem:[#allocation3 + $0xc8] sm:$0xff] %vm278_vm0, %v5079_v0  ;;  %v418_v31 = vld [vmem:[%s5400_s19 + $0xf0] sm:$0xff]  ;;  %v419_v32 = vld [vmem:[%s5400_s19 + $0xf8] sm:$0xff] }
  0x29   : > { %361 = vst.msk [vmem:[#allocation3 + $0xd8] sm:$0xff] %vm278_vm0, %v5079_v0  ;;  %362 = vst.msk [vmem:[#allocation3 + $0xe0] sm:$0xff] %vm278_vm0, %v5079_v0 }
  0x2a   : > { %364 = vst.msk [vmem:[#allocation3 + $0xf0] sm:$0xff] %vm278_vm0, %v5079_v0  ;;  %365 = vst.msk [vmem:[#allocation3 + $0xf8] sm:$0xff] %vm278_vm0, %v5079_v0 }
  0x2b   : > { %367 = vst.msk [vmem:[#allocation3 + $0x108] sm:$0xff] %vm278_vm0, %v5079_v0  ;;  %368 = vst.msk [vmem:[#allocation3 + $0x110] sm:$0xff] %vm278_vm0, %v5079_v0 }
  0x2c   : > { %370 = vst.msk [vmem:[#allocation3 + $0x120] sm:$0xff] %vm278_vm0, %v5079_v0  ;;  %371 = vst.msk [vmem:[#allocation3 + $0x128] sm:$0xff] %vm278_vm0, %v5079_v0 }
  0x2d   : > { %373 = vst.msk [vmem:[#allocation3 + $0x138] sm:$0xff] %vm278_vm0, %v5079_v0  ;;  %374 = vst.msk [vmem:[#allocation3 + $0x140] sm:$0xff] %vm278_vm0, %v5079_v0 }
  0x2e   : > { %376 = vst.msk [vmem:[#allocation3 + $0x150] sm:$0xff] %vm278_vm0, %v5079_v0  ;;  %377 = vst.msk [vmem:[#allocation3 + $0x158] sm:$0xff] %vm278_vm0, %v5079_v0 }
  0x2f   : > { %379 = vst.msk [vmem:[#allocation3 + $0x168] sm:$0xff] %vm278_vm0, %v5079_v0  ;;  %380 = vst.msk [vmem:[#allocation3 + $0x170] sm:$0xff] %vm278_vm0, %v5079_v0 }
  0x30   : > { %382 = vst.msk [vmem:[#allocation3 + $0x180] sm:$0xff] %vm278_vm0, %v5079_v0  ;;  %383 = vst.msk [vmem:[#allocation3 + $0x188] sm:$0xff] %vm278_vm0, %v5079_v0 }
  0x31   : > { %385 = vst.msk [vmem:[#allocation3 + $0x198] sm:$0xff] %vm278_vm0, %v5079_v0  ;;  %386 = vst.msk [vmem:[#allocation3 + $0x1a0] sm:$0xff] %vm278_vm0, %v5079_v0 }
  0x32   : > { %285 = vst.msk [vmem:[#allocation2 + $0x28] sm:$0x3] %vm281_vm1, %v5079_v0  ;;  %282 = vst.msk [vmem:[#allocation2 + $0x10] sm:$0x3] %vm281_vm1, %v5079_v0 }
  0x33   : > { %288 = vst.msk [vmem:[#allocation2 + $0x40] sm:$0x3] %vm281_vm1, %v5079_v0  ;;  %291 = vst.msk [vmem:[#allocation2 + $0x58] sm:$0x3] %vm281_vm1, %v5079_v0 }
  0x34   : > { %294 = vst.msk [vmem:[#allocation2 + $0x70] sm:$0x3] %vm281_vm1, %v5079_v0  ;;  %297 = vst.msk [vmem:[#allocation2 + $0x88] sm:$0x3] %vm281_vm1, %v5079_v0 }
  0x35   : > { %300 = vst.msk [vmem:[#allocation2 + $0xa0] sm:$0x3] %vm281_vm1, %v5079_v0  ;;  %303 = vst.msk [vmem:[#allocation2 + $0xb8] sm:$0x3] %vm281_vm1, %v5079_v0 }
  0x36   : > { %306 = vst.msk [vmem:[#allocation2 + $0xd0] sm:$0x3] %vm281_vm1, %v5079_v0  ;;  %309 = vst.msk [vmem:[#allocation2 + $0xe8] sm:$0x3] %vm281_vm1, %v5079_v0 }
  0x37   : > { %312 = vst.msk [vmem:[#allocation2 + $0x100] sm:$0x3] %vm281_vm1, %v5079_v0  ;;  %315 = vst.msk [vmem:[#allocation2 + $0x118] sm:$0x3] %vm281_vm1, %v5079_v0 }
  0x38   : > { %318 = vst.msk [vmem:[#allocation2 + $0x130] sm:$0x3] %vm281_vm1, %v5079_v0  ;;  %321 = vst.msk [vmem:[#allocation2 + $0x148] sm:$0x3] %vm281_vm1, %v5079_v0 }
  0x39   : > { %324 = vst.msk [vmem:[#allocation2 + $0x160] sm:$0x3] %vm281_vm1, %v5079_v0  ;;  %327 = vst.msk [vmem:[#allocation2 + $0x178] sm:$0x3] %vm281_vm1, %v5079_v0 }
  0x3a   : > { %330 = vst.msk [vmem:[#allocation2 + $0x190] sm:$0x3] %vm281_vm1, %v5079_v0  ;;  %333 = vst.msk [vmem:[#allocation2 + $0x1a8] sm:$0x3] %vm281_vm1, %v5079_v0 }
  0x3b   : > { %336 = vst.msk [vmem:[#allocation3 + $0x10] sm:$0x3] %vm281_vm1, %v5079_v0  ;;  %339 = vst.msk [vmem:[#allocation3 + $0x28] sm:$0x3] %vm281_vm1, %v5079_v0 }
  0x3c   : > { %342 = vst.msk [vmem:[#allocation3 + $0x40] sm:$0x3] %vm281_vm1, %v5079_v0  ;;  %345 = vst.msk [vmem:[#allocation3 + $0x58] sm:$0x3] %vm281_vm1, %v5079_v0 }
  0x3d   : > { %348 = vst.msk [vmem:[#allocation3 + $0x70] sm:$0x3] %vm281_vm1, %v5079_v0  ;;  %351 = vst.msk [vmem:[#allocation3 + $0x88] sm:$0x3] %vm281_vm1, %v5079_v0 }
  0x3e   : > { %354 = vst.msk [vmem:[#allocation3 + $0xa0] sm:$0x3] %vm281_vm1, %v5079_v0  ;;  %357 = vst.msk [vmem:[#allocation3 + $0xb8] sm:$0x3] %vm281_vm1, %v5079_v0 }
  0x3f   : > { %360 = vst.msk [vmem:[#allocation3 + $0xd0] sm:$0x3] %vm281_vm1, %v5079_v0  ;;  %363 = vst.msk [vmem:[#allocation3 + $0xe8] sm:$0x3] %vm281_vm1, %v5079_v0 }
  0x40   : > { %366 = vst.msk [vmem:[#allocation3 + $0x100] sm:$0x3] %vm281_vm1, %v5079_v0  ;;  %369 = vst.msk [vmem:[#allocation3 + $0x118] sm:$0x3] %vm281_vm1, %v5079_v0 }
  0x41   : > { %372 = vst.msk [vmem:[#allocation3 + $0x130] sm:$0x3] %vm281_vm1, %v5079_v0  ;;  %375 = vst.msk [vmem:[#allocation3 + $0x148] sm:$0x3] %vm281_vm1, %v5079_v0 }
  0x42   : > { %378 = vst.msk [vmem:[#allocation3 + $0x160] sm:$0x3] %vm281_vm1, %v5079_v0  ;;  %381 = vst.msk [vmem:[#allocation3 + $0x178] sm:$0x3] %vm281_vm1, %v5079_v0 }
  0x43   : > { %384 = vst.msk [vmem:[#allocation3 + $0x190] sm:$0x3] %vm281_vm1, %v5079_v0  ;;  %387 = vst.msk [vmem:[#allocation3 + $0x1a8] sm:$0x3] %vm281_vm1, %v5079_v0 }
  0x44   : > { %421 = vst.msk [vmem:[#allocation2 + $0x19] sm:$0xff] %vm278_vm0, %v388_v1  ;;  %422 = vst.msk [vmem:[#allocation2 + $0x21] sm:$0xff] %vm278_vm0, %v389_v2 }
  0x45   : > { %423 = vst.msk [vmem:[#allocation2 + $0x31] sm:$0xff] %vm278_vm0, %v390_v3  ;;  %424 = vst.msk [vmem:[#allocation2 + $0x39] sm:$0xff] %vm278_vm0, %v391_v4 }
  0x46   : > { %425 = vst.msk [vmem:[#allocation2 + $0x49] sm:$0xff] %vm278_vm0, %v392_v5  ;;  %426 = vst.msk [vmem:[#allocation2 + $0x51] sm:$0xff] %vm278_vm0, %v393_v6 }
  0x47   : > { %427 = vst.msk [vmem:[#allocation2 + $0x61] sm:$0xff] %vm278_vm0, %v394_v7  ;;  %428 = vst.msk [vmem:[#allocation2 + $0x69] sm:$0xff] %vm278_vm0, %v395_v8 }
  0x48   : > { %429 = vst.msk [vmem:[#allocation2 + $0x79] sm:$0xff] %vm278_vm0, %v396_v9  ;;  %430 = vst.msk [vmem:[#allocation2 + $0x81] sm:$0xff] %vm278_vm0, %v397_v10 }
  0x49   : > { %431 = vst.msk [vmem:[#allocation2 + $0x91] sm:$0xff] %vm278_vm0, %v398_v11  ;;  %432 = vst.msk [vmem:[#allocation2 + $0x99] sm:$0xff] %vm278_vm0, %v399_v12 }
  0x4a   : > { %433 = vst.msk [vmem:[#allocation2 + $0xa9] sm:$0xff] %vm278_vm0, %v400_v13  ;;  %434 = vst.msk [vmem:[#allocation2 + $0xb1] sm:$0xff] %vm278_vm0, %v401_v14 }
  0x4b   : > { %435 = vst.msk [vmem:[#allocation2 + $0xc1] sm:$0xff] %vm278_vm0, %v402_v15  ;;  %436 = vst.msk [vmem:[#allocation2 + $0xc9] sm:$0xff] %vm278_vm0, %v403_v16 }
  0x4c   : > { %437 = vst.msk [vmem:[#allocation2 + $0xd9] sm:$0xff] %vm278_vm0, %v404_v17  ;;  %438 = vst.msk [vmem:[#allocation2 + $0xe1] sm:$0xff] %vm278_vm0, %v405_v18 }
  0x4d   : > { %439 = vst.msk [vmem:[#allocation2 + $0xf1] sm:$0xff] %vm278_vm0, %v406_v19  ;;  %440 = vst.msk [vmem:[#allocation2 + $0xf9] sm:$0xff] %vm278_vm0, %v407_v20 }
  0x4e   : > { %441 = vst.msk [vmem:[#allocation2 + $0x109] sm:$0xff] %vm278_vm0, %v408_v21  ;;  %442 = vst.msk [vmem:[#allocation2 + $0x111] sm:$0xff] %vm278_vm0, %v409_v22 }
  0x4f   : > { %443 = vst.msk [vmem:[#allocation2 + $0x121] sm:$0xff] %vm278_vm0, %v410_v23  ;;  %444 = vst.msk [vmem:[#allocation2 + $0x129] sm:$0xff] %vm278_vm0, %v411_v24 }
  0x50   : > { %445 = vst.msk [vmem:[#allocation2 + $0x139] sm:$0xff] %vm278_vm0, %v412_v25  ;;  %446 = vst.msk [vmem:[#allocation2 + $0x141] sm:$0xff] %vm278_vm0, %v413_v26 }
  0x51   : > { %447 = vst.msk [vmem:[#allocation2 + $0x151] sm:$0xff] %vm278_vm0, %v414_v27  ;;  %448 = vst.msk [vmem:[#allocation2 + $0x159] sm:$0xff] %vm278_vm0, %v415_v28 }
  0x52   : > { %449 = vst.msk [vmem:[#allocation2 + $0x169] sm:$0xff] %vm278_vm0, %v416_v29  ;;  %450 = vst.msk [vmem:[#allocation2 + $0x171] sm:$0xff] %vm278_vm0, %v417_v30 }
  0x53   : > { %451 = vst.msk [vmem:[#allocation2 + $0x181] sm:$0xff] %vm278_vm0, %v418_v31  ;;  %452 = vst.msk [vmem:[#allocation2 + $0x189] sm:$0xff] %vm278_vm0, %v419_v32 }
  0x54 LB: >> { %v628_v33 = vld [vmem:[#allocation2 + $0x18] sm:$0xff]  ;;  %v629_v34 = vld [vmem:[#allocation2 + $0x20] sm:$0xff]  ;;  %v626_v37 = vld [vmem:[#allocation2 + $0x8] sm:$0xff]  ;;  %vm715_vm2 = vsmask.f32 7424  ;;  %s5080_s22 = smov 64   ;;  %s610_s15 = scalar_lea.vmem %s7255_s4, %s5077_s21  ;;  %s5077_s21 = sphi %s5469_s21, %s458_s21  }
  0x55   : >> { %v625_v35 = vld [vmem:[#allocation2] sm:$0xff]  ;;  %v5474_v36 = vpack.c.bf16 %v629_v34, %v628_v33  ;;  %v627_v38 = vld [vmem:[#allocation2 + $0x10] sm:$0x3]  ;;  %v632_v42 = vld [vmem:[#allocation2 + $0x38] sm:$0xff]  ;;  %s4145_s23 = sshll.u32 %s5077_s21, 5  ;;  %s4143_s14 = smul.u32 288, %s5077_s21 }
  0x56   : >> { %v631_v39 = vld [vmem:[#allocation2 + $0x30] sm:$0xff]  ;;  %v5476_v40 = vpack.c.bf16 %v626_v37, %v625_v35  ;;  %v5478_v41 = vpack.c.bf16 %v627_v38, %v627_v38  ;;  %v634_v44 = vld [vmem:[#allocation2 + $0x48] sm:$0xff]  ;;  %v633_v53 = vld [vmem:[#allocation2 + $0x40] sm:$0x3]  ;;  %s5546_s9 = scalar_lea.vmem %s7256_s5, %s4145_s23  ;;  %vm972_vm3 = vcmask 1046528   ;;  %s623_s18 = scalar_lea.vmem %s7257_s6, %s5077_s21 }
  0x57   : >> { %1022 = vrot.lane.b32.xlu0 %v5474_v36, %s5080_s22  ;;  %v5482_v43 = vpack.c.bf16 %v632_v42, %v631_v39  ;;  %v630_v45 = vld [vmem:[#allocation2 + $0x28] sm:$0x3]  ;;  %v729_v46 = vshrl.u32 %v5474_v36, 16  ;;  %v731_v47 = vshll.u32 %v5474_v36, 16  ;;  %v635_v51 = vld [vmem:[#allocation2 + $0x50] sm:$0xff]  ;;  %v637_v55 = vld [vmem:[#allocation2 + $0x60] sm:$0xff]  ;;  %v5493_v57 = vpack.c.bf16 %v633_v53, %v633_v53  ;;  %s5601_s17 = scalar_lea.vmem %s7252_s1, %s4143_s14  ;;  %s6095_s23 = scalar_lea.vmem %s7254_s3, %s4143_s14 }
  0x58   : >> { %v717_v48 = vshrl.u32 %v5476_v40, 16  ;;  %v719_v49 = vshll.u32 %v5476_v40, 16  ;;  %v724_v50 = vshll.u32 %v5478_v41, 16  ;;  %v5489_v52 = vpack.c.bf16 %v630_v45, %v630_v45  ;;  %v638_v56 = vld [vmem:[#allocation2 + $0x68] sm:$0xff]  ;;  %v636_v59 = vld [vmem:[#allocation2 + $0x58] sm:$0x3] }
  0x59   : >> { %1024 = vrot.lane.b32.xlu1 %v5482_v43, %s5080_s22  ;;  %v733_v54 = vrot.slane %v731_v47, 1  ;;  %v741_v58 = vshrl.u32 %v5482_v43, 16  ;;  %v743_v63 = vshll.u32 %v5482_v43, 16  ;;  %v5498_v0 = vpack.c.bf16 %v635_v51, %v634_v44  ;;  %v639_v4 = vld [vmem:[#allocation2 + $0x70] sm:$0x3]  ;;  %v640_v9 = vld [vmem:[#allocation2 + $0x78] sm:$0xff] }
  0x5a   : >> { %v721_v60 = vrot.slane %v719_v49, 1  ;;  %v726_v61 = vrot.slane %v724_v50, 1  ;;  %v736_v62 = vshll.u32 %v5489_v52, 16  ;;  %v748_v2 = vshll.u32 %v5493_v57, 16  ;;  %v641_v10 = vld [vmem:[#allocation2 + $0x80] sm:$0xff]  ;;  %v643_v19 = vld [vmem:[#allocation2 + $0x90] sm:$0xff] }
  0x5b   : >> { %v734_v1 = vor.u32 %v733_v54, %v729_v46  ;;  %v5501_v3 = vpack.c.bf16 %v636_v59, %v636_v59  ;;  %v5503_v7 = vpack.c.bf16 %v638_v56, %v637_v55  ;;  %v745_v8 = vrot.slane %v743_v63, 1  ;;  %v642_v15 = vld [vmem:[#allocation2 + $0x88] sm:$0x3]  ;;  %v644_v20 = vld [vmem:[#allocation2 + $0x98] sm:$0xff]  ;;  %v647_v27 = vld [vmem:[#allocation2 + $0xb0] sm:$0xff] }
  0x5c   : >> { %v722_v5 = vor.u32 %v721_v60, %v717_v48  ;;  %v738_v6 = vrot.slane %v736_v62, 1  ;;  %v750_v11 = vrot.slane %v748_v2, 1  ;;  %v753_v12 = vshrl.u32 %v5498_v0, 16  ;;  %v646_v22 = vld [vmem:[#allocation2 + $0xa8] sm:$0xff]  ;;  %v645_v28 = vld [vmem:[#allocation2 + $0xa0] sm:$0x3] }
  0x5d   : >> { %v755_v13 = vshll.u32 %v5498_v0, 16  ;;  %v760_v14 = vshll.u32 %v5501_v3, 16  ;;  %v746_v18 = vor.u32 %v745_v8, %v741_v58  ;;  %v5512_v21 = vpack.c.bf16 %v639_v4, %v639_v4  ;;  %v648_v42 = vld [vmem:[#allocation2 + $0xb8] sm:$0x3]  ;;  %v649_v48 = vld [vmem:[#allocation2 + $0xc0] sm:$0xff]  ;;  %v650_v49 = vld [vmem:[#allocation2 + $0xc8] sm:$0xff] }
  0x5e   : >> { %v727_v16 = vsel %vm715_vm2, %v722_v5, %v726_v61  ;;  %v5510_v17 = vsel %vm715_vm2, %v734_v1, %v738_v6  ;;  %v5517_v23 = vpack.c.bf16 %v641_v10, %v640_v9  ;;  %v767_v26 = vshll.u32 %v5503_v7, 16  ;;  %v652_v55 = vld [vmem:[#allocation2 + $0xd8] sm:$0xff]  ;;  %v653_v56 = vld [vmem:[#allocation2 + $0xe0] sm:$0xff]  ;;  %v651_v59 = vld [vmem:[#allocation2 + $0xd0] sm:$0x3] }
  0x5f   : >> { %908 = vrot.lane.b32.xlu0 %v727_v16, %s5080_s22  ;;  %910 = vrot.lane.b32.xlu1 %v5510_v17, %s5080_s22  ;;  %v757_v24 = vrot.slane %v755_v13, 1  ;;  %v762_v25 = vrot.slane %v760_v14, 1  ;;  %v5521_v29 = vsel %vm715_vm2, %v746_v18, %v750_v11  ;;  %v765_v30 = vshrl.u32 %v5503_v7, 16  ;;  %v654_v60 = vld [vmem:[#allocation2 + $0xe8] sm:$0x3]  ;;  %v655_v1 = vld [vmem:[#allocation2 + $0xf0] sm:$0xff] }
  0x60   : >> { %v772_v31 = vshll.u32 %v5512_v21, 16  ;;  %v5525_v32 = vpack.c.bf16 %v642_v15, %v642_v15  ;;  %4663 = vmatprep.mubr.msk.bf16.mxu0 %vm278_vm0, %v5510_v17  ;;  %v769_v34 = vrot.slane %v767_v26, 1  ;;  %v779_v35 = vshll.u32 %v5517_v23, 16  ;;  %v656_v2 = vld [vmem:[#allocation2 + $0xf8] sm:$0xff]  ;;  %v657_v4 = vld [vmem:[#allocation2 + $0x100] sm:$0x3] }
  0x61   : >> { %v758_v33 = vor.u32 %v757_v24, %v753_v12  ;;  %v5531_v37 = vpack.c.bf16 %v644_v20, %v643_v19  ;;  %v5533_v38 = vpack.c.bf16 %v647_v27, %v646_v22  ;;  %v5535_v39 = vpack.c.bf16 %v645_v28, %v645_v28  ;;  %v4930_v5 = vld [vmem:[%s5546_s9] sm:$0xff]   ;;  %v658_v11 = vld [vmem:[#allocation2 + $0x108] sm:$0xff]  ;;  %v659_v20 = vld [vmem:[#allocation2 + $0x110] sm:$0xff] }
  0x62   : >> { %v774_v44 = vrot.slane %v772_v31, 1  ;;  %v777_v45 = vshrl.u32 %v5517_v23, 16  ;;  %v781_v46 = vrot.slane %v779_v35, 1  ;;  %v784_v47 = vshll.u32 %v5525_v32, 16  ;;  %4775 = vmatprep.subr.bf16.mxu1 %v4930_v5  ;;  %4655 = vmatprep.subr.bf16.mxu0 %v4930_v5  ;;  %v4931_v24 = vld [vmem:[%s5546_s9 + $0x8] sm:$0xff]  }
  0x63   : >> { %1026 = vrot.lane.b32.xlu0 %v5498_v0, %s5080_s22  ;;  %912 = vrot.lane.b32.xlu1 %v5521_v29, %s5080_s22  ;;  %v5549_v50 = vsel %vm715_vm2, %v758_v33, %v762_v25  ;;  %v770_v51 = vor.u32 %v769_v34, %v765_v30  ;;  %v791_v53 = vshll.u32 %v5531_v37, 16  ;;  %v796_v54 = vshll.u32 %v5535_v39, 16  ;;  %v660_v33 = vld [vmem:[#allocation2 + $0x118] sm:$0x3]  ;;  %v4932_v34 = vld [vmem:[%s5546_s9 + $0x10] sm:$0xff]  }
  0x64   : >> { %v5553_v58 = vpack.c.bf16 %v648_v42, %v648_v42  ;;  %v5556_v61 = vpack.c.bf16 %v650_v49, %v649_v48  ;;  %v789_v62 = vshrl.u32 %v5531_v37, 16  ;;  %v803_v63 = vshll.u32 %v5533_v38, 16  ;;  %4779 = vmatpush3.bf16.msra.mxu1 %v4930_v5  ;;  %4656 = vmatpush3.bf16.msra.mxu0 %v4930_v5 }
  0x65   : >> { %v782_v6 = vor.u32 %v781_v46, %v777_v45  ;;  %v786_v8 = vrot.slane %v784_v47, 1  ;;  %v793_v9 = vrot.slane %v791_v53, 1  ;;  %v801_v10 = vshrl.u32 %v5533_v38, 16  ;;  %v661_v46 = vld [vmem:[#allocation2 + $0x120] sm:$0xff]  ;;  %v662_v47 = vld [vmem:[#allocation2 + $0x128] sm:$0xff]  ;;  %4776 = vmatprep.subr.bf16.mxu1 %v4931_v24  ;;  %4657 = vmatprep.subr.bf16.mxu0 %v4931_v24 }
  0x66   : >> { %v5567_v12 = vsel %vm715_vm2, %v770_v51, %v774_v44  ;;  %v798_v13 = vrot.slane %v796_v54, 1  ;;  %v5569_v14 = vpack.c.bf16 %v653_v56, %v652_v55  ;;  %v808_v15 = vshll.u32 %v5553_v58, 16  ;;  %v664_v54 = vld [vmem:[#allocation2 + $0x138] sm:$0xff]  ;;  %v665_v55 = vld [vmem:[#allocation2 + $0x140] sm:$0xff] }
  0x67   : >> { %1028 = vrot.lane.b32.xlu0 %v5503_v7, %s5080_s22  ;;  %914 = vrot.lane.b32.xlu1 %v5549_v50, %s5080_s22  ;;  %v805_v16 = vrot.slane %v803_v63, 1  ;;  %v5572_v18 = vpack.c.bf16 %v651_v59, %v651_v59  ;;  %v815_v19 = vshll.u32 %v5556_v61, 16  ;;  %v5575_v22 = vpack.c.bf16 %v654_v60, %v654_v60  ;;  %v663_v63 = vld [vmem:[#allocation2 + $0x130] sm:$0x3] }
  0x68   : >> { %v825_v25 = vshrl.u32 %v5569_v14, 16  ;;  %v827_v26 = vshll.u32 %v5569_v14, 16  ;;  %v5585_v27 = vsel %vm715_vm2, %v782_v6, %v786_v8  ;;  %v5587_v28 = vpack.c.bf16 %v656_v2, %v655_v1  ;;  %4780 = vmatpush3.bf16.msra.mxu1 %v4931_v24  ;;  %4658 = vmatpush3.bf16.msra.mxu0 %v4931_v24  ;;  %v4933_v1 = vld [vmem:[%s5546_s9 + $0x18] sm:$0xff]   ;;  %v666_v8 = vld [vmem:[#allocation2 + $0x148] sm:$0x3]  ;;  %s534_s9 = scalar_lea.vmem %s7253_s2, %s5077_s21  ;;  %s458_s21 = sadd.s32 1, %s5077_s21  }
  0x69   : >> { %v832_v30 = vshll.u32 %v5575_v22, 16  ;;  %v5590_v31 = vpack.c.bf16 %v657_v4, %v657_v4  ;;  %v794_v35 = vor.u32 %v793_v9, %v789_v62  ;;  %v813_v42 = vshrl.u32 %v5556_v61, 16  ;;  %4777 = vmatprep.subr.bf16.mxu1 %v4932_v34  ;;  %4659 = vmatprep.subr.bf16.mxu0 %v4932_v34  ;;  %p455_p11 = scmp.ge.s32.totalorder %s458_s21, 10  }
  0x6a   : >> { %v5594_v44 = vpack.c.bf16 %v659_v20, %v658_v11  ;;  %v829_v45 = vrot.slane %v827_v26, 1  ;;  %v810_v48 = vrot.slane %v808_v15, 1  ;;  %v820_v49 = vshll.u32 %v5572_v18, 16  ;;  %v4934_v26 = vld [vmem:[%s5601_s17 + $0x40] sm:$0xff]   ;;  %s4146_s21 = sshll.u32 (%p455_p11), %s5145_s28, 12  ;;  %s3923_s19 = sshll.u32 (%p455_p11), %s5467_s20, 4  ;;  %s7190_s19 = int_to_ptr.vmem [resolvable:$true] %s3923_s19 }
  0x6b   : >> { %1030 = vrot.lane.b32.xlu0 %v5517_v23, %s5080_s22  ;;  %916 = vrot.lane.b32.xlu1 %v5567_v12, %s5080_s22  ;;  %v834_v51 = vrot.slane %v832_v30, 1  ;;  %v839_v53 = vshll.u32 %v5587_v28, 16  ;;  %v806_v56 = vor.u32 %v805_v16, %v801_v10  ;;  %v817_v59 = vrot.slane %v815_v19, 1  ;;  %s7188_s29 = scalar_lea.hbm (%p455_p11), %s7258_s7, %s4146_s21  ;;  %s7210_s8 = scalar_lea.sflag (%p455_p11), [#allocation5], %s269_s13 }
  0x6c   : >> { %v830_v60 = vor.u32 %v829_v45, %v825_v25  ;;  %v5605_v62 = vpack.c.bf16 %v660_v33, %v660_v33  ;;  %v837_v2 = vshrl.u32 %v5587_v28, 16  ;;  %v844_v5 = vshll.u32 %v5590_v31, 16  ;;  %4781 = vmatpush3.bf16.msra.mxu1 %v4932_v34  ;;  %4660 = vmatpush3.bf16.msra.mxu0 %v4932_v34 }
  0x6d   : >> { %v841_v4 = vrot.slane %v839_v53, 1  ;;  %v851_v6 = vshll.u32 %v5594_v44, 16  ;;  %v5616_v9 = vsel %vm715_vm2, %v794_v35, %v798_v13  ;;  %v849_v11 = vshrl.u32 %v5594_v44, 16  ;;  %4778 = vmatprep.subr.bf16.mxu1 %v4933_v1  ;;  %4661 = vmatprep.subr.bf16.mxu0 %v4933_v1  ;;  %v4935_v53 = vld [vmem:[%s5601_s17] sm:$0xff]  }
  0x6e   : >> { %v5619_v10 = vsel %vm715_vm2, %v830_v60, %v834_v51  ;;  %v856_v15 = vshll.u32 %v5605_v62, 16  ;;  %v5623_v16 = vpack.c.bf16 %v662_v47, %v661_v46  ;;  %v5628_v20 = vsel %vm715_vm2, %v806_v56, %v810_v48  ;;  %v667_v47 = vld [vmem:[#allocation2 + $0x150] sm:$0xff]  ;;  %v668_v48 = vld [vmem:[#allocation2 + $0x158] sm:$0xff]  ;;  %v670_v51 = vld [vmem:[#allocation2 + $0x168] sm:$0xff] }
  0x6f   : >> { %1032 = vrot.lane.b32.xlu0 %v5531_v37, %s5080_s22  ;;  %918 = vrot.lane.b32.xlu1 %v5585_v27, %s5080_s22  ;;  %7272 = vst [vmem:[#allocation7_spill] sm:$0xff] %v5619_v10  ;;  %v853_v19 = vrot.slane %v851_v6, 1  ;;  %v818_v24 = vor.u32 %v817_v59, %v813_v42  ;;  %v822_v13 = vrot.slane %v820_v49, 1  ;;  %v5630_v25 = vpack.c.bf16 %v665_v55, %v664_v54  ;;  %v669_v55 = vld [vmem:[#allocation2 + $0x160] sm:$0x3]  ;;  %v4936_v56 = vld [vmem:[%s5601_s17 + $0x48] sm:$0xff]  }
  0x70   : >> { %4679 = vmatprep.mubr.msk.bf16.mxu1 %vm278_vm0, %v5619_v10  ;;  %v842_v30 = vor.u32 %v841_v4, %v837_v2  ;;  %v846_v33 = vrot.slane %v844_v5, 1  ;;  %v5637_v35 = vpack.c.bf16 %v663_v63, %v663_v63  ;;  %v863_v42 = vshll.u32 %v5623_v16, 16  ;;  %4782 = vmatpush3.bf16.msra.mxu1 %v4933_v1  ;;  %v671_v4 = vld [vmem:[#allocation2 + $0x170] sm:$0xff] }
  0x71   : >> { %v854_v45 = vor.u32 %v853_v19, %v849_v11  ;;  %v858_v46 = vrot.slane %v856_v15, 1  ;;  %v5640_v49 = vpack.c.bf16 %v666_v8, %v666_v8  ;;  %v875_v34 = vshll.u32 %v5630_v25, 16  ;;  %4167 = vmatprep.subr.bf16.mxu1 %v4934_v26  ;;  %4662 = vmatpush3.bf16.msra.mxu0 %v4933_v1  ;;  %v672_v15 = vld [vmem:[#allocation2 + $0x178] sm:$0x3]  ;;  %v4937_v19 = vld [vmem:[%s5601_s17 + $0x8] sm:$0xff]   ;;  %v4938_v26 = vld [vmem:[%s5601_s17 + $0x50] sm:$0xff]  }
  0x72   : >> { %v5645_v54 = vsel %vm715_vm2, %v818_v24, %v822_v13  ;;  %v5653_v59 = vsel %vm715_vm2, %v842_v30, %v846_v33  ;;  %v861_v60 = vshrl.u32 %v5623_v16, 16  ;;  %v865_v63 = vrot.slane %v863_v42, 1  ;;  %v673_v13 = vld [vmem:[#allocation2 + $0x180] sm:$0xff]  ;;  %v674_v42 = vld [vmem:[#allocation2 + $0x188] sm:$0xff] }
  0x73   : >> { %1034 = vrot.lane.b32.xlu0 %v5533_v38, %s5080_s22  ;;  %920 = vrot.lane.b32.xlu1 %v5616_v9, %s5080_s22  ;;  %v868_v2 = vshll.u32 %v5637_v35, 16  ;;  %v5658_v5 = vsel %vm715_vm2, %v854_v45, %v858_v46  ;;  %v873_v1 = vshrl.u32 %v5630_v25, 16  ;;  %v877_v6 = vrot.slane %v875_v34, 1 }
  0x74   : >> { %v880_v8 = vshll.u32 %v5640_v49, 16  ;;  %4680 = vmatmul.mubr.msk.bf16.vlgmr.msra.gmra.mrb[0].mxu1 %vm278_vm0, %v5653_v59  ;;  %v5664_v11 = vpack.c.bf16 %v668_v48, %v667_v47  ;;  %v5669_v24 = vpack.c.bf16 %v671_v4, %v670_v51  ;;  %4664 = vmatmul.mubr.msk.bf16.vlgmr.msra.gmra.mrb[0].mxu0 %vm278_vm0, %v5521_v29  ;;  %v866_v30 = vor.u32 %v865_v63, %v861_v60  ;;  %v4939_v47 = vld [vmem:[%s5601_s17 + $0x10] sm:$0xff]   ;;  %v4940_v60 = vld [vmem:[%s5601_s17 + $0x58] sm:$0xff]  }
  0x75   : >> { %4168 = vmatpush3.bf16.msra.mxu1 %v4935_v53  ;;  %4683 = vmatprep.mubr.msk.bf16.mxu1 %vm278_vm0, %v5658_v5  ;;  %v870_v33 = vrot.slane %v868_v2, 1  ;;  %v5678_v45 = vpack.c.bf16 %v669_v55, %v669_v55  ;;  %v878_v48 = vor.u32 %v877_v6, %v873_v1  ;;  %v5682_v51 = vpack.c.bf16 %v672_v15, %v672_v15  ;;  %v675_v55 = vld [vmem:[#allocation2 + $0x190] sm:$0x3] }
  0x76   : >> { %4169 = vmatprep.subr.bf16.mxu1 %v4936_v56  ;;  %v887_v46 = vshll.u32 %v5664_v11, 16  ;;  %v882_v34 = vrot.slane %v880_v8, 1  ;;  %v899_v53 = vshll.u32 %v5669_v24, 16  ;;  %4667 = vmatprep.mubr.msk.bf16.mxu0 %vm278_vm0, %v5549_v50  ;;  %v885_v56 = vshrl.u32 %v5664_v11, 16 }
  0x77   : >> { %1036 = vrot.lane.b32.xlu0 %v5556_v61, %s5080_s22  ;;  %922 = vrot.lane.b32.xlu1 %v5628_v20, %s5080_s22  ;;  %v5689_v63 = vpack.c.bf16 %v674_v42, %v673_v13  ;;  %v5696_v2 = vsel %vm715_vm2, %v866_v30, %v870_v33  ;;  %v892_v1 = vshll.u32 %v5678_v45, 16  ;;  %v897_v6 = vshrl.u32 %v5669_v24, 16  ;;  %v4941_v13 = vld [vmem:[%s5601_s17 + $0x18] sm:$0xff]   ;;  %v4942_v33 = vld [vmem:[%s5601_s17 + $0x60] sm:$0xff]  }
  0x78   : >> { %v889_v4 = vrot.slane %v887_v46, 1  ;;  %v5701_v8 = vsel %vm715_vm2, %v878_v48, %v882_v34  ;;  %v901_v15 = vrot.slane %v899_v53, 1  ;;  %v4943_v34 = vld [vmem:[%s5601_s17 + $0x20] sm:$0xff]  }
  0x79   : >> { %4170 = vmatpush3.bf16.msra.mxu1 %v4937_v19  ;;  %v904_v19 = vshll.u32 %v5682_v51, 16  ;;  %v1057_v30 = vshll.u32 %v5689_v63, 16  ;;  %v894_v46 = vrot.slane %v892_v1, 1  ;;  %v1055_v53 = vshrl.u32 %v5689_v63, 16  ;;  %v4945_v1 = vld [vmem:[%s5601_s17 + $0x28] sm:$0xff]  }
  0x7a   : >> { %4171 = vmatprep.subr.bf16.mxu1 %v4938_v26  ;;  %v5709_v26 = vpack.c.bf16 %v675_v55, %v675_v55  ;;  %v890_v42 = vor.u32 %v889_v4, %v885_v56  ;;  %v4944_v56 = vld [vmem:[%s5601_s17 + $0x68] sm:$0xff]  }
  0x7b   : >> { %1038 = vrot.lane.b32.xlu0 %v5569_v14, %s5080_s22  ;;  %924 = vrot.lane.b32.xlu1 %v5645_v54, %s5080_s22  ;;  %v906_v48 = vrot.slane %v904_v19, 1 }
  0x7c   : >> { %4684 = vmatmul.mubr.msk.bf16.gmra.mrb[4].mxu1 %vm278_vm0, %v5696_v2  ;;  %4668 = vmatmul.mubr.msk.bf16.gmra.mrb[4].mxu0 %vm278_vm0, %v5567_v12  ;;  %v1062_v55 = vshll.u32 %v5709_v26, 16  ;;  %v5731_v4 = vsel %vm715_vm2, %v890_v42, %v894_v46  ;;  %v4955_v42 = vld [vmem:[%s5601_s17 + $0x88] sm:$0xff]  }
  0x7d   : >> { %4172 = vmatpush3.bf16.msra.mxu1 %v4939_v47  ;;  %4687 = vmatprep.mubr.msk.bf16.mxu1 %vm278_vm0, %v5701_v8  ;;  %v902_v47 = vor.u32 %v901_v15, %v897_v6  ;;  %v4952_v15 = vld [vmem:[%s5601_s17 + $0x80] sm:$0xff]  }
  0x7e   : >> { %4173 = vmatprep.subr.bf16.mxu1 %v4940_v60  ;;  %4671 = vmatprep.mubr.msk.bf16.mxu0 %vm278_vm0, %v5585_v27  ;;  %v1059_v60 = vrot.slane %v1057_v30, 1  ;;  %v4954_v30 = vld [vmem:[%s5601_s17 + $0xc8] sm:$0xff]  }
  0x7f   : >> { %1040 = vrot.lane.b32.xlu0 %v5587_v28, %s5080_s22  ;;  %926 = vrot.lane.b32.xlu1 %v5619_v10, %s5080_s22  ;;  %v4951_v10 = vld [vmem:[%s5601_s17 + $0xc0] sm:$0xff]   ;;  %v5735_v6 = vsel %vm715_vm2, %v902_v47, %v906_v48  ;;  %v4956_v47 = vld [vmem:[%s5601_s17 + $0xd0] sm:$0xff]  }
  0x80   : >> { %7273 = vst [vmem:[#allocation8_spill] sm:$0xff] %v5735_v6  ;;  %4279 = vmatprep.subr.bf16.mxu0 %v4951_v10  ;;  %v1060_v19 = vor.u32 %v1059_v60, %v1055_v53  ;;  %v4947_v10 = vld [vmem:[%s5601_s17 + $0x30] sm:$0xff]   ;;  %v4948_v48 = vld [vmem:[%s5601_s17 + $0x78] sm:$0xff]  }
  0x81   : >> { %4174 = vmatpush3.bf16.msra.mxu1 %v4941_v13  ;;  %v1064_v13 = vrot.slane %v1062_v55, 1  ;;  %4280 = vmatpush3.bf16.msra.mxu0 %v4952_v15  ;;  %v4957_v53 = vld [vmem:[%s5601_s17 + $0x90] sm:$0xff]   ;;  %v4958_v60 = vld [vmem:[%s5601_s17 + $0xd8] sm:$0xff]   ;;  %v5769_v55 = vld [vmem:[%s5601_s17 + $0x100] sm:$0xff]   ;;  %v979_v15 = vrot.slane %v5482_v43, 1 }
  0x82   : >> { %4175 = vmatprep.subr.bf16.mxu1 %v4942_v33  ;;  %v4946_v33 = vld [vmem:[%s5601_s17 + $0x70] sm:$0xff]   ;;  %4281 = vmatprep.subr.bf16.mxu0 %v4954_v30  ;;  %v4960_v30 = vld [vmem:[%s5601_s17 + $0xe0] sm:$0xff]  }
  0x83   : >> { %1042 = vrot.lane.b32.xlu0 %v5594_v44, %s5080_s22  ;;  %928 = vrot.lane.b32.xlu1 %v5653_v59, %s5080_s22  ;;  %v5755_v46 = vsel %vm715_vm2, %v1060_v19, %v1064_v13  ;;  %v980_v19 = vrot.slane %v5493_v57, 1  ;;  %v4959_v13 = vld [vmem:[%s5601_s17 + $0x98] sm:$0xff]   ;;  %v985_v57 = vrot.slane %v5503_v7, 1 }
  0x84   : >> { %4688 = vmatmul.mubr.msk.bf16.gmra.mrb[8].mxu1 %vm278_vm0, %v5731_v4  ;;  %4672 = vmatmul.mubr.msk.bf16.gmra.mrb[8].mxu0 %vm278_vm0, %v5616_v9  ;;  %7274 = vst [vmem:[#allocation9_spill] sm:$0xff] %v5755_v46 }
  0x85   : >> { %4176 = vmatpush3.bf16.msra.mxu1 %v4943_v34  ;;  %4691 = vmatprep.mubr.msk.bf16.mxu1 %vm278_vm0, %v5735_v6  ;;  %v4949_v34 = vld [vmem:[%s5601_s17 + $0x38] sm:$0xff]  }
  0x86   : >> { %4177 = vmatprep.subr.bf16.mxu1 %v4944_v56  ;;  %4675 = vmatprep.mubr.msk.bf16.mxu0 %vm278_vm0, %v5628_v20  ;;  %v976_v56 = vrot.slane %v5474_v36, 1 }
  0x87   : >> { %1044 = vrot.lane.b32.xlu0 %v5623_v16, %s5080_s22  ;;  %930 = vrot.lane.b32.xlu1 %v5658_v5, %s5080_s22 }
  0x88   : >> { %4282 = vmatpush3.bf16.msra.mxu0 %v4955_v42  ;;  %v4961_v42 = vld [vmem:[%s5601_s17 + $0xa0] sm:$0xff]  }
  0x89   : >> { %4178 = vmatpush3.bf16.msra.mxu1 %v4945_v1  ;;  %4283 = vmatprep.subr.bf16.mxu0 %v4956_v47  ;;  %v977_v1 = vrot.slane %v5489_v52, 1  ;;  %v983_v52 = vrot.slane %v5501_v3, 1 }
  0x8a   : >> { %4179 = vmatprep.subr.bf16.mxu1 %v4946_v33  ;;  %v982_v33 = vrot.slane %v5498_v0, 1 }
  0x8b   : >> { %1046 = vrot.lane.b32.xlu0 %v5630_v25, %s5080_s22  ;;  %932 = vrot.lane.b32.xlu1 %v5696_v2, %s5080_s22  ;;  %v5794_v47 = vsel %vm972_vm3, %v976_v56, %v977_v1  ;;  %v991_v56 = vrot.slane %v5531_v37, 1  ;;  %v992_v1 = vrot.slane %v5535_v39, 1 }
  0x8c   : >> { %4692 = vmatmul.mubr.msk.bf16.gmra.mrb[12].mxu1 %vm278_vm0, %v5755_v46  ;;  %4676 = vmatmul.mubr.msk.bf16.gmra.mrb[12].mxu0 %vm278_vm0, %v5645_v54  ;;  %v5805_v3 = vsel %vm972_vm3, %v982_v33, %v983_v52  ;;  %v997_v33 = vrot.slane %v5556_v61, 1  ;;  %v998_v52 = vrot.slane %v5572_v18, 1  ;;  %v1001_v18 = vrot.slane %v5575_v22, 1 }
  0x8d   : >> { %4180 = vmatpush3.bf16.msra.mxu1 %v4947_v10  ;;  %4284 = vmatpush3.bf16.msra.mxu0 %v4957_v53  ;;  %v986_v10 = vrot.slane %v5512_v21, 1  ;;  %v988_v21 = vrot.slane %v5517_v23, 1  ;;  %v5826_v39 = vsel %vm972_vm3, %v991_v56, %v992_v1  ;;  %v4967_v56 = vld [vmem:[%s5601_s17 + $0xb8] sm:$0xff]   ;;  %v1009_v22 = vrot.slane %v5623_v16, 1 }
  0x8e   : >> { %4181 = vmatprep.subr.bf16.mxu1 %v4948_v48  ;;  %4285 = vmatprep.subr.bf16.mxu0 %v4958_v60  ;;  %v5797_v48 = vsel %vm972_vm3, %v979_v15, %v980_v19  ;;  %v989_v60 = vrot.slane %v5525_v32, 1  ;;  %v4963_v15 = vld [vmem:[%s5601_s17 + $0xa8] sm:$0xff]   ;;  %v4964_v19 = vld [vmem:[%s5601_s17 + $0xf0] sm:$0xff]   ;;  %v995_v32 = vrot.slane %v5553_v58, 1  ;;  %v676_v1 = vld [vmem:[#allocation2 + $0x198] sm:$0xff] }
  0x8f   : >> { %1048 = vrot.lane.b32.xlu0 %v5664_v11, %s5080_s22  ;;  %934 = vrot.lane.b32.xlu1 %v5701_v8, %s5080_s22  ;;  %v5809_v53 = vsel %vm972_vm3, %v985_v57, %v986_v10  ;;  %v4965_v57 = vld [vmem:[%s5601_s17 + $0xb0] sm:$0xff]   ;;  %v4966_v10 = vld [vmem:[%s5601_s17 + $0xf8] sm:$0xff]  }
  0x91   : >> { %4182 = vmatpush3.bf16.msra.mxu1 %v4949_v34  ;;  %4286 = vmatpush3.bf16.msra.mxu0 %v4959_v13  ;;  %v4962_v34 = vld [vmem:[%s5601_s17 + $0xe8] sm:$0xff]   ;;  %v994_v13 = vrot.slane %v5533_v38, 1 }
  0x92   : >> { %4695 = vmatprep.subr.bf16.mxu1 %v5769_v55  ;;  %4287 = vmatprep.subr.bf16.mxu0 %v4960_v30  ;;  %v5823_v30 = vsel %vm972_vm3, %v988_v21, %v989_v60  ;;  %v1003_v21 = vrot.slane %v5587_v28, 1  ;;  %v1004_v60 = vrot.slane %v5590_v31, 1 }
  0x93   : >> { %1050 = vrot.lane.b32.xlu0 %v5669_v24, %s5080_s22  ;;  %936 = vrot.lane.b32.xlu1 %v5731_v4, %s5080_s22  ;;  %v5837_v58 = vsel %vm972_vm3, %v994_v13, %v995_v32  ;;  %v1007_v13 = vrot.slane %v5605_v62, 1  ;;  %v1010_v32 = vrot.slane %v5637_v35, 1 }
  0x95   : >> { %4288 = vmatpush3.bf16.msra.mxu0 %v4961_v42  ;;  %v1000_v42 = vrot.slane %v5569_v14, 1  ;;  %v5871_v35 = vsel %vm972_vm3, %v1009_v22, %v1010_v32 }
  0x96   : >> { %4289 = vmatprep.subr.bf16.mxu0 %v4962_v34  ;;  %v5841_v34 = vsel %vm972_vm3, %v997_v33, %v998_v52  ;;  %v5859_v33 = vsel %vm972_vm3, %v1003_v21, %v1004_v60  ;;  %v1016_v21 = vrot.slane %v5678_v45, 1 }
  0x97   : >> { %1052 = vrot.lane.b32.xlu0 %v5689_v63, %s5080_s22  ;;  %938 = vrot.lane.b32.xlu1 %v5735_v6, %s5080_s22  ;;  %v5856_v31 = vsel %vm972_vm3, %v1000_v42, %v1001_v18  ;;  %v1013_v42 = vrot.slane %v5640_v49, 1  ;;  %v1015_v18 = vrot.slane %v5664_v11, 1  ;;  %v1019_v49 = vrot.slane %v5682_v51, 1 }
  0x98   : >> { %v1067_v51 = vrot.slane %v5689_v63, 1 }
  0x99   : >> { %4290 = vmatpush3.bf16.msra.mxu0 %v4963_v15  ;;  %v677_v15 = vld [vmem:[#allocation2 + $0x1a0] sm:$0xff] }
  0x9a   : >> { %4291 = vmatprep.subr.bf16.mxu0 %v4964_v19  ;;  %v1006_v19 = vrot.slane %v5594_v44, 1  ;;  %v5861_v52 = vpack.c.bf16 %v677_v15, %v676_v1  ;;  %v1018_v15 = vrot.slane %v5669_v24, 1 }
  0x9b   : >> { %1070 = vrot.lane.b32.xlu0 %v5794_v47, %s5080_s22  ;;  %1072 = vrot.lane.b32.xlu1 %v5797_v48, %s5080_s22 }
  0x9c   : >> { %7275 = vst [vmem:[#allocation10_spill] sm:$0xff] %v5861_v52  ;;  %v5868_v62 = vsel %vm972_vm3, %v1006_v19, %v1007_v13  ;;  %v5890_v19 = vsel %vm972_vm3, %v1015_v18, %v1016_v21  ;;  %v1103_v45 = vshrl.u32 %v5861_v52, 16  ;;  %v5899_v32 = vsel %vm972_vm3, %v1018_v15, %v1019_v49 }
  0x9d   : >> { %4292 = vmatpush3.bf16.msra.mxu0 %v4965_v57  ;;  %v678_v57 = vld [vmem:[#allocation2 + $0x1a8] sm:$0x3] }
  0x9e   : >> { %4293 = vmatprep.subr.bf16.mxu0 %v4966_v10  ;;  %v1012_v10 = vrot.slane %v5630_v25, 1  ;;  %v5877_v60 = vpack.c.bf16 %v678_v57, %v678_v57 }
  0x9f   : >> { %1074 = vrot.lane.b32.xlu0 %v5805_v3, %s5080_s22  ;;  %1076 = vrot.lane.b32.xlu1 %v5809_v53, %s5080_s22 }
  0xa0   : >> { %7276 = vst [vmem:[#allocation11_spill] sm:$0xff] %v5877_v60  ;;  %v5885_v1 = vsel %vm972_vm3, %v1012_v10, %v1013_v42  ;;  %v1110_v22 = vshll.u32 %v5877_v60, 16  ;;  %v1068_v42 = vrot.slane %v5709_v26, 1  ;;  %v974_v26 = vrot.slane %v5478_v41, 1 }
  0xa1   : >> { %4294 = vmatpush3.bf16.msra.mxu0 %v4967_v56  ;;  %v1105_v56 = vshll.u32 %v5861_v52, 16 }
  0xa2   : >> { %v1112_v10 = vrot.slane %v1110_v22, 1  ;;  %v5909_v21 = vsel %vm972_vm3, %v1067_v51, %v1068_v42  ;;  %v4953_v51 = vld [vmem:[%s5601_s17 + $0x108] sm:$0xff]  }
  0xa3   : >> { %1078 = vrot.lane.b32.xlu0 %v5823_v30, %s5080_s22  ;;  %1080 = vrot.lane.b32.xlu1 %v5826_v39, %s5080_s22  ;;  %v1107_v13 = vrot.slane %v1105_v56, 1  ;;  %7277 = vst [vmem:[#allocation12_spill] sm:$0xff] %v5909_v21  ;;  %v973_v56 = vrot.slane %v5476_v40, 1 }
  0xa5   : >> { %v1108_v57 = vor.u32 %v1107_v13, %v1103_v45  ;;  %v975_v15 = vsel %vm972_vm3, %v973_v56, %v974_v26  ;;  %v4968_v56 = vld [vmem:[%s5601_s17 + $0x110] sm:$0xff]  }
  0xa7   : >> { %1082 = vrot.lane.b32.xlu0 %v5837_v58, %s5080_s22  ;;  %1084 = vrot.lane.b32.xlu1 %v5841_v34, %s5080_s22  ;;  %v1113_v18 = vsel %vm715_vm2, %v1108_v57, %v1112_v10 }
  0xab   : >> { %1086 = vrot.lane.b32.xlu0 %v5856_v31, %s5080_s22  ;;  %1088 = vrot.lane.b32.xlu1 %v5859_v33, %s5080_s22 }
  0xaf   : >> { %1090 = vrot.lane.b32.xlu0 %v5868_v62, %s5080_s22  ;;  %1092 = vrot.lane.b32.xlu1 %v5871_v35, %s5080_s22 }
  0xb3   : >> { %1094 = vrot.lane.b32.xlu0 %v5885_v1, %s5080_s22  ;;  %1096 = vrot.lane.b32.xlu1 %v5890_v19, %s5080_s22 }
  0xb7   : >> { %1114 = vrot.lane.b32.xlu0 %v5755_v46, %s5080_s22  ;;  %1098 = vrot.lane.b32.xlu1 %v5899_v32, %s5080_s22 }
  0xbb   : >> { %1116 = vrot.lane.b32.xlu0 %v1113_v18, %s5080_s22  ;;  %1100 = vrot.lane.b32.xlu1 %v5909_v21, %s5080_s22 }
  0xc9   : >> { %v1023_v49 = vpop.permute.xlu0 %1022 }
  0xca   : >> { %v1173_v45 = vsel %vm278_vm0, %v975_v15, %v1023_v49 }
  0xcb   : >> { %1816 = vmatprep.mubr.bf16.mxu1 %v1173_v45  ;;  %v1025_v13 = vpop.permute.xlu1 %1024 }
  0xcc   : >> { %v1177_v57 = vsel %vm278_vm0, %v5794_v47, %v1025_v13 }
  0xd1   : >> { %v909_v22 = vpop.permute.xlu0 %908  ;;  %v911_v10 = vpop.permute.xlu1 %910 }
  0xd2   : >> { %v1124_v42 = vsel %vm278_vm0, %v5476_v40, %v909_v22  ;;  %v1127_v47 = vsel %vm278_vm0, %v5474_v36, %v911_v10 }
  0xd3   : >> { %1817 = vmatmul.mubr.bf16.vlgmr.msra.gmra.mrb[16].mxu1 %v1124_v42 }
  0xd4   : >> { %4696 = vmatpush3.bf16.msra.mxu1 %v5769_v55  ;;  %1824 = vmatprep.mubr.bf16.mxu1 %v1177_v57  ;;  %v4969_v55 = vld [vmem:[%s5601_s17 + $0x118] sm:$0xff]  }
  0xd5   : >> { %v1027_v41 = vpop.permute.xlu0 %1026  ;;  %v913_v18 = vpop.permute.xlu1 %912  ;;  %4697 = vmatprep.subr.bf16.mxu1 %v4953_v51 }
  0xd6   : >> { %v1130_v26 = vsel %vm278_vm0, %v5482_v43, %v913_v18  ;;  %v1181_v40 = vsel %vm278_vm0, %v5797_v48, %v1027_v41 }
  0xd7   : >> { %1977 = vmatprep.mubr.bf16.mxu0 %v1130_v26 }
  0xd8   : >> { %4698 = vmatpush3.bf16.msra.mxu1 %v4953_v51 }
  0xd9   : >> { %v1029_v15 = vpop.permute.xlu0 %1028  ;;  %v915_v49 = vpop.permute.xlu1 %914  ;;  %4699 = vmatprep.subr.bf16.mxu1 %v4968_v56 }
  0xda   : >> { %v1185_v43 = vsel %vm278_vm0, %v5805_v3, %v1029_v15  ;;  %v1133_v51 = vsel %vm278_vm0, %v5498_v0, %v915_v49 }
  0xdb   : >> { %1825 = vmatmul.mubr.bf16.gmra.mrb[20].mxu1 %v1127_v47 }
  0xdc   : >> { %1832 = vmatprep.mubr.bf16.mxu1 %v1181_v40  ;;  %4700 = vmatpush3.bf16.msra.mxu1 %v4968_v56 }
  0xdd   : >> { %v1031_v45 = vpop.permute.xlu0 %1030  ;;  %v917_v13 = vpop.permute.xlu1 %916  ;;  %4701 = vmatprep.subr.bf16.mxu1 %v4969_v55 }
  0xde   : >> { %v1189_v42 = vsel %vm278_vm0, %v5809_v53, %v1031_v45  ;;  %v1136_v40 = vsel %vm278_vm0, %v5503_v7, %v917_v13 }
  0xe0   : >> { %4702 = vmatpush3.bf16.msra.mxu1 %v4969_v55 }
  0xe1   : >> { %v1033_v22 = vpop.permute.xlu0 %1032  ;;  %v919_v36 = vpop.permute.xlu1 %918 }
  0xe2   : >> { %v1139_v45 = vsel %vm278_vm0, %v5517_v23, %v919_v36 }
  0xe3   : >> { %1833 = vmatmul.mubr.bf16.gmra.mrb[24].mxu1 %v1130_v26  ;;  %v1193_v26 = vsel %vm278_vm0, %v5823_v30, %v1033_v22 }
  0xe4   : >> { %1840 = vmatprep.mubr.bf16.mxu1 %v1185_v43 }
  0xe5   : >> { %v1035_v57 = vpop.permute.xlu0 %1034  ;;  %v921_v10 = vpop.permute.xlu1 %920 }
  0xe6   : >> { %v1197_v43 = vsel %vm278_vm0, %v5826_v39, %v1035_v57  ;;  %v1142_v22 = vsel %vm278_vm0, %v5531_v37, %v921_v10 }
  0xe9   : >> { %v1037_v41 = vpop.permute.xlu0 %1036  ;;  %v923_v18 = vpop.permute.xlu1 %922 }
  0xea   : >> { %v1145_v57 = vsel %vm278_vm0, %v5533_v38, %v923_v18 }
  0xeb   : >> { %1841 = vmatmul.mubr.bf16.gmra.mrb[28].mxu1 %v1133_v51 }
  0xec   : >> { %1848 = vmatprep.mubr.bf16.mxu1 %v1189_v42 }
  0xed   : >> { %v1039_v56 = vpop.permute.xlu0 %1038  ;;  %v925_v47 = vpop.permute.xlu1 %924 }
  0xf1   : >> { %v1041_v15 = vpop.permute.xlu0 %1040  ;;  %v927_v55 = vpop.permute.xlu1 %926 }
  0xf3   : >> { %1849 = vmatmul.mubr.bf16.gmra.mrb[32].mxu1 %v1136_v40 }
  0xf4   : >> { %1856 = vmatprep.mubr.bf16.mxu1 %v1193_v26  ;;  %v1201_v26 = vsel %vm278_vm0, %v5837_v58, %v1037_v41  ;;  %v1148_v41 = vsel %vm278_vm0, %v5556_v61, %v925_v47 }
  0xf5   : >> { %v1043_v0 = vpop.permute.xlu0 %1042  ;;  %v929_v49 = vpop.permute.xlu1 %928 }
  0xf9   : >> { %v1045_v42 = vpop.permute.xlu0 %1044  ;;  %v931_v60 = vpop.permute.xlu1 %930 }
  0xfb   : >> { %1857 = vmatmul.mubr.bf16.gmra.mrb[36].mxu1 %v1139_v45 }
  0xfc   : >> { %1864 = vmatprep.mubr.bf16.mxu1 %v1197_v43  ;;  %v1205_v43 = vsel %vm278_vm0, %v5841_v34, %v1039_v56  ;;  %v1151_v56 = vsel %vm278_vm0, %v5569_v14, %v927_v55 }
  0xfd   : >> { %v1047_v7 = vpop.permute.xlu0 %1046  ;;  %v933_v13 = vpop.permute.xlu1 %932 }
  0xfe   : >> { %v1160_v55 = vsel %vm278_vm0, %v5623_v16, %v933_v13 }
 0x101   : >> { %v1049_v21 = vpop.permute.xlu0 %1048  ;;  %v935_v46 = vpop.permute.xlu1 %934 }
 0x103   : >> { %1865 = vmatmul.mubr.bf16.gmra.mrb[40].mxu1 %v1142_v22 }
 0x104   : >> { %1872 = vmatprep.mubr.bf16.mxu1 %v1201_v26  ;;  %v1209_v26 = vsel %vm278_vm0, %v5856_v31, %v1041_v15 }
 0x105   : >> { %v1051_v23 = vpop.permute.xlu0 %1050  ;;  %v937_v36 = vpop.permute.xlu1 %936 }
 0x109   : >> { %v1053_v52 = vpop.permute.xlu0 %1052  ;;  %v939_v6 = vpop.permute.xlu1 %938 }
 0x10b   : >> { %1873 = vmatmul.mubr.bf16.gmra.mrb[44].mxu1 %v1145_v57 }
 0x10c   : >> { %1880 = vmatprep.mubr.bf16.mxu1 %v1205_v43 }
 0x10d   : >> { %v1071_v37 = vpop.permute.xlu0 %1070  ;;  %v1073_v38 = vpop.permute.xlu1 %1072 }
 0x10e   : >> { %v1237_v10 = vsel %vm278_vm0, %v5510_v17, %v1071_v37  ;;  %v1241_v18 = vsel %vm278_vm0, %v5521_v29, %v1073_v38  ;;  %v1213_v17 = vsel %vm278_vm0, %v5859_v33, %v1043_v0  ;;  %v1217_v29 = vsel %vm278_vm0, %v5868_v62, %v1045_v42 }
 0x10f   : >> { %1978 = vmatmul.mubr.bf16.vlgmr.msra.gmra.mrb[16].mxu0 %v1237_v10 }
 0x110   : >> { %1985 = vmatprep.mubr.bf16.mxu0 %v1133_v51  ;;  %v1154_v51 = vsel %vm278_vm0, %v5587_v28, %v929_v49 }
 0x111   : >> { %v1075_v43 = vpop.permute.xlu0 %1074  ;;  %v1077_v47 = vpop.permute.xlu1 %1076 }
 0x112   : >> { %v1245_v61 = vsel %vm278_vm0, %v5549_v50, %v1075_v43  ;;  %v1249_v14 = vsel %vm278_vm0, %v5567_v12, %v1077_v47  ;;  %v1221_v50 = vsel %vm278_vm0, %v5871_v35, %v1047_v7  ;;  %v1225_v12 = vsel %vm278_vm0, %v5885_v1, %v1049_v21 }
 0x113   : >> { %1881 = vmatmul.mubr.bf16.gmra.mrb[48].mxu1 %v1148_v41  ;;  %v1166_v21 = vsel %vm278_vm0, %v5664_v11, %v937_v36  ;;  %v7279_v11 = vld [vmem:[#allocation7_spill] sm:$0xff] }
 0x114   : >> { %1888 = vmatprep.mubr.bf16.mxu1 %v1209_v26 }
 0x115   : >> { %v1079_v15 = vpop.permute.xlu0 %1078  ;;  %v1081_v0 = vpop.permute.xlu1 %1080 }
 0x116   : >> { %v1253_v28 = vsel %vm278_vm0, %v5585_v27, %v1079_v15  ;;  %v1229_v27 = vsel %vm278_vm0, %v5890_v19, %v1051_v23 }
 0x117   : >> { %1986 = vmatmul.mubr.bf16.gmra.mrb[20].mxu0 %v1241_v18 }
 0x118   : >> { %1993 = vmatprep.mubr.bf16.mxu0 %v1136_v40  ;;  %v1157_v40 = vsel %vm278_vm0, %v5594_v44, %v931_v60  ;;  %v1257_v44 = vsel %vm278_vm0, %v5616_v9, %v1081_v0  ;;  %v1163_v60 = vsel %vm278_vm0, %v5630_v25, %v935_v46  ;;  %v1233_v9 = vsel %vm278_vm0, %v5899_v32, %v1053_v52  ;;  %v4970_v0 = vld [vmem:[%s6095_s23 + $0x40] sm:$0xff]  }
 0x119   : >> { %v1083_v49 = vpop.permute.xlu0 %1082  ;;  %v1169_v46 = vsel %vm278_vm0, %v5669_v24, %v939_v6  ;;  %4411 = vmatprep.subr.bf16.mxu0 %v4970_v0 }
 0x11a   : >> { %v1261_v16 = vsel %vm278_vm0, %v5628_v20, %v1083_v49 }
 0x11b   : >> { %1889 = vmatmul.mubr.bf16.gmra.mrb[52].mxu1 %v1151_v56 }
 0x11c   : >> { %1896 = vmatprep.mubr.bf16.mxu1 %v1213_v17  ;;  %v7295_v17 = vld [vmem:[#allocation8_spill] sm:$0xff] }
 0x11d   : >> { %v1087_v20 = vpop.permute.xlu0 %1086 }
 0x11e   : >> { %v1269_v7 = vsel %vm278_vm0, %v7279_v11, %v1087_v20 }
 0x11f   : >> { %1994 = vmatmul.mubr.bf16.gmra.mrb[24].mxu0 %v1245_v61 }
 0x120   : >> { %2001 = vmatprep.mubr.bf16.mxu0 %v1139_v45  ;;  %v1085_v45 = vpop.permute.xlu1 %1084 }
 0x121   : >> { %v1265_v25 = vsel %vm278_vm0, %v5645_v54, %v1085_v45 }
 0x123   : >> { %1897 = vmatmul.mubr.bf16.gmra.mrb[56].mxu1 %v1154_v51 }
 0x124   : >> { %1904 = vmatprep.mubr.bf16.mxu1 %v1217_v29  ;;  %v1089_v24 = vpop.permute.xlu1 %1088  ;;  %v7299_v29 = vld [vmem:[#allocation11_spill] sm:$0xff] }
 0x127   : >> { %2002 = vmatmul.mubr.bf16.gmra.mrb[28].mxu0 %v1249_v14 }
 0x128   : >> { %2009 = vmatprep.mubr.bf16.mxu0 %v1142_v22  ;;  %v1273_v22 = vsel %vm278_vm0, %v5653_v59, %v1089_v24 }
 0x12b   : >> { %1905 = vmatmul.mubr.bf16.gmra.mrb[60].mxu1 %v1157_v40 }
 0x12c   : >> { %1912 = vmatprep.mubr.bf16.mxu1 %v1221_v50 }
 0x12f   : >> { %2010 = vmatmul.mubr.bf16.gmra.mrb[32].mxu0 %v1253_v28 }
 0x130   : >> { %2017 = vmatprep.mubr.bf16.mxu0 %v1145_v57  ;;  %v1091_v57 = vpop.permute.xlu0 %1090 }
 0x131   : >> { %v1277_v59 = vsel %vm278_vm0, %v5658_v5, %v1091_v57 }
 0x133   : >> { %1913 = vmatmul.mubr.bf16.gmra.mrb[64].mxu1 %v1160_v55 }
 0x134   : >> { %1920 = vmatprep.mubr.bf16.mxu1 %v1225_v12  ;;  %v1095_v18 = vpop.permute.xlu0 %1094 }
 0x137   : >> { %2018 = vmatmul.mubr.bf16.gmra.mrb[36].mxu0 %v1257_v44 }
 0x138   : >> { %2025 = vmatprep.mubr.bf16.mxu0 %v1148_v41  ;;  %v1093_v41 = vpop.permute.xlu1 %1092 }
 0x139   : >> { %v1281_v5 = vsel %vm278_vm0, %v5696_v2, %v1093_v41 }
 0x13b   : >> { %1921 = vmatmul.mubr.bf16.gmra.mrb[68].mxu1 %v1163_v60 }
 0x13c   : >> { %1928 = vmatprep.mubr.bf16.mxu1 %v1229_v27  ;;  %v1097_v2 = vpop.permute.xlu1 %1096  ;;  %v4971_v27 = vld [vmem:[%s6095_s23] sm:$0xff]  }
 0x13d   : >> { %4412 = vmatpush3.bf16.msra.mxu0 %v4971_v27 }
 0x13f   : >> { %2026 = vmatmul.mubr.bf16.gmra.mrb[40].mxu0 %v1261_v16  ;;  %v2332_v16 = vld [vmem:[#allocation3] sm:$0xff] }
 0x140   : >> { %2033 = vmatprep.mubr.bf16.mxu0 %v1151_v56  ;;  %v1289_v56 = vsel %vm278_vm0, %v5731_v4, %v1097_v2  ;;  %v7296_v4 = vld [vmem:[#allocation10_spill] sm:$0xff] }
 0x143   : >> { %1929 = vmatmul.mubr.bf16.gmra.mrb[72].mxu1 %v1166_v21 }
 0x144   : >> { %1936 = vmatprep.mubr.bf16.mxu1 %v1233_v9  ;;  %v2334_v9 = vld [vmem:[#allocation3 + $0x10] sm:$0x3] }
 0x147   : >> { %2034 = vmatmul.mubr.bf16.gmra.mrb[44].mxu0 %v1265_v25  ;;  %v6000_v42 = vpop.f32.mrb[0].mxu1 }
 0x148   : >> { %2041 = vmatprep.mubr.bf16.mxu0 %v1154_v51  ;;  %7278 = vst [vmem:[#allocation13_spill] sm:$0xff] %v6000_v42  ;;  %v6006_v52 = vpop.f32.mrb[1].mxu1  ;;  %v1120_v51 = vrot.slane %v7296_v4, 1 }
 0x149   : >> { %7280 = vst [vmem:[#allocation7_spill] sm:$0xff] %v6006_v52  ;;  %v6008_v13 = vpop.f32.mrb[2].mxu1 }
 0x14a   : >> { %7281 = vst [vmem:[#allocation14_spill] sm:$0xff] %v6008_v13  ;;  %v6010_v54 = vpop.f32.mrb[3].mxu1 }
 0x14b   : >> { %1937 = vmatmul.mubr.bf16.gmra.mrb[76].mxu1 %v1169_v46  ;;  %7282 = vst [vmem:[#allocation15_spill] sm:$0xff] %v6010_v54 }
 0x14c   : >> { %4703 = vmatprep.mubr.msk.bf16.mxu1 %vm278_vm0, %v5797_v48 }
 0x14f   : >> { %2042 = vmatmul.mubr.bf16.gmra.mrb[48].mxu0 %v1269_v7  ;;  %v6014_v6 = vpop.f32.mrb[4].mxu1 }
 0x150   : >> { %2049 = vmatprep.mubr.bf16.mxu0 %v1157_v40  ;;  %7283 = vst [vmem:[#allocation16_spill] sm:$0xff] %v6014_v6  ;;  %v6020_v48 = vpop.f32.mrb[5].mxu1 }
 0x151   : >> { %7284 = vst [vmem:[#allocation17_spill] sm:$0xff] %v6020_v48  ;;  %v6022_v23 = vpop.f32.mrb[6].mxu1 }
 0x152   : >> { %7285 = vst [vmem:[#allocation18_spill] sm:$0xff] %v6022_v23  ;;  %v6024_v36 = vpop.f32.mrb[7].mxu1 }
 0x153   : >> { %4704 = vmatmul.mubr.msk.bf16.vlgmr.msra.gmra.mrb[80].mxu1 %vm278_vm0, %v5805_v3  ;;  %7286 = vst [vmem:[#allocation19_spill] sm:$0xff] %v6024_v36  ;;  %v2384_v36 = vld [vmem:[#allocation3 + $0x1a0] sm:$0xff] }
 0x154   : >> { %4707 = vmatprep.mubr.msk.bf16.mxu1 %vm278_vm0, %v5809_v53 }
 0x157   : >> { %2050 = vmatmul.mubr.bf16.gmra.mrb[52].mxu0 %v1273_v22  ;;  %v6028_v3 = vpop.f32.mrb[8].mxu1 }
 0x158   : >> { %2057 = vmatprep.mubr.bf16.mxu0 %v1160_v55  ;;  %7287 = vst [vmem:[#allocation20_spill] sm:$0xff] %v6028_v3  ;;  %v6034_v53 = vpop.f32.mrb[9].mxu1 }
 0x159   : >> { %7288 = vst [vmem:[#allocation21_spill] sm:$0xff] %v6034_v53  ;;  %v6036_v37 = vpop.f32.mrb[10].mxu1 }
 0x15a   : >> { %7289 = vst [vmem:[#allocation22_spill] sm:$0xff] %v6036_v37  ;;  %v6038_v10 = vpop.f32.mrb[11].mxu1 }
 0x15b   : >> { %4708 = vmatmul.mubr.msk.bf16.gmra.mrb[84].mxu1 %vm278_vm0, %v5823_v30  ;;  %7290 = vst [vmem:[#allocation23_spill] sm:$0xff] %v6038_v10 }
 0x15c   : >> { %4711 = vmatprep.mubr.msk.bf16.mxu1 %vm278_vm0, %v5826_v39 }
 0x15f   : >> { %2058 = vmatmul.mubr.bf16.gmra.mrb[56].mxu0 %v1277_v59  ;;  %v6042_v30 = vpop.f32.mrb[12].mxu1 }
 0x160   : >> { %2065 = vmatprep.mubr.bf16.mxu0 %v1163_v60  ;;  %7291 = vst [vmem:[#allocation24_spill] sm:$0xff] %v6042_v30  ;;  %v6048_v39 = vpop.f32.mrb[13].mxu1 }
 0x161   : >> { %7292 = vst [vmem:[#allocation25_spill] sm:$0xff] %v6048_v39  ;;  %v6050_v26 = vpop.f32.mrb[14].mxu1 }
 0x162   : >> { %7293 = vst [vmem:[#allocation26_spill] sm:$0xff] %v6050_v26  ;;  %v6052_v38 = vpop.f32.mrb[15].mxu1  ;;  %v4986_v26 = vld [vmem:[%s6095_s23 + $0xc0] sm:$0xff]  }
 0x163   : >> { %4712 = vmatmul.mubr.msk.bf16.gmra.mrb[88].mxu1 %vm278_vm0, %v5837_v58  ;;  %7294 = vst [vmem:[#allocation27_spill] sm:$0xff] %v6052_v38  ;;  %v1285_v58 = vsel %vm278_vm0, %v5701_v8, %v1095_v18  ;;  %v1099_v8 = vpop.permute.xlu1 %1098  ;;  %4523 = vmatprep.subr.bf16.mxu1 %v4986_v26 }
 0x164   : >> { %4715 = vmatprep.mubr.msk.bf16.mxu1 %vm278_vm0, %v5841_v34  ;;  %v1115_v34 = vpop.permute.xlu0 %1114  ;;  %v1293_v43 = vsel %vm278_vm0, %v7295_v17, %v1099_v8  ;;  %v4973_v8 = vld [vmem:[%s6095_s23 + $0x8] sm:$0xff]  }
 0x167   : >> { %2066 = vmatmul.mubr.bf16.gmra.mrb[60].mxu0 %v1281_v5 }
 0x168   : >> { %2073 = vmatprep.mubr.bf16.mxu0 %v1166_v21  ;;  %v2333_v21 = vld [vmem:[#allocation3 + $0x8] sm:$0xff] }
 0x169   : >> { %v6103_v25 = vpack.c.bf16 %v2333_v21, %v2332_v16 }
 0x16b   : >> { %4716 = vmatmul.mubr.msk.bf16.gmra.mrb[92].mxu1 %vm278_vm0, %v5856_v31  ;;  %v1300_v31 = vsel %vm278_vm0, %v5689_v63, %v1115_v34  ;;  %v7297_v63 = vld [vmem:[#allocation9_spill] sm:$0xff]  ;;  %v2423_v20 = vshrl.u32 %v6103_v25, 16  ;;  %v2425_v11 = vshll.u32 %v6103_v25, 16 }
 0x16c   : >> { %4719 = vmatprep.mubr.msk.bf16.mxu1 %vm278_vm0, %v5859_v33  ;;  %v1117_v33 = vpop.permute.xlu0 %1116 }
 0x16d   : >> { %v2427_v22 = vrot.slane %v2425_v11, 1  ;;  %v4977_v11 = vld [vmem:[%s6095_s23 + $0x18] sm:$0xff]  }
 0x16f   : >> { %2074 = vmatmul.mubr.bf16.gmra.mrb[64].mxu0 %v1285_v58  ;;  %v2428_v18 = vor.u32 %v2427_v22, %v2423_v20  ;;  %v4976_v20 = vld [vmem:[%s6095_s23 + $0x58] sm:$0xff]  }
 0x170   : >> { %2081 = vmatprep.mubr.bf16.mxu0 %v1169_v46  ;;  %v6105_v46 = vpack.c.bf16 %v2334_v9, %v2334_v9 }
 0x172   : >> { %v2430_v7 = vshll.u32 %v6105_v46, 16 }
 0x173   : >> { %4720 = vmatmul.mubr.msk.bf16.gmra.mrb[96].mxu1 %vm278_vm0, %v5868_v62  ;;  %v1303_v62 = vsel %vm278_vm0, %v7296_v4, %v1117_v33 }
 0x174   : >> { %4723 = vmatprep.mubr.msk.bf16.mxu1 %vm278_vm0, %v5871_v35  ;;  %v1101_v35 = vpop.permute.xlu1 %1100  ;;  %v2432_v57 = vrot.slane %v2430_v7, 1 }
 0x175   : >> { %v1297_v61 = vsel %vm278_vm0, %v7297_v63, %v1101_v35 }
 0x176   : >> { %v2433_v34 = vsel %vm715_vm2, %v2428_v18, %v2432_v57  ;;  %v6144_v57 = vld [vmem:[%s534_s9] ss:$0 sm:$0xff]  ;;  %s5007_s9 = scalar_lea.vmem (%p455_p11), %s7190_s19, 4096 }
 0x177   : >> { %2082 = vmatmul.mubr.bf16.gmra.mrb[68].mxu0 %v1289_v56  ;;  %2614 = vrot.lane.b32.xlu1 %v2433_v34, %s5080_s22  ;;  %p5008_p12 = scmp.ne.s32.totalorder (%p455_p11), %s7190_s19, %s5007_s9 }
 0x178   : >> { %2089 = vmatprep.mubr.bf16.mxu0 %v1300_v31  ;;  %v4972_v31 = vld [vmem:[%s6095_s23 + $0x48] sm:$0xff]  }
 0x179   : >> { %4413 = vmatprep.subr.bf16.mxu0 %v4972_v31  ;;  %p5009_p13 = pnand (%p455_p11), %p5008_p12, %p5162_p5 }
 0x17a   : >> { %4414 = vmatpush3.bf16.msra.mxu0 %v4973_v8 }
 0x17b   : >> { %4724 = vmatmul.mubr.msk.bf16.gmra.mrb[100].mxu1 %vm278_vm0, %v5885_v1  ;;  %v7298_v1 = vld [vmem:[#allocation12_spill] sm:$0xff]  ;;  %p5010_p0 = pneg (%p455_p11), %p5009_p13 }
 0x17c   : >> { %4727 = vmatprep.mubr.msk.bf16.mxu1 %vm278_vm0, %v5890_v19  ;;  %v1121_v19 = vrot.slane %v7299_v29, 1 }
 0x17e   : >> { %v1122_v47 = vsel %vm972_vm3, %v1120_v51, %v1121_v19 }
 0x17f   : >> { %2090 = vmatmul.mubr.bf16.gmra.mrb[72].mxu0 %v1293_v43 }
 0x180   : >> { %2097 = vmatprep.mubr.bf16.mxu0 %v1303_v62 }
 0x183   : >> { %4728 = vmatmul.mubr.msk.bf16.gmra.mrb[104].mxu1 %vm278_vm0, %v5899_v32 }
 0x184   : >> { %4731 = vmatprep.mubr.msk.bf16.mxu1 %vm278_vm0, %v7298_v1 }
 0x187   : >> { %2098 = vmatmul.mubr.bf16.gmra.mrb[76].mxu0 %v1297_v61 }
 0x18b   : >> { %4732 = vmatmul.mubr.msk.bf16.gmra.mrb[108].mxu1 %vm278_vm0, %v1122_v47  ;;  %v4974_v47 = vld [vmem:[%s6095_s23 + $0x50] sm:$0xff]  }
 0x18c   : >> { %4415 = vmatprep.subr.bf16.mxu0 %v4974_v47 }
 0x1a6   : >> { %v4183_v14 = vpop.f32.mrb[16].mxu1 }
 0x1a7   : >> { %v4184_v40 = vpop.f32.mrb[17].mxu1 }
 0x1a8   : >> { %v6086_v50 = vadd.f32 %v4184_v40, %v4183_v14  ;;  %v4186_v32 = vpop.f32.mrb[18].mxu1  ;;  %v4975_v14 = vld [vmem:[%s6095_s23 + $0x10] sm:$0xff]  }
 0x1a9   : >> { %v4187_v15 = vpop.f32.mrb[19].mxu1  ;;  %4416 = vmatpush3.bf16.msra.mxu0 %v4975_v14 }
 0x1aa   : >> { %v6088_v28 = vadd.f32 %v4187_v15, %v4186_v32  ;;  %4417 = vmatprep.subr.bf16.mxu0 %v4976_v20  ;;  %v1819_v34 = vadd.f32 %v6086_v50, %v6144_v57 }
 0x1ad   : >> { %4418 = vmatpush3.bf16.msra.mxu0 %v4977_v11 }
 0x1ae   : >> { %v4189_v55 = vpop.f32.mrb[20].mxu1 }
 0x1af   : >> { %v4190_v12 = vpop.f32.mrb[21].mxu1 }
 0x1b0   : >> { %v6098_v44 = vadd.f32 %v4190_v12, %v4189_v55  ;;  %v4192_v60 = vpop.f32.mrb[22].mxu1 }
 0x1b1   : >> { %v4193_v49 = vpop.f32.mrb[23].mxu1 }
 0x1b2   : >> { %v6101_v45 = vadd.f32 %v4193_v49, %v4192_v60 }
 0x1b6   : >> { %v4195_v24 = vpop.f32.mrb[24].mxu1 }
 0x1b7   : >> { %v4196_v59 = vpop.f32.mrb[25].mxu1 }
 0x1b8   : >> { %v6110_v41 = vadd.f32 %v4196_v59, %v4195_v24  ;;  %v4198_v5 = vpop.f32.mrb[26].mxu1 }
 0x1b9   : >> { %v4199_v58 = vpop.f32.mrb[27].mxu1 }
 0x1ba   : >> { %v6112_v2 = vadd.f32 %v4199_v58, %v4198_v5 }
 0x1be   : >> { %v4201_v56 = vpop.f32.mrb[28].mxu1 }
 0x1bf   : >> { %v4202_v33 = vpop.f32.mrb[29].mxu1 }
 0x1c0   : >> { %v6118_v17 = vadd.f32 %v4202_v33, %v4201_v56  ;;  %v4204_v43 = vpop.f32.mrb[30].mxu1  ;;  %v1822_v33 = vadd.f32 %v6088_v28, %v6144_v57  ;;  %v1827_v28 = vadd.f32 %v6098_v44, %v6144_v57 }
 0x1c1   : >> { %v4205_v4 = vpop.f32.mrb[31].mxu1 }
 0x1c2   : >> { %v6120_v62 = vadd.f32 %v4205_v4, %v4204_v43 }
 0x1c6   : >> { %v4207_v35 = vpop.f32.mrb[32].mxu1 }
 0x1c7   : >> { %v4208_v63 = vpop.f32.mrb[33].mxu1 }
 0x1c8   : >> { %v6122_v61 = vadd.f32 %v4208_v63, %v4207_v35  ;;  %v4210_v1 = vpop.f32.mrb[34].mxu1 }
 0x1c9   : >> { %v4211_v51 = vpop.f32.mrb[35].mxu1 }
 0x1ca   : >> { %v6124_v29 = vadd.f32 %v4211_v51, %v4210_v1 }
 0x1ce   : >> { %v4213_v19 = vpop.f32.mrb[36].mxu1 }
 0x1cf   : >> { %v4214_v40 = vpop.f32.mrb[37].mxu1 }
 0x1d0   : >> { %v6128_v32 = vadd.f32 %v4214_v40, %v4213_v19  ;;  %v4216_v15 = vpop.f32.mrb[38].mxu1 }
 0x1d1   : >> { %v4217_v55 = vpop.f32.mrb[39].mxu1 }
 0x1d2   : >> { %v6130_v12 = vadd.f32 %v4217_v55, %v4216_v15  ;;  %v4978_v15 = vld [vmem:[%s6095_s23 + $0x60] sm:$0xff]  }
 0x1d3   : >> { %4419 = vmatprep.subr.bf16.mxu0 %v4978_v15 }
 0x1d6   : >> { %v4219_v0 = vpop.f32.mrb[40].mxu1 }
 0x1d7   : >> { %v4220_v60 = vpop.f32.mrb[41].mxu1 }
 0x1d8   : >> { %v6132_v27 = vadd.f32 %v4220_v60, %v4219_v0  ;;  %v4222_v49 = vpop.f32.mrb[42].mxu1  ;;  %v4979_v60 = vld [vmem:[%s6095_s23 + $0x20] sm:$0xff]  }
 0x1d9   : >> { %v4223_v16 = vpop.f32.mrb[43].mxu1  ;;  %4420 = vmatpush3.bf16.msra.mxu0 %v4979_v60  ;;  %v4980_v60 = vld [vmem:[%s6095_s23 + $0x68] sm:$0xff]  }
 0x1da   : >> { %v6134_v21 = vadd.f32 %v4223_v16, %v4222_v49  ;;  %v1830_v16 = vadd.f32 %v6101_v45, %v6144_v57  ;;  %4421 = vmatprep.subr.bf16.mxu0 %v4980_v60 }
 0x1de   : >> { %v4225_v9 = vpop.f32.mrb[44].mxu1 }
 0x1df   : >> { %v4226_v7 = vpop.f32.mrb[45].mxu1 }
 0x1e0   : >> { %v6142_v24 = vadd.f32 %v4226_v7, %v4225_v9  ;;  %v4228_v22 = vpop.f32.mrb[46].mxu1 }
 0x1e1   : >> { %v4229_v59 = vpop.f32.mrb[47].mxu1 }
 0x1e2   : >> { %v6146_v5 = vadd.f32 %v4229_v59, %v4228_v22  ;;  %v4295_v18 = vpop.f32.mrb[16].mxu0 }
 0x1e3   : >> { %v4296_v58 = vpop.f32.mrb[17].mxu0 }
 0x1e4   : >> { %v4297_v56 = vadd.f32 %v4296_v58, %v4295_v18  ;;  %v4298_v31 = vpop.f32.mrb[18].mxu0 }
 0x1e5   : >> { %v4299_v8 = vpop.f32.mrb[19].mxu0 }
 0x1e6   : >> { %v4300_v43 = vadd.f32 %v4299_v8, %v4298_v31  ;;  %v4231_v4 = vpop.f32.mrb[48].mxu1  ;;  %v6152_v35 = vadd.f32 %v4297_v56, %v1819_v34  ;;  %v1835_v31 = vadd.f32 %v6110_v41, %v6144_v57 }
 0x1e7   : >> { %v4232_v63 = vpop.f32.mrb[49].mxu1 }
 0x1e8   : >> { %v6154_v1 = vadd.f32 %v4232_v63, %v4231_v4  ;;  %v4234_v51 = vpop.f32.mrb[50].mxu1  ;;  %v6156_v19 = vadd.f32 %v4300_v43, %v1822_v33  ;;  %v1838_v43 = vadd.f32 %v6112_v2, %v6144_v57  ;;  %v1843_v2 = vadd.f32 %v6118_v17, %v6144_v57 }
 0x1e9   : >> { %v4235_v47 = vpop.f32.mrb[51].mxu1 }
 0x1ea   : >> { %v6158_v50 = vadd.f32 %v4235_v47, %v4234_v51  ;;  %v4301_v14 = vpop.f32.mrb[20].mxu0 }
 0x1eb   : >> { %v4302_v40 = vpop.f32.mrb[21].mxu0 }
 0x1ec   : >> { %v4303_v55 = vadd.f32 %v4302_v40, %v4301_v14  ;;  %v4304_v0 = vpop.f32.mrb[22].mxu0 }
 0x1ed   : >> { %v4305_v49 = vpop.f32.mrb[23].mxu0 }
 0x1ee   : >> { %v4306_v9 = vadd.f32 %v4305_v49, %v4304_v0  ;;  %v4237_v20 = vpop.f32.mrb[52].mxu1  ;;  %v6166_v11 = vadd.f32 %v4303_v55, %v1827_v28 }
 0x1ef   : >> { %v4238_v7 = vpop.f32.mrb[53].mxu1 }
 0x1f0   : >> { %v6168_v22 = vadd.f32 %v4238_v7, %v4237_v20  ;;  %v4240_v59 = vpop.f32.mrb[54].mxu1  ;;  %v6170_v18 = vadd.f32 %v4306_v9, %v1830_v16  ;;  %v4981_v9 = vld [vmem:[%s6095_s23 + $0x28] sm:$0xff]   ;;  %v1846_v7 = vadd.f32 %v6120_v62, %v6144_v57 }
 0x1f1   : >> { %v4241_v44 = vpop.f32.mrb[55].mxu1  ;;  %4422 = vmatpush3.bf16.msra.mxu0 %v4981_v9 }
 0x1f2   : >> { %v6172_v58 = vadd.f32 %v4241_v44, %v4240_v59  ;;  %v4307_v34 = vpop.f32.mrb[24].mxu0 }
 0x1f3   : >> { %v4308_v56 = vpop.f32.mrb[25].mxu0 }
 0x1f4   : >> { %v4309_v45 = vadd.f32 %v4308_v56, %v4307_v34  ;;  %v4310_v8 = vpop.f32.mrb[26].mxu0 }
 0x1f5   : >> { %v4311_v33 = vpop.f32.mrb[27].mxu0 }
 0x1f6   : >> { %v4312_v4 = vadd.f32 %v4311_v33, %v4310_v8  ;;  %v4243_v63 = vpop.f32.mrb[56].mxu1  ;;  %v6178_v51 = vadd.f32 %v4309_v45, %v1835_v31 }
 0x1f7   : >> { %v4244_v47 = vpop.f32.mrb[57].mxu1 }
 0x1f8   : >> { %v6180_v14 = vadd.f32 %v4244_v47, %v4243_v63  ;;  %v4246_v40 = vpop.f32.mrb[58].mxu1  ;;  %v6182_v15 = vadd.f32 %v4312_v4, %v1838_v43  ;;  %v1851_v63 = vadd.f32 %v6122_v61, %v6144_v57 }
 0x1f9   : >> { %v4247_v28 = vpop.f32.mrb[59].mxu1 }
 0x1fa   : >> { %v6184_v41 = vadd.f32 %v4247_v28, %v4246_v40  ;;  %v4313_v55 = vpop.f32.mrb[28].mxu0  ;;  %v1854_v28 = vadd.f32 %v6124_v29, %v6144_v57  ;;  %v1859_v29 = vadd.f32 %v6128_v32, %v6144_v57 }
 0x1fb   : >> { %v4314_v0 = vpop.f32.mrb[29].mxu0 }
 0x1fc   : >> { %v4315_v49 = vadd.f32 %v4314_v0, %v4313_v55  ;;  %v4316_v16 = vpop.f32.mrb[30].mxu0 }
 0x1fd   : >> { %v4317_v20 = vpop.f32.mrb[31].mxu0 }
 0x1fe   : >> { %v4318_v59 = vadd.f32 %v4317_v20, %v4316_v16  ;;  %v4249_v44 = vpop.f32.mrb[60].mxu1  ;;  %v6192_v34 = vadd.f32 %v4315_v49, %v1843_v2 }
 0x1ff   : >> { %v4250_v56 = vpop.f32.mrb[61].mxu1 }
 0x200   : >> { %v6194_v31 = vadd.f32 %v4250_v56, %v4249_v44  ;;  %v4252_v45 = vpop.f32.mrb[62].mxu1  ;;  %v6196_v8 = vadd.f32 %v4318_v59, %v1846_v7  ;;  %v4982_v44 = vld [vmem:[%s6095_s23 + $0x70] sm:$0xff]  }
 0x201   : >> { %v4253_v17 = vpop.f32.mrb[63].mxu1  ;;  %4423 = vmatprep.subr.bf16.mxu0 %v4982_v44 }
 0x202   : >> { %v6198_v33 = vadd.f32 %v4253_v17, %v4252_v45  ;;  %v4319_v43 = vpop.f32.mrb[32].mxu0  ;;  %v4983_v17 = vld [vmem:[%s6095_s23 + $0x30] sm:$0xff]  }
 0x203   : >> { %v4320_v4 = vpop.f32.mrb[33].mxu0  ;;  %4424 = vmatpush3.bf16.msra.mxu0 %v4983_v17 }
 0x204   : >> { %v4321_v62 = vadd.f32 %v4320_v4, %v4319_v43  ;;  %v4322_v47 = vpop.f32.mrb[34].mxu0  ;;  %v1862_v4 = vadd.f32 %v6130_v12, %v6144_v57 }
 0x205   : >> { %v4323_v40 = vpop.f32.mrb[35].mxu0 }
 0x206   : >> { %v4324_v55 = vadd.f32 %v4323_v40, %v4322_v47  ;;  %v4255_v0 = vpop.f32.mrb[64].mxu1  ;;  %v6204_v60 = vadd.f32 %v4321_v62, %v1851_v63 }
 0x207   : >> { %v4256_v2 = vpop.f32.mrb[65].mxu1 }
 0x208   : >> { %v6206_v49 = vadd.f32 %v4256_v2, %v4255_v0  ;;  %v4258_v16 = vpop.f32.mrb[66].mxu1  ;;  %v6208_v9 = vadd.f32 %v4324_v55, %v1854_v28 }
 0x209   : >> { %v4259_v20 = vpop.f32.mrb[67].mxu1 }
 0x20a   : >> { %v6210_v61 = vadd.f32 %v4259_v20, %v4258_v16  ;;  %v4325_v7 = vpop.f32.mrb[36].mxu0 }
 0x20b   : >> { %v4326_v59 = vpop.f32.mrb[37].mxu0 }
 0x20c   : >> { %v4327_v56 = vadd.f32 %v4326_v59, %v4325_v7  ;;  %v4328_v45 = vpop.f32.mrb[38].mxu0  ;;  %v1867_v7 = vadd.f32 %v6132_v27, %v6144_v57 }
 0x20d   : >> { %v4329_v43 = vpop.f32.mrb[39].mxu0 }
 0x20e   : >> { %v4330_v63 = vadd.f32 %v4329_v43, %v4328_v45  ;;  %v4261_v62 = vpop.f32.mrb[68].mxu1  ;;  %v6218_v47 = vadd.f32 %v4327_v56, %v1859_v29  ;;  %v1870_v29 = vadd.f32 %v6134_v21, %v6144_v57  ;;  %v1875_v21 = vadd.f32 %v6142_v24, %v6144_v57 }
 0x20f   : >> { %v4262_v40 = vpop.f32.mrb[69].mxu1 }
 0x210   : >> { %v6220_v28 = vadd.f32 %v4262_v40, %v4261_v62  ;;  %v4264_v55 = vpop.f32.mrb[70].mxu1  ;;  %v6222_v0 = vadd.f32 %v4330_v63, %v1862_v4 }
 0x211   : >> { %v4265_v32 = vpop.f32.mrb[71].mxu1 }
 0x212   : >> { %v6224_v2 = vadd.f32 %v4265_v32, %v4264_v55  ;;  %v4331_v16 = vpop.f32.mrb[40].mxu0 }
 0x213   : >> { %v4332_v20 = vpop.f32.mrb[41].mxu0 }
 0x214   : >> { %v4333_v12 = vadd.f32 %v4332_v20, %v4331_v16  ;;  %v4334_v59 = vpop.f32.mrb[42].mxu0  ;;  %v4984_v16 = vld [vmem:[%s6095_s23 + $0x78] sm:$0xff]  }
 0x215   : >> { %v4335_v44 = vpop.f32.mrb[43].mxu0  ;;  %v4985_v20 = vld [vmem:[%s6095_s23 + $0x38] sm:$0xff]   ;;  %4425 = vmatprep.subr.bf16.mxu0 %v4984_v16 }
 0x216   : >> { %v4336_v56 = vadd.f32 %v4335_v44, %v4334_v59  ;;  %v4267_v45 = vpop.f32.mrb[72].mxu1  ;;  %v6230_v17 = vadd.f32 %v4333_v12, %v1867_v7  ;;  %v4987_v12 = vld [vmem:[%s6095_s23 + $0x80] sm:$0xff]   ;;  %4426 = vmatpush3.bf16.msra.mxu0 %v4985_v20  ;;  %v1886_v20 = vadd.f32 %v6158_v50, %v6144_v57 }
 0x217   : >> { %v4268_v43 = vpop.f32.mrb[73].mxu1  ;;  %4524 = vmatpush3.bf16.msra.mxu1 %v4987_v12 }
 0x218   : >> { %v6232_v4 = vadd.f32 %v4268_v43, %v4267_v45  ;;  %v4270_v63 = vpop.f32.mrb[74].mxu1  ;;  %v6234_v62 = vadd.f32 %v4336_v56, %v1870_v29  ;;  %v1878_v29 = vadd.f32 %v6146_v5, %v6144_v57  ;;  %v1883_v5 = vadd.f32 %v6154_v1, %v6144_v57 }
 0x219   : >> { %v4271_v27 = vpop.f32.mrb[75].mxu1 }
 0x21a   : >> { %v6236_v40 = vadd.f32 %v4271_v27, %v4270_v63  ;;  %v4337_v55 = vpop.f32.mrb[44].mxu0 }
 0x21b   : >> { %v4338_v32 = vpop.f32.mrb[45].mxu0 }
 0x21c   : >> { %v4339_v59 = vadd.f32 %v4338_v32, %v4337_v55  ;;  %v4340_v7 = vpop.f32.mrb[46].mxu0 }
 0x21d   : >> { %v4341_v44 = vpop.f32.mrb[47].mxu0 }
 0x21e   : >> { %v4342_v56 = vadd.f32 %v4341_v44, %v4340_v7  ;;  %v4273_v45 = vpop.f32.mrb[76].mxu1  ;;  %v6246_v43 = vadd.f32 %v4339_v59, %v1875_v21 }
 0x21f   : >> { %v4274_v63 = vpop.f32.mrb[77].mxu1 }
 0x220   : >> { %v6248_v27 = vadd.f32 %v4274_v63, %v4273_v45  ;;  %v4276_v30 = vpop.f32.mrb[78].mxu1  ;;  %v6250_v24 = vadd.f32 %v4342_v56, %v1878_v29 }
 0x221   : >> { %v4277_v55 = vpop.f32.mrb[79].mxu1 }
 0x222   : >> { %v6252_v32 = vadd.f32 %v4277_v55, %v4276_v30  ;;  %v4343_v16 = vpop.f32.mrb[48].mxu0 }
 0x223   : >> { %v4344_v26 = vpop.f32.mrb[49].mxu0 }
 0x224   : >> { %v4345_v7 = vadd.f32 %v4344_v26, %v4343_v16  ;;  %v4346_v44 = vpop.f32.mrb[50].mxu0 }
 0x225   : >> { %v4347_v21 = vpop.f32.mrb[51].mxu0 }
 0x226   : >> { %v4348_v59 = vadd.f32 %v4347_v21, %v4346_v44  ;;  %v4705_v12 = vpop.f32.mrb[80].mxu1  ;;  %v6258_v45 = vadd.f32 %v4345_v7, %v1883_v5 }
 0x227   : >> { %v2149_v29 = vadd.f32 %v4705_v12, %v6166_v11  ;;  %v2140_v56 = vpop.f32.mrb[81].mxu1 }
 0x228   : >> { %v2141_v30 = vadd.f32 %v2140_v56, %v6152_v35  ;;  %v4706_v63 = vpop.f32.mrb[82].mxu1  ;;  %v6262_v55 = vadd.f32 %v4348_v59, %v1886_v20  ;;  %v1891_v35 = vadd.f32 %v6168_v22, %v6144_v57  ;;  %v4989_v22 = vld [vmem:[%s6095_s23 + $0xc8] sm:$0xff]  }
 0x229   : >> { %v2269_v1 = vmax.f32 %v2149_v29, 0.0  ;;  %v2152_v16 = vadd.f32 %v4706_v63, %v6170_v18  ;;  %v2143_v26 = vpop.f32.mrb[83].mxu1  ;;  %v4988_v18 = vld [vmem:[%s6095_s23 + $0x100] sm:$0xff]   ;;  %v4990_v63 = vld [vmem:[%s6095_s23 + $0x88] sm:$0xff]   ;;  %4525 = vmatprep.subr.bf16.mxu1 %v4989_v22 }
 0x22a   : >> { %v2267_v38 = vmax.f32 %v2141_v30, 0.0  ;;  %v2144_v50 = vadd.f32 %v2143_v26, %v6156_v19  ;;  %v4349_v44 = vpop.f32.mrb[52].mxu0  ;;  %v1894_v19 = vadd.f32 %v6172_v58, %v6144_v57  ;;  %4735 = vmatprep.subr.bf16.mxu0 %v4988_v18  ;;  %4526 = vmatpush3.bf16.msra.mxu1 %v4990_v63 }
 0x22b   : >> { %2302 = vst.msk [vmem:[#allocation3 + $0x31] sm:$0xff] %vm278_vm0, %v2269_v1  ;;  %v2270_v5 = vmax.f32 %v2152_v16, 0.0  ;;  %v4350_v11 = vpop.f32.mrb[53].mxu0 }
 0x22c   : >> { %2300 = vst.msk [vmem:[#allocation3 + $0x19] sm:$0xff] %vm278_vm0, %v2267_v38  ;;  %v2268_v7 = vmax.f32 %v2144_v50, 0.0  ;;  %v4351_v21 = vadd.f32 %v4350_v11, %v4349_v44  ;;  %v4352_v20 = vpop.f32.mrb[54].mxu0 }
 0x22d   : >> { %2303 = vst.msk [vmem:[#allocation3 + $0x39] sm:$0xff] %vm278_vm0, %v2270_v5  ;;  %v4353_v59 = vpop.f32.mrb[55].mxu0 }
 0x22e   : >> { %2301 = vst.msk [vmem:[#allocation3 + $0x21] sm:$0xff] %vm278_vm0, %v2268_v7  ;;  %v4354_v12 = vadd.f32 %v4353_v59, %v4352_v20  ;;  %v4709_v29 = vpop.f32.mrb[84].mxu1  ;;  %v6275_v56 = vadd.f32 %v4351_v21, %v1891_v35  ;;  %v4991_v20 = vld [vmem:[%s6095_s23 + $0xd0] sm:$0xff]  }
 0x22f   : >> { %v2165_v38 = vadd.f32 %v4709_v29, %v6192_v34  ;;  %v2156_v30 = vpop.f32.mrb[85].mxu1  ;;  %4527 = vmatprep.subr.bf16.mxu1 %v4991_v20  ;;  %v4994_v20 = vld [vmem:[%s6095_s23 + $0x98] sm:$0xff]  }
 0x230   : >> { %v2157_v1 = vadd.f32 %v2156_v30, %v6178_v51  ;;  %v4710_v16 = vpop.f32.mrb[86].mxu1  ;;  %v6281_v26 = vadd.f32 %v4354_v12, %v1894_v19  ;;  %v1899_v51 = vadd.f32 %v6180_v14, %v6144_v57 }
 0x231   : >> { %v2273_v58 = vmax.f32 %v2165_v38, 0.0  ;;  %v2168_v50 = vadd.f32 %v4710_v16, %v6196_v8  ;;  %v2159_v44 = vpop.f32.mrb[87].mxu1 }
 0x232   : >> { %v2271_v5 = vmax.f32 %v2157_v1, 0.0  ;;  %v2160_v11 = vadd.f32 %v2159_v44, %v6182_v15  ;;  %v4355_v35 = vpop.f32.mrb[56].mxu0  ;;  %v2338_v21 = vld [vmem:[#allocation3 + $0x30] sm:$0xff]  ;;  %v1902_v15 = vadd.f32 %v6184_v41, %v6144_v57  ;;  %v4992_v1 = vld [vmem:[%s6095_s23 + $0x90] sm:$0xff]  }
 0x233   : >> { %2306 = vst.msk [vmem:[#allocation3 + $0x61] sm:$0xff] %vm278_vm0, %v2273_v58  ;;  %v2274_v34 = vmax.f32 %v2168_v50, 0.0  ;;  %v4356_v7 = vpop.f32.mrb[57].mxu0  ;;  %v2335_v19 = vld [vmem:[#allocation3 + $0x18] sm:$0xff]  ;;  %4528 = vmatpush3.bf16.msra.mxu1 %v4992_v1 }
 0x234   : >> { %2304 = vst.msk [vmem:[#allocation3 + $0x49] sm:$0xff] %vm278_vm0, %v2271_v5  ;;  %v2272_v18 = vmax.f32 %v2160_v11, 0.0  ;;  %v4357_v8 = vadd.f32 %v4356_v7, %v4355_v35  ;;  %v4358_v59 = vpop.f32.mrb[58].mxu0  ;;  %v2339_v12 = vld [vmem:[#allocation3 + $0x38] sm:$0xff]  ;;  %v2340_v29 = vld [vmem:[#allocation3 + $0x40] sm:$0x3]  ;;  %v6307_v5 = vadd.f32 %v6194_v31, %v6144_v57 }
 0x235   : >> { %2307 = vst.msk [vmem:[#allocation3 + $0x69] sm:$0xff] %vm278_vm0, %v2274_v34  ;;  %v4359_v22 = vpop.f32.mrb[59].mxu0  ;;  %v2336_v38 = vld [vmem:[#allocation3 + $0x20] sm:$0xff]  ;;  %v6293_v30 = vpack.c.bf16 %v2339_v12, %v2338_v21  ;;  %v2337_v63 = vld [vmem:[#allocation3 + $0x28] sm:$0x3]  ;;  %v6295_v14 = vpack.c.bf16 %v2340_v29, %v2340_v29 }
 0x236   : >> { %2305 = vst.msk [vmem:[#allocation3 + $0x51] sm:$0xff] %vm278_vm0, %v2272_v18  ;;  %v4360_v16 = vadd.f32 %v4359_v22, %v4358_v59  ;;  %v4713_v58 = vpop.f32.mrb[88].mxu1  ;;  %v6299_v50 = vpack.c.bf16 %v2336_v38, %v2335_v19  ;;  %v6301_v41 = vpack.c.bf16 %v2337_v63, %v2337_v63  ;;  %v6303_v44 = vadd.f32 %v4357_v8, %v1899_v51  ;;  %v4993_v21 = vld [vmem:[%s6095_s23 + $0xd8] sm:$0xff]  }
 0x237   : >> { %v2181_v11 = vadd.f32 %v4713_v58, %v6218_v47  ;;  %v2172_v35 = vpop.f32.mrb[89].mxu1  ;;  %v2449_v34 = vshll.u32 %v6293_v30, 16  ;;  %v2454_v7 = vshll.u32 %v6295_v14, 16  ;;  %v2447_v47 = vshrl.u32 %v6293_v30, 16  ;;  %4529 = vmatprep.subr.bf16.mxu1 %v4993_v21 }
 0x238   : >> { %v2173_v18 = vadd.f32 %v2172_v35, %v6204_v60  ;;  %v4714_v59 = vpop.f32.mrb[90].mxu1  ;;  %2727 = vrot.lane.b32.xlu0 %v6299_v50, %s5080_s22  ;;  %v2437_v51 = vshll.u32 %v6299_v50, 16  ;;  %v2442_v31 = vshll.u32 %v6301_v41, 16  ;;  %v2435_v29 = vshrl.u32 %v6299_v50, 16  ;;  %4530 = vmatpush3.bf16.msra.mxu1 %v4994_v20 }
 0x239   : >> { %v2277_v8 = vmax.f32 %v2181_v11, 0.0  ;;  %v2184_v19 = vadd.f32 %v4714_v59, %v6222_v0  ;;  %v2175_v12 = vpop.f32.mrb[91].mxu1  ;;  %v2451_v22 = vrot.slane %v2449_v34, 1  ;;  %v2456_v58 = vrot.slane %v2454_v7, 1  ;;  %v4995_v59 = vld [vmem:[%s6095_s23 + $0xe0] sm:$0xff]  }
 0x23a   : >> { %v2275_v60 = vmax.f32 %v2173_v18, 0.0  ;;  %v2176_v38 = vadd.f32 %v2175_v12, %v6208_v9  ;;  %v4361_v63 = vpop.f32.mrb[60].mxu0  ;;  %v2439_v1 = vrot.slane %v2437_v51, 1  ;;  %v2444_v37 = vrot.slane %v2442_v31, 1  ;;  %v2344_v3 = vld [vmem:[#allocation3 + $0x60] sm:$0xff]  ;;  %4531 = vmatprep.subr.bf16.mxu1 %v4995_v59  ;;  %v4996_v12 = vld [vmem:[%s6095_s23 + $0xa0] sm:$0xff]  }
 0x23b   : >> { %2310 = vst.msk [vmem:[#allocation3 + $0x91] sm:$0xff] %vm278_vm0, %v2277_v8  ;;  %v2278_v35 = vmax.f32 %v2184_v19, 0.0  ;;  %v4362_v39 = vpop.f32.mrb[61].mxu0  ;;  %v2452_v11 = vor.u32 %v2451_v22, %v2447_v47  ;;  %v6324_v0 = vadd.f32 %v4360_v16, %v1902_v15  ;;  %v1910_v34 = vadd.f32 %v6198_v33, %v6144_v57  ;;  %v2341_v51 = vld [vmem:[#allocation3 + $0x48] sm:$0xff] }
 0x23c   : >> { %2308 = vst.msk [vmem:[#allocation3 + $0x79] sm:$0xff] %vm278_vm0, %v2275_v60  ;;  %v2276_v9 = vmax.f32 %v2176_v38, 0.0  ;;  %v4363_v21 = vadd.f32 %v4362_v39, %v4361_v63  ;;  %v4364_v7 = vpop.f32.mrb[62].mxu0  ;;  %2729 = vrot.lane.b32.xlu0 %v6293_v30, %s5080_s22  ;;  %v2440_v18 = vor.u32 %v2439_v1, %v2435_v29  ;;  %v2345_v31 = vld [vmem:[#allocation3 + $0x68] sm:$0xff]  ;;  %v2346_v47 = vld [vmem:[#allocation3 + $0x70] sm:$0x3]  ;;  %v6334_v15 = vadd.f32 %v6206_v49, %v6144_v57 }
 0x23d   : >> { %2311 = vst.msk [vmem:[#allocation3 + $0x99] sm:$0xff] %vm278_vm0, %v2278_v35  ;;  %v4365_v33 = vpop.f32.mrb[63].mxu0  ;;  %v2342_v16 = vld [vmem:[#allocation3 + $0x50] sm:$0xff]  ;;  %v6337_v20 = vpack.c.bf16 %v2345_v31, %v2344_v3  ;;  %v2343_v39 = vld [vmem:[#allocation3 + $0x58] sm:$0x3]  ;;  %v6339_v8 = vpack.c.bf16 %v2346_v47, %v2346_v47  ;;  %v6355_v1 = vsel %vm715_vm2, %v2452_v11, %v2456_v58  ;;  %4532 = vmatpush3.bf16.msra.mxu1 %v4996_v12 }
 0x23e   : >> { %2309 = vst.msk [vmem:[#allocation3 + $0x81] sm:$0xff] %vm278_vm0, %v2276_v9  ;;  %v4366_v29 = vadd.f32 %v4365_v33, %v4364_v7  ;;  %v4717_v49 = vpop.f32.mrb[92].mxu1  ;;  %v6345_v22 = vsel %vm715_vm2, %v2440_v18, %v2444_v37  ;;  %v6347_v60 = vpack.c.bf16 %v2342_v16, %v2341_v51  ;;  %v6349_v3 = vpack.c.bf16 %v2343_v39, %v2343_v39  ;;  %v4997_v37 = vld [vmem:[%s6095_s23 + $0xe8] sm:$0xff]  }
 0x23f   : >> { %v2197_v38 = vadd.f32 %v4717_v49, %v6246_v43  ;;  %v2188_v63 = vpop.f32.mrb[93].mxu1  ;;  %2616 = vrot.lane.b32.xlu1 %v6345_v22, %s5080_s22  ;;  %v2471_v35 = vshrl.u32 %v6337_v20, 16  ;;  %v2473_v59 = vshll.u32 %v6337_v20, 16  ;;  %v4998_v9 = vld [vmem:[%s6095_s23 + $0xa8] sm:$0xff]   ;;  %v2478_v58 = vshll.u32 %v6339_v8, 16  ;;  %4533 = vmatprep.subr.bf16.mxu1 %v4997_v37  ;;  %v4999_v37 = vld [vmem:[%s6095_s23 + $0xf0] sm:$0xff]  }
 0x240   : >> { %v2189_v7 = vadd.f32 %v2188_v63, %v6230_v17  ;;  %v4718_v18 = vpop.f32.mrb[94].mxu1  ;;  %2731 = vrot.lane.b32.xlu0 %v6347_v60, %s5080_s22  ;;  %v2461_v43 = vshll.u32 %v6347_v60, 16  ;;  %v2466_v51 = vshll.u32 %v6349_v3, 16  ;;  %v2459_v33 = vshrl.u32 %v6347_v60, 16 }
 0x241   : >> { %v2281_v11 = vmax.f32 %v2197_v38, 0.0  ;;  %v2200_v31 = vadd.f32 %v4718_v18, %v6250_v24  ;;  %v2191_v47 = vpop.f32.mrb[95].mxu1  ;;  %v2475_v16 = vrot.slane %v2473_v59, 1  ;;  %v6374_v18 = vadd.f32 %v4363_v21, %v6307_v5  ;;  %4534 = vmatpush3.bf16.msra.mxu1 %v4998_v9 }
 0x242   : >> { %v2279_v17 = vmax.f32 %v2189_v7, 0.0  ;;  %v2192_v39 = vadd.f32 %v2191_v47, %v6234_v62  ;;  %v4367_v12 = vpop.f32.mrb[64].mxu0  ;;  %v2463_v49 = vrot.slane %v2461_v43, 1  ;;  %v2468_v63 = vrot.slane %v2466_v51, 1  ;;  %v2350_v38 = vld [vmem:[#allocation3 + $0x90] sm:$0xff]  ;;  %4535 = vmatprep.subr.bf16.mxu1 %v4999_v37 }
 0x243   : >> { %2314 = vst.msk [vmem:[#allocation3 + $0xc1] sm:$0xff] %vm278_vm0, %v2281_v11  ;;  %v2282_v19 = vmax.f32 %v2200_v31, 0.0  ;;  %v4368_v10 = vpop.f32.mrb[65].mxu0  ;;  %2618 = vrot.lane.b32.xlu1 %v6355_v1, %s5080_s22  ;;  %v2476_v24 = vor.u32 %v2475_v16, %v2471_v35  ;;  %v6376_v59 = vadd.f32 %v4366_v29, %v1910_v34  ;;  %v1918_v62 = vadd.f32 %v6210_v61, %v6144_v57  ;;  %v2347_v11 = vld [vmem:[#allocation3 + $0x78] sm:$0xff] }
 0x244   : >> { %2312 = vst.msk [vmem:[#allocation3 + $0xa9] sm:$0xff] %vm278_vm0, %v2279_v17  ;;  %v2280_v7 = vmax.f32 %v2192_v39, 0.0  ;;  %v4369_v43 = vadd.f32 %v4368_v10, %v4367_v12  ;;  %v4370_v51 = vpop.f32.mrb[66].mxu0  ;;  %2733 = vrot.lane.b32.xlu0 %v6337_v20, %s5080_s22  ;;  %v2464_v35 = vor.u32 %v2463_v49, %v2459_v33  ;;  %v2351_v5 = vld [vmem:[#allocation3 + $0x98] sm:$0xff]  ;;  %v2352_v21 = vld [vmem:[#allocation3 + $0xa0] sm:$0x3]  ;;  %v6386_v34 = vadd.f32 %v6220_v28, %v6144_v57 }
 0x245   : >> { %2315 = vst.msk [vmem:[#allocation3 + $0xc9] sm:$0xff] %vm278_vm0, %v2282_v19  ;;  %v4371_v61 = vpop.f32.mrb[67].mxu0  ;;  %v2348_v29 = vld [vmem:[#allocation3 + $0x80] sm:$0xff]  ;;  %v2480_v9 = vrot.slane %v2478_v58, 1  ;;  %v6389_v31 = vpack.c.bf16 %v2351_v5, %v2350_v38  ;;  %v2349_v10 = vld [vmem:[#allocation3 + $0x88] sm:$0x3]  ;;  %v6391_v47 = vpack.c.bf16 %v2352_v21, %v2352_v21 }
 0x246   : >> { %v5000_v33 = vld [vmem:[%s6095_s23 + $0xb0] sm:$0xff]   ;;  %2313 = vst.msk [vmem:[#allocation3 + $0xb1] sm:$0xff] %vm278_vm0, %v2280_v7  ;;  %v4372_v16 = vadd.f32 %v4371_v61, %v4370_v51  ;;  %v4721_v17 = vpop.f32.mrb[96].mxu1  ;;  %v6396_v28 = vsel %vm715_vm2, %v2464_v35, %v2468_v63  ;;  %v6398_v19 = vpack.c.bf16 %v2348_v29, %v2347_v11  ;;  %v6400_v39 = vpack.c.bf16 %v2349_v10, %v2349_v10  ;;  %v5001_v63 = vld [vmem:[%s6095_s23 + $0xf8] sm:$0xff]  }
 0x247   : >> { %v2213_v58 = vadd.f32 %v4721_v17, %v6275_v56  ;;  %v2204_v12 = vpop.f32.mrb[97].mxu1  ;;  %2620 = vrot.lane.b32.xlu1 %v6396_v28, %s5080_s22  ;;  %v6406_v49 = vsel %vm715_vm2, %v2476_v24, %v2480_v9  ;;  %v2497_v38 = vshll.u32 %v6389_v31, 16  ;;  %4536 = vmatpush3.bf16.msra.mxu1 %v5000_v33  ;;  %v5002_v7 = vld [vmem:[%s6095_s23 + $0xb8] sm:$0xff]   ;;  %v2495_v24 = vshrl.u32 %v6389_v31, 16 }
 0x248   : >> { %v2205_v51 = vadd.f32 %v2204_v12, %v6258_v45  ;;  %v4722_v35 = vpop.f32.mrb[98].mxu1  ;;  %2735 = vrot.lane.b32.xlu0 %v6398_v19, %s5080_s22  ;;  %v2485_v56 = vshll.u32 %v6398_v19, 16  ;;  %v2490_v11 = vshll.u32 %v6400_v39, 16  ;;  %v2502_v9 = vshll.u32 %v6391_v47, 16  ;;  %4537 = vmatprep.subr.bf16.mxu1 %v5001_v63 }
 0x249   : >> { %v2285_v5 = vmax.f32 %v2213_v58, 0.0  ;;  %v2216_v21 = vadd.f32 %v4722_v35, %v6281_v26  ;;  %v2207_v61 = vpop.f32.mrb[99].mxu1  ;;  %v2499_v29 = vrot.slane %v2497_v38, 1  ;;  %v2483_v17 = vshrl.u32 %v6398_v19, 16 }
 0x24a   : >> { %v2283_v10 = vmax.f32 %v2205_v51, 0.0  ;;  %v2208_v45 = vadd.f32 %v2207_v61, %v6262_v55  ;;  %v4373_v33 = vpop.f32.mrb[68].mxu0  ;;  %v2487_v12 = vrot.slane %v2485_v56, 1  ;;  %v2492_v26 = vrot.slane %v2490_v11, 1 }
 0x24b   : >> { %2318 = vst.msk [vmem:[#allocation3 + $0xf1] sm:$0xff] %vm278_vm0, %v2285_v5  ;;  %v2286_v37 = vmax.f32 %v2216_v21, 0.0  ;;  %v4374_v53 = vpop.f32.mrb[69].mxu0  ;;  %2622 = vrot.lane.b32.xlu1 %v6406_v49, %s5080_s22  ;;  %v6426_v58 = vadd.f32 %v4369_v43, %v6334_v15  ;;  %v6428_v38 = vadd.f32 %v4372_v16, %v1918_v62  ;;  %4538 = vmatpush3.bf16.msra.mxu1 %v5002_v7  ;;  %v2356_v5 = vld [vmem:[#allocation3 + $0xc0] sm:$0xff]  ;;  %v2353_v43 = vld [vmem:[#allocation3 + $0xa8] sm:$0xff]  ;;  %v2504_v7 = vrot.slane %v2502_v9, 1 }
 0x24c   : >> { %2316 = vst.msk [vmem:[#allocation3 + $0xd9] sm:$0xff] %vm278_vm0, %v2283_v10  ;;  %v2284_v55 = vmax.f32 %v2208_v45, 0.0  ;;  %v4375_v63 = vadd.f32 %v4374_v53, %v4373_v33  ;;  %v4376_v51 = vpop.f32.mrb[70].mxu0  ;;  %2737 = vrot.lane.b32.xlu0 %v6389_v31, %s5080_s22  ;;  %v2488_v35 = vor.u32 %v2487_v12, %v2483_v17  ;;  %v2500_v56 = vor.u32 %v2499_v29, %v2495_v24  ;;  %v2357_v21 = vld [vmem:[#allocation3 + $0xc8] sm:$0xff]  ;;  %v2358_v61 = vld [vmem:[#allocation3 + $0xd0] sm:$0x3] }
 0x24d   : >> { %v1926_v15 = vadd.f32 %v6224_v2, %v6144_v57  ;;  %2319 = vst.msk [vmem:[#allocation3 + $0xf9] sm:$0xff] %vm278_vm0, %v2286_v37  ;;  %v4377_v62 = vpop.f32.mrb[71].mxu0  ;;  %v2354_v16 = vld [vmem:[#allocation3 + $0xb0] sm:$0xff]  ;;  %v6436_v11 = vpack.c.bf16 %v2357_v21, %v2356_v5  ;;  %v2355_v53 = vld [vmem:[#allocation3 + $0xb8] sm:$0x3]  ;;  %v6450_v17 = vpack.c.bf16 %v2358_v61, %v2358_v61 }
 0x24e   : >> { %2317 = vst.msk [vmem:[#allocation3 + $0xe1] sm:$0xff] %vm278_vm0, %v2284_v55  ;;  %v4378_v10 = vadd.f32 %v4377_v62, %v4376_v51  ;;  %v4725_v45 = vpop.f32.mrb[100].mxu1  ;;  %v6440_v24 = vsel %vm715_vm2, %v2488_v35, %v2492_v26  ;;  %v6442_v29 = vpack.c.bf16 %v2354_v16, %v2353_v43  ;;  %v2084_v2 = vadd.f32 %v4375_v63, %v6386_v34 }
 0x24f   : >> { %v2229_v37 = vadd.f32 %v4725_v45, %v6374_v18  ;;  %v2220_v33 = vpop.f32.mrb[101].mxu1  ;;  %2624 = vrot.lane.b32.xlu1 %v6440_v24, %s5080_s22  ;;  %v6448_v9 = vpack.c.bf16 %v2355_v53, %v2355_v53  ;;  %v2521_v12 = vshll.u32 %v6436_v11, 16  ;;  %v6457_v34 = vsel %vm715_vm2, %v2500_v56, %v2504_v7 }
 0x250   : >> { %v2221_v55 = vadd.f32 %v2220_v33, %v6303_v44  ;;  %v4726_v26 = vpop.f32.mrb[102].mxu1  ;;  %2739 = vrot.lane.b32.xlu0 %v6442_v29, %s5080_s22  ;;  %v2509_v18 = vshll.u32 %v6442_v29, 16  ;;  %v2087_v63 = vadd.f32 %v4378_v10, %v1926_v15  ;;  %v2507_v21 = vshrl.u32 %v6442_v29, 16 }
 0x251   : >> { %v2289_v51 = vmax.f32 %v2229_v37, 0.0  ;;  %v2232_v35 = vadd.f32 %v4726_v26, %v6376_v59  ;;  %v2223_v5 = vpop.f32.mrb[103].mxu1  ;;  %v2514_v61 = vshll.u32 %v6448_v9, 16  ;;  %v2523_v53 = vrot.slane %v2521_v12, 1 }
 0x252   : >> { %v2287_v62 = vmax.f32 %v2221_v55, 0.0  ;;  %v2224_v44 = vadd.f32 %v2223_v5, %v6324_v0  ;;  %v4379_v43 = vpop.f32.mrb[72].mxu0  ;;  %v2511_v16 = vrot.slane %v2509_v18, 1  ;;  %v2519_v59 = vshrl.u32 %v6436_v11, 16 }
 0x253   : >> { %2322 = vst.msk [vmem:[#allocation3 + $0x121] sm:$0xff] %vm278_vm0, %v2289_v51  ;;  %v2290_v56 = vmax.f32 %v2232_v35, 0.0  ;;  %v4380_v7 = vpop.f32.mrb[73].mxu0  ;;  %2626 = vrot.lane.b32.xlu1 %v6457_v34, %s5080_s22  ;;  %v2526_v15 = vshll.u32 %v6450_v17, 16  ;;  %v2516_v33 = vrot.slane %v2514_v61, 1  ;;  %v1931_v55 = vadd.f32 %v6232_v4, %v6144_v57 }
 0x254   : >> { %2320 = vst.msk [vmem:[#allocation3 + $0x109] sm:$0xff] %vm278_vm0, %v2287_v62  ;;  %v2288_v10 = vmax.f32 %v2224_v44, 0.0  ;;  %v4381_v45 = vadd.f32 %v4380_v7, %v4379_v43  ;;  %v4382_v37 = vpop.f32.mrb[74].mxu0  ;;  %2741 = vrot.lane.b32.xlu0 %v6436_v11, %s5080_s22  ;;  %v2512_v0 = vor.u32 %v2511_v16, %v2507_v21  ;;  %v2363_v12 = vld [vmem:[#allocation3 + $0xf8] sm:$0xff]  ;;  %v1934_v26 = vadd.f32 %v6236_v40, %v6144_v57 }
 0x255   : >> { %2323 = vst.msk [vmem:[#allocation3 + $0x129] sm:$0xff] %vm278_vm0, %v2290_v56  ;;  %v4383_v18 = vpop.f32.mrb[75].mxu0  ;;  %v7300_v51 = vrot.slane %v6301_v41, 1  ;;  %v7301_v35 = vrot.slane %v6299_v50, 1  ;;  %v2359_v62 = vld [vmem:[#allocation3 + $0xd8] sm:$0xff]  ;;  %v2360_v21 = vld [vmem:[#allocation3 + $0xe0] sm:$0xff]  ;;  %v2524_v16 = vor.u32 %v2523_v53, %v2519_v59 }
 0x256   : >> { %v2361_v61 = vld [vmem:[#allocation3 + $0xe8] sm:$0x3]  ;;  %2321 = vst.msk [vmem:[#allocation3 + $0x111] sm:$0xff] %vm278_vm0, %v2288_v10  ;;  %v4384_v44 = vadd.f32 %v4383_v18, %v4382_v37  ;;  %v4729_v4 = vpop.f32.mrb[104].mxu1  ;;  %v6486_v43 = vsel %vm715_vm2, %v2512_v0, %v2516_v33  ;;  %v6488_v40 = vpack.c.bf16 %v2360_v21, %v2359_v62  ;;  %v2362_v56 = vld [vmem:[#allocation3 + $0xf0] sm:$0xff]  ;;  %v2528_v0 = vrot.slane %v2526_v15, 1 }
 0x257   : >> { %v6482_v5 = vsel %vm972_vm3, %v7301_v35, %v7300_v51  ;;  %v2245_v41 = vadd.f32 %v4729_v4, %v2084_v2  ;;  %v2236_v7 = vpop.f32.mrb[105].mxu1  ;;  %2628 = vrot.lane.b32.xlu1 %v6486_v43, %s5080_s22  ;;  %v2092_v51 = vadd.f32 %v4381_v45, %v1931_v55  ;;  %v6492_v35 = vpack.c.bf16 %v2363_v12, %v2362_v56  ;;  %v2364_v4 = vld [vmem:[#allocation3 + $0x100] sm:$0x3] }
 0x258   : >> { %v6494_v23 = vpack.c.bf16 %v2361_v61, %v2361_v61  ;;  %v2237_v10 = vadd.f32 %v2236_v7, %v6426_v58  ;;  %v4730_v37 = vpop.f32.mrb[106].mxu1  ;;  %2775 = vrot.lane.b32.xlu0 %v6482_v5, %s5080_s22  ;;  %v2095_v33 = vadd.f32 %v4384_v44, %v1934_v26  ;;  %v2533_v53 = vshll.u32 %v6488_v40, 16 }
 0x259   : >> { %v2293_v2 = vmax.f32 %v2245_v41, 0.0  ;;  %v2248_v59 = vadd.f32 %v4730_v37, %v2087_v63  ;;  %v2239_v18 = vpop.f32.mrb[107].mxu1  ;;  %v2684_v62 = vrot.slane %v6293_v30, 1  ;;  %v2685_v45 = vrot.slane %v6295_v14, 1 }
 0x25a   : >> { %v2291_v12 = vmax.f32 %v2237_v10, 0.0  ;;  %v2240_v55 = vadd.f32 %v2239_v18, %v6428_v38  ;;  %v4385_v21 = vpop.f32.mrb[76].mxu0  ;;  %v6504_v58 = vsel %vm715_vm2, %v2524_v16, %v2528_v0  ;;  %v2535_v61 = vrot.slane %v2533_v53, 1 }
 0x25b   : >> { %2326 = vst.msk [vmem:[#allocation3 + $0x151] sm:$0xff] %vm278_vm0, %v2293_v2  ;;  %v2294_v15 = vmax.f32 %v2248_v59, 0.0  ;;  %v4386_v26 = vpop.f32.mrb[77].mxu0  ;;  %2743 = vrot.lane.b32.xlu1 %v6488_v40, %s5080_s22  ;;  %v2531_v63 = vshrl.u32 %v6488_v40, 16  ;;  %v2538_v14 = vshll.u32 %v6494_v23, 16  ;;  %v2545_v44 = vshll.u32 %v6492_v35, 16 }
 0x25c   : >> { %v1939_v38 = vadd.f32 %v6248_v27, %v6144_v57  ;;  %2324 = vst.msk [vmem:[#allocation3 + $0x139] sm:$0xff] %vm278_vm0, %v2291_v12  ;;  %v2292_v16 = vmax.f32 %v2240_v55, 0.0  ;;  %v4387_v56 = vadd.f32 %v4386_v26, %v4385_v21  ;;  %v4388_v41 = vpop.f32.mrb[78].mxu0  ;;  %2630 = vrot.lane.b32.xlu0 %v6504_v58, %s5080_s22  ;;  %v1942_v7 = vadd.f32 %v6252_v32, %v6144_v57  ;;  %v2365_v0 = vld [vmem:[#allocation3 + $0x108] sm:$0xff] }
 0x25d   : >> { %2327 = vst.msk [vmem:[#allocation3 + $0x159] sm:$0xff] %vm278_vm0, %v2294_v15  ;;  %v4389_v10 = vpop.f32.mrb[79].mxu0  ;;  %v2536_v37 = vor.u32 %v2535_v61, %v2531_v63  ;;  %v2366_v53 = vld [vmem:[#allocation3 + $0x110] sm:$0xff]  ;;  %v6520_v2 = vpack.c.bf16 %v2364_v4, %v2364_v4  ;;  %v6524_v12 = vsel %vm972_vm3, %v2684_v62, %v2685_v45  ;;  %v2540_v57 = vrot.slane %v2538_v14, 1  ;;  %v2369_v62 = vld [vmem:[#allocation3 + $0x128] sm:$0xff] }
 0x25e   : >> { %2325 = vst.msk [vmem:[#allocation3 + $0x141] sm:$0xff] %vm278_vm0, %v2292_v16  ;;  %v4390_v27 = vadd.f32 %v4389_v10, %v4388_v41  ;;  %v2100_v59 = vadd.f32 %v4387_v56, %v1939_v38  ;;  %v4733_v18 = vpop.f32.mrb[108].mxu1  ;;  %v6526_v55 = vpack.c.bf16 %v2366_v53, %v2365_v0  ;;  %v2687_v32 = vrot.slane %v6347_v60, 1  ;;  %v2367_v41 = vld [vmem:[#allocation3 + $0x118] sm:$0x3]  ;;  %v2368_v0 = vld [vmem:[#allocation3 + $0x120] sm:$0xff] }
 0x25f   : >> { %v2252_v21 = vpop.f32.mrb[109].mxu1  ;;  %2777 = vrot.lane.b32.xlu1 %v6524_v12, %s5080_s22  ;;  %v2688_v61 = vrot.slane %v6349_v3, 1  ;;  %v2547_v4 = vrot.slane %v2545_v44, 1  ;;  %v6535_v16 = vsel %vm715_vm2, %v2536_v37, %v2540_v57  ;;  %v2543_v56 = vshrl.u32 %v6492_v35, 16 }
 0x260   : >> { %v2261_v15 = vadd.f32 %v4733_v18, %v2100_v59  ;;  %v2253_v26 = vadd.f32 %v2252_v21, %v2092_v51  ;;  %v2103_v63 = vadd.f32 %v4390_v27, %v1942_v7  ;;  %v4734_v38 = vpop.f32.mrb[110].mxu1  ;;  %2745 = vrot.lane.b32.xlu0 %v6492_v35, %s5080_s22  ;;  %v2550_v14 = vshll.u32 %v6520_v2, 16 }
 0x261   : >> { %v2255_v45 = vpop.f32.mrb[111].mxu1  ;;  %v2557_v3 = vshll.u32 %v6526_v55, 16  ;;  %v6543_v53 = vsel %vm972_vm3, %v2687_v32, %v2688_v61  ;;  %v2548_v37 = vor.u32 %v2547_v4, %v2543_v56  ;;  %v6545_v27 = vpack.c.bf16 %v2369_v62, %v2368_v0  ;;  %v2370_v4 = vld [vmem:[#allocation3 + $0x130] sm:$0x3] }
 0x262   : >> { %v2297_v44 = vmax.f32 %v2261_v15, 0.0  ;;  %v2295_v10 = vmax.f32 %v2253_v26, 0.0  ;;  %v2264_v51 = vadd.f32 %v4734_v38, %v2103_v63  ;;  %v2256_v7 = vadd.f32 %v2255_v45, %v2095_v33 }
 0x263   : >> { %2632 = vrot.lane.b32.xlu1 %v6535_v16, %s5080_s22  ;;  %v6551_v33 = vpack.c.bf16 %v2367_v41, %v2367_v41  ;;  %v2552_v21 = vrot.slane %v2550_v14, 1  ;;  %v2690_v57 = vrot.slane %v6337_v20, 1  ;;  %v2691_v32 = vrot.slane %v6339_v8, 1  ;;  %v2371_v45 = vld [vmem:[#allocation3 + $0x138] sm:$0xff] }
 0x264   : >> { %2330 = vst.msk [vmem:[#allocation3 + $0x181] sm:$0xff] %vm278_vm0, %v2297_v44  ;;  %2328 = vst.msk [vmem:[#allocation3 + $0x169] sm:$0xff] %vm278_vm0, %v2295_v10  ;;  %v2298_v59 = vmax.f32 %v2264_v51, 0.0  ;;  %v2296_v18 = vmax.f32 %v2256_v7, 0.0  ;;  %2779 = vrot.lane.b32.xlu0 %v6543_v53, %s5080_s22  ;;  %v2559_v61 = vrot.slane %v2557_v3, 1  ;;  %v2569_v63 = vshll.u32 %v6545_v27, 16 }
 0x265   : >> { %v6560_v15 = vsel %vm715_vm2, %v2548_v37, %v2552_v21  ;;  %v2372_v26 = vld [vmem:[#allocation3 + $0x140] sm:$0xff]  ;;  %v2555_v38 = vshrl.u32 %v6526_v55, 16  ;;  %v2562_v62 = vshll.u32 %v6551_v33, 16  ;;  %v6567_v8 = vpack.c.bf16 %v2370_v4, %v2370_v4  ;;  %v2375_v7 = vld [vmem:[#allocation3 + $0x158] sm:$0xff]  ;;  %v2374_v21 = vld [vmem:[#allocation3 + $0x150] sm:$0xff] }
 0x266   : >> { %2331 = vst.msk [vmem:[#allocation3 + $0x189] sm:$0xff] %vm278_vm0, %v2298_v59  ;;  %2329 = vst.msk [vmem:[#allocation3 + $0x171] sm:$0xff] %vm278_vm0, %v2296_v18  ;;  %v6570_v56 = vsel %vm972_vm3, %v2690_v57, %v2691_v32  ;;  %v6572_v41 = vpack.c.bf16 %v2372_v26, %v2371_v45  ;;  %v2693_v3 = vrot.slane %v6398_v19, 1  ;;  %v2694_v44 = vrot.slane %v6400_v39, 1  ;;  %v2373_v59 = vld [vmem:[#allocation3 + $0x148] sm:$0x3] }
 0x267   : >> { %2747 = vrot.lane.b32.xlu1 %v6526_v55, %s5080_s22  ;;  %v2560_v14 = vor.u32 %v2559_v61, %v2555_v38  ;;  %v2571_v10 = vrot.slane %v2569_v63, 1  ;;  %v2564_v51 = vrot.slane %v2562_v62, 1  ;;  %v2567_v0 = vshrl.u32 %v6545_v27, 16  ;;  %v2376_v45 = vld [vmem:[#allocation3 + $0x160] sm:$0x3] }
 0x268   : >> { %2634 = vrot.lane.b32.xlu0 %v6560_v15, %s5080_s22  ;;  %v2574_v37 = vshll.u32 %v6567_v8, 16  ;;  %v2581_v57 = vshll.u32 %v6572_v41, 16  ;;  %v6589_v39 = vsel %vm972_vm3, %v2693_v3, %v2694_v44  ;;  %v6591_v61 = vpack.c.bf16 %v2375_v7, %v2374_v21 }
 0x269   : >> { %v6583_v18 = vsel %vm715_vm2, %v2560_v14, %v2564_v51  ;;  %v2572_v32 = vor.u32 %v2571_v10, %v2567_v0  ;;  %v6595_v4 = vpack.c.bf16 %v2373_v59, %v2373_v59  ;;  %v2696_v63 = vrot.slane %v6389_v31, 1 }
 0x26a   : >> { %v2576_v26 = vrot.slane %v2574_v37, 1  ;;  %v2697_v38 = vrot.slane %v6391_v47, 1  ;;  %v2583_v62 = vrot.slane %v2581_v57, 1  ;;  %v2593_v44 = vshll.u32 %v6591_v61, 16 }
 0x26b   : >> { %2781 = vrot.lane.b32.xlu1 %v6570_v56, %s5080_s22  ;;  %v2579_v10 = vshrl.u32 %v6572_v41, 16  ;;  %v2586_v51 = vshll.u32 %v6595_v4, 16  ;;  %v2377_v7 = vld [vmem:[#allocation3 + $0x168] sm:$0xff]  ;;  %v6609_v47 = vpack.c.bf16 %v2376_v45, %v2376_v45  ;;  %v2699_v21 = vrot.slane %v6442_v29, 1 }
 0x26c   : >> { %2749 = vrot.lane.b32.xlu0 %v6545_v27, %s5080_s22  ;;  %v6602_v14 = vsel %vm715_vm2, %v2572_v32, %v2576_v26  ;;  %v6612_v0 = vsel %vm972_vm3, %v2696_v63, %v2697_v38  ;;  %v2700_v57 = vrot.slane %v6448_v9, 1  ;;  %v2595_v32 = vrot.slane %v2593_v44, 1 }
 0x26d   : >> { %v2378_v3 = vld [vmem:[#allocation3 + $0x170] sm:$0xff]  ;;  %v2584_v37 = vor.u32 %v2583_v62, %v2579_v10  ;;  %v2588_v26 = vrot.slane %v2586_v51, 1  ;;  %v2591_v45 = vshrl.u32 %v6591_v61, 16  ;;  %v2598_v63 = vshll.u32 %v6609_v47, 16  ;;  %v2379_v38 = vld [vmem:[#allocation3 + $0x178] sm:$0x3] }
 0x26e   : >> { %v6614_v59 = vpack.c.bf16 %v2378_v3, %v2377_v7  ;;  %v6631_v9 = vsel %vm972_vm3, %v2699_v21, %v2700_v57  ;;  %v6635_v10 = vpack.c.bf16 %v2379_v38, %v2379_v38  ;;  %v2702_v7 = vrot.slane %v6436_v11, 1  ;;  %v2381_v21 = vld [vmem:[#allocation3 + $0x188] sm:$0xff] }
 0x26f   : >> { %2636 = vrot.lane.b32.xlu1 %v6583_v18, %s5080_s22  ;;  %v6625_v62 = vsel %vm715_vm2, %v2584_v37, %v2588_v26  ;;  %v2596_v44 = vor.u32 %v2595_v32, %v2591_v45  ;;  %v2600_v51 = vrot.slane %v2598_v63, 1  ;;  %v2703_v37 = vrot.slane %v6450_v17, 1  ;;  %v2380_v45 = vld [vmem:[#allocation3 + $0x180] sm:$0xff] }
 0x270   : >> { %2783 = vrot.lane.b32.xlu0 %v6589_v39, %s5080_s22  ;;  %v2605_v3 = vshll.u32 %v6614_v59, 16  ;;  %v2603_v57 = vshrl.u32 %v6614_v59, 16  ;;  %v2610_v32 = vshll.u32 %v6635_v10, 16  ;;  %v6651_v17 = vpack.c.bf16 %v2381_v21, %v2380_v45  ;;  %v2382_v21 = vld [vmem:[#allocation3 + $0x190] sm:$0x3] }
 0x271   : >> { %v6642_v6 = vsel %vm715_vm2, %v2596_v44, %v2600_v51  ;;  %v6649_v63 = vsel %vm972_vm3, %v2702_v7, %v2703_v37  ;;  %v2705_v44 = vrot.slane %v6488_v40, 1  ;;  %v2706_v51 = vrot.slane %v6494_v23, 1 }
 0x272   : >> { %v2607_v26 = vrot.slane %v2605_v3, 1  ;;  %v2383_v3 = vld [vmem:[#allocation3 + $0x198] sm:$0xff]  ;;  %v2612_v48 = vrot.slane %v2610_v32, 1  ;;  %v2708_v37 = vrot.slane %v6492_v35, 1  ;;  %v2711_v45 = vrot.slane %v6526_v55, 1 }
 0x273   : >> { %2751 = vrot.lane.b32.xlu1 %v6572_v41, %s5080_s22  ;;  %v6659_v13 = vpack.c.bf16 %v2384_v36, %v2383_v3  ;;  %v6669_v23 = vsel %vm972_vm3, %v2705_v44, %v2706_v51  ;;  %v2712_v36 = vrot.slane %v6551_v33, 1  ;;  %v2762_v32 = vshll.u32 %v6651_v17, 16 }
 0x274   : >> { %2638 = vrot.lane.b32.xlu0 %v6602_v14, %s5080_s22  ;;  %v2608_v38 = vor.u32 %v2607_v26, %v2603_v57  ;;  %v2709_v26 = vrot.slane %v6520_v2, 1  ;;  %v2385_v57 = vld [vmem:[#allocation3 + $0x1a8] sm:$0x3]  ;;  %v2714_v44 = vrot.slane %v6545_v27, 1  ;;  %v2715_v51 = vrot.slane %v6567_v8, 1 }
 0x275   : >> { %7302 = vst [vmem:[#allocation8_spill] sm:$0xff] %v6659_v13  ;;  %v2810_v2 = vshll.u32 %v6659_v13, 16  ;;  %v6687_v33 = vsel %vm972_vm3, %v2711_v45, %v2712_v36  ;;  %v2717_v42 = vrot.slane %v6572_v41, 1  ;;  %v2808_v54 = vshrl.u32 %v6659_v13, 16 }
 0x276   : >> { %v6662_v7 = vsel %vm715_vm2, %v2608_v38, %v2612_v48  ;;  %v2419_v48 = vpack.c.bf16 %v2382_v21, %v2382_v21  ;;  %v6676_v38 = vpack.c.bf16 %v2385_v57, %v2385_v57  ;;  %v6680_v3 = vsel %vm972_vm3, %v2708_v37, %v2709_v26 }
 0x277   : >> { %2785 = vrot.lane.b32.xlu1 %v6612_v0, %s5080_s22  ;;  %7303 = vst [vmem:[#allocation10_spill] sm:$0xff] %v6662_v7  ;;  %v2718_v21 = vrot.slane %v6595_v4, 1  ;;  %v2764_v57 = vrot.slane %v2762_v32, 1  ;;  %v2760_v37 = vshrl.u32 %v6651_v17, 16  ;;  %v2812_v8 = vrot.slane %v2810_v2, 1 }
 0x278   : >> { %2753 = vrot.lane.b32.xlu0 %v6591_v61, %s5080_s22  ;;  %7304 = vst [vmem:[#allocation9_spill] sm:$0xff] %v6676_v38  ;;  %v2767_v26 = vshll.u32 %v2419_v48, 16  ;;  %v2815_v52 = vshll.u32 %v6676_v38, 16  ;;  %v2720_v45 = vrot.slane %v6591_v61, 1  ;;  %v2721_v36 = vrot.slane %v6609_v47, 1 }
 0x279   : >> { %v6704_v4 = vsel %vm972_vm3, %v2717_v42, %v2718_v21  ;;  %v2765_v32 = vor.u32 %v2764_v57, %v2760_v37  ;;  %v2813_v13 = vor.u32 %v2812_v8, %v2808_v54  ;;  %v2724_v47 = vrot.slane %v6635_v10, 1  ;;  %v2615_v37 = vpop.permute.xlu1 %2614 }
 0x27a   : >> { %v2769_v2 = vrot.slane %v2767_v26, 1  ;;  %v2817_v38 = vrot.slane %v2815_v52, 1  ;;  %v2772_v21 = vrot.slane %v6651_v17, 1  ;;  %v2773_v57 = vrot.slane %v2419_v48, 1 }
 0x27b   : >> { %2640 = vrot.lane.b32.xlu1 %v6625_v62, %s5080_s22  ;;  %v2829_v8 = vsel %vm278_vm0, %v6103_v25, %v2615_v37 }
 0x27c   : >> { %2787 = vrot.lane.b32.xlu0 %v6631_v9, %s5080_s22  ;;  %v6716_v42 = vsel %vm715_vm2, %v2765_v32, %v2769_v2  ;;  %v2818_v54 = vsel %vm715_vm2, %v2813_v13, %v2817_v38  ;;  %v6729_v10 = vsel %vm972_vm3, %v2772_v21, %v2773_v57  ;;  %v2678_v13 = vrot.slane %v6103_v25, 1  ;;  %v5006_v32 = vld [vmem:[%s6095_s23 + $0x100] sm:$0xff]   ;;  %v5005_v25 = vld [vmem:[%s6095_s23 + $0x118] sm:$0xff]  }
 0x27d   : >> { %v2679_v38 = vrot.slane %v6105_v46, 1  ;;  %v5004_v46 = vld [vmem:[%s6095_s23 + $0x110] sm:$0xff]  }
 0x27f   : >> { %2755 = vrot.lane.b32.xlu1 %v6614_v59, %s5080_s22  ;;  %v2680_v26 = vsel %vm972_vm3, %v2678_v13, %v2679_v38 }
 0x280   : >> { %2642 = vrot.lane.b32.xlu0 %v6642_v6, %s5080_s22 }
 0x283   : >> { %2789 = vrot.lane.b32.xlu1 %v6649_v63, %s5080_s22 }
 0x284   : >> { %2757 = vrot.lane.b32.xlu0 %v6651_v17, %s5080_s22 }
 0x287   : >> { %2644 = vrot.lane.b32.xlu1 %v6662_v7, %s5080_s22  ;;  %v6697_v7 = vsel %vm972_vm3, %v2714_v44, %v2715_v51  ;;  %v6709_v44 = vsel %vm972_vm3, %v2720_v45, %v2721_v36  ;;  %v2723_v51 = vrot.slane %v6614_v59, 1  ;;  %v5003_v36 = vld [vmem:[%s6095_s23 + $0x108] sm:$0xff]  }
 0x288   : >> { %2791 = vrot.lane.b32.xlu0 %v6669_v23, %s5080_s22 }
 0x289   : >> { %v6722_v52 = vsel %vm972_vm3, %v2723_v51, %v2724_v47 }
 0x28b   : >> { %2793 = vrot.lane.b32.xlu1 %v6680_v3, %s5080_s22 }
 0x28c   : >> { %2795 = vrot.lane.b32.xlu0 %v6687_v33, %s5080_s22 }
 0x28f   : >> { %2797 = vrot.lane.b32.xlu1 %v6697_v7, %s5080_s22 }
 0x290   : >> { %2799 = vrot.lane.b32.xlu0 %v6704_v4, %s5080_s22 }
 0x293   : >> { %2801 = vrot.lane.b32.xlu1 %v6709_v44, %s5080_s22 }
 0x294   : >> { %2819 = vrot.lane.b32.xlu0 %v6716_v42, %s5080_s22 }
 0x297   : >> { %2803 = vrot.lane.b32.xlu1 %v6722_v52, %s5080_s22 }
 0x298   : >> { %2821 = vrot.lane.b32.xlu0 %v2818_v54, %s5080_s22 }
 0x29b   : >> { %2805 = vrot.lane.b32.xlu1 %v6729_v10, %s5080_s22  ;;  %s5081_s22 = smov (%p455_p11), [#allocation4]  }
 0x29c   : > { %s5011_s14 = sshll.u32 (%p455_p11), %s5081_s22, 4  ;;  %s5012_s14 = int_to_ptr.vmem [resolvable:$false] %s5011_s14 }
 0x29d   : > { %p5014_p1 = scmp.lt.s32.totalorder (%p455_p11), %s7190_s19, %s5012_s14 }
 0x2aa   : >> { %v2728_v48 = vpop.permute.xlu0 %2727 }
 0x2ab   : >> { %v2878_v45 = vsel %vm278_vm0, %v2680_v26, %v2728_v48 }
 0x2ac   : >> { %3298 = vmatprep.mubr.bf16.mxu0 %v2878_v45 }
 0x2ad   : >> { %3299 = vmatmul.mubr.bf16.vlgmr.msra.gmra.mrb[80].mxu0 %v2829_v8 }
 0x2ae   : >> { %4736 = vmatpush3.bf16.msra.mxu0 %v5006_v32  ;;  %v2730_v2 = vpop.permute.xlu0 %2729 }
 0x2af   : >> { %v2882_v51 = vsel %vm278_vm0, %v6482_v5, %v2730_v2  ;;  %4737 = vmatprep.subr.bf16.mxu0 %v5003_v36 }
 0x2b0   : >> { %3306 = vmatprep.mubr.bf16.mxu0 %v2882_v51 }
 0x2b1   : >> { %v2617_v47 = vpop.permute.xlu1 %2616 }
 0x2b2   : >> { %v2732_v54 = vpop.permute.xlu0 %2731  ;;  %4738 = vmatpush3.bf16.msra.mxu0 %v5003_v36  ;;  %v2832_v21 = vsel %vm278_vm0, %v6299_v50, %v2617_v47 }
 0x2b3   : >> { %4739 = vmatprep.subr.bf16.mxu0 %v5004_v46  ;;  %v2886_v57 = vsel %vm278_vm0, %v6524_v12, %v2732_v54 }
 0x2b5   : >> { %3307 = vmatmul.mubr.bf16.gmra.mrb[84].mxu0 %v2832_v21  ;;  %v2619_v13 = vpop.permute.xlu1 %2618 }
 0x2b6   : >> { %v2835_v38 = vsel %vm278_vm0, %v6293_v30, %v2619_v13  ;;  %v2734_v5 = vpop.permute.xlu0 %2733  ;;  %3314 = vmatprep.mubr.bf16.mxu0 %v2886_v57  ;;  %4740 = vmatpush3.bf16.msra.mxu0 %v5004_v46 }
 0x2b7   : >> { %3459 = vmatprep.mubr.bf16.mxu1 %v2835_v38  ;;  %4741 = vmatprep.subr.bf16.mxu0 %v5005_v25  ;;  %v2890_v48 = vsel %vm278_vm0, %v6543_v53, %v2734_v5 }
 0x2b9   : >> { %v2621_v37 = vpop.permute.xlu1 %2620 }
 0x2ba   : >> { %v2736_v26 = vpop.permute.xlu0 %2735  ;;  %4742 = vmatpush3.bf16.msra.mxu0 %v5005_v25  ;;  %v2838_v30 = vsel %vm278_vm0, %v6347_v60, %v2621_v37 }
 0x2bb   : >> { %v2894_v32 = vsel %vm278_vm0, %v6570_v56, %v2736_v26 }
 0x2bd   : >> { %3315 = vmatmul.mubr.bf16.gmra.mrb[88].mxu0 %v2835_v38  ;;  %v2623_v50 = vpop.permute.xlu1 %2622 }
 0x2be   : >> { %v2738_v8 = vpop.permute.xlu0 %2737  ;;  %3322 = vmatprep.mubr.bf16.mxu0 %v2890_v48  ;;  %v2841_v25 = vsel %vm278_vm0, %v6337_v20, %v2623_v50 }
 0x2bf   : >> { %v2898_v21 = vsel %vm278_vm0, %v6589_v39, %v2738_v8 }
 0x2c1   : >> { %v2625_v45 = vpop.permute.xlu1 %2624 }
 0x2c2   : >> { %v2740_v36 = vpop.permute.xlu0 %2739 }
 0x2c3   : >> { %v2902_v20 = vsel %vm278_vm0, %v6612_v0, %v2740_v36 }
 0x2c5   : >> { %3323 = vmatmul.mubr.bf16.gmra.mrb[92].mxu0 %v2838_v30  ;;  %v2627_v2 = vpop.permute.xlu1 %2626 }
 0x2c6   : >> { %v2742_v51 = vpop.permute.xlu0 %2741  ;;  %3330 = vmatprep.mubr.bf16.mxu0 %v2894_v32 }
 0x2c9   : >> { %v2629_v46 = vpop.permute.xlu1 %2628 }
 0x2ca   : >> { %v2776_v47 = vpop.permute.xlu0 %2775 }
 0x2cb   : >> { %v2942_v54 = vsel %vm278_vm0, %v6345_v22, %v2776_v47  ;;  %v2844_v22 = vsel %vm278_vm0, %v6398_v19, %v2625_v45  ;;  %v2906_v19 = vsel %vm278_vm0, %v6631_v9, %v2742_v51  ;;  %v2850_v47 = vsel %vm278_vm0, %v6442_v29, %v2629_v46 }
 0x2cc   : >> { %3460 = vmatmul.mubr.bf16.vlgmr.msra.gmra.mrb[112].mxu1 %v2942_v54 }
 0x2cd   : >> { %3331 = vmatmul.mubr.bf16.gmra.mrb[96].mxu0 %v2841_v25  ;;  %v2744_v60 = vpop.permute.xlu1 %2743  ;;  %3467 = vmatprep.mubr.bf16.mxu1 %v2838_v30 }
 0x2ce   : >> { %v2631_v57 = vpop.permute.xlu0 %2630  ;;  %3338 = vmatprep.mubr.bf16.mxu0 %v2898_v21 }
 0x2d1   : >> { %v2778_v13 = vpop.permute.xlu1 %2777 }
 0x2d2   : >> { %v2946_v38 = vsel %vm278_vm0, %v6355_v1, %v2778_v13  ;;  %v2746_v5 = vpop.permute.xlu0 %2745  ;;  %v2847_v1 = vsel %vm278_vm0, %v6389_v31, %v2627_v2  ;;  %v2910_v31 = vsel %vm278_vm0, %v6649_v63, %v2744_v60 }
 0x2d4   : >> { %3468 = vmatmul.mubr.bf16.gmra.mrb[116].mxu1 %v2946_v38 }
 0x2d5   : >> { %3339 = vmatmul.mubr.bf16.gmra.mrb[100].mxu0 %v2844_v22  ;;  %v2633_v37 = vpop.permute.xlu1 %2632  ;;  %3475 = vmatprep.mubr.bf16.mxu1 %v2841_v25  ;;  %v2853_v25 = vsel %vm278_vm0, %v6436_v11, %v2631_v57 }
 0x2d6   : >> { %v2780_v26 = vpop.permute.xlu0 %2779  ;;  %3346 = vmatprep.mubr.bf16.mxu0 %v2902_v20  ;;  %v2856_v60 = vsel %vm278_vm0, %v6488_v40, %v2633_v37 }
 0x2d7   : >> { %v2950_v8 = vsel %vm278_vm0, %v6396_v28, %v2780_v26 }
 0x2d9   : >> { %v2748_v48 = vpop.permute.xlu1 %2747 }
 0x2da   : >> { %v2635_v50 = vpop.permute.xlu0 %2634  ;;  %v2918_v11 = vsel %vm278_vm0, %v6680_v3, %v2748_v48 }
 0x2dc   : >> { %3476 = vmatmul.mubr.bf16.gmra.mrb[120].mxu1 %v2950_v8 }
 0x2dd   : >> { %3347 = vmatmul.mubr.bf16.gmra.mrb[104].mxu0 %v2847_v1  ;;  %v2782_v45 = vpop.permute.xlu1 %2781  ;;  %3483 = vmatprep.mubr.bf16.mxu1 %v2844_v22 }
 0x2de   : >> { %v2750_v36 = vpop.permute.xlu0 %2749  ;;  %3354 = vmatprep.mubr.bf16.mxu0 %v2906_v19  ;;  %v2954_v32 = vsel %vm278_vm0, %v6406_v49, %v2782_v45  ;;  %v2914_v49 = vsel %vm278_vm0, %v6669_v23, %v2746_v5  ;;  %v2859_v5 = vsel %vm278_vm0, %v6492_v35, %v2635_v50 }
 0x2df   : >> { %v2922_v40 = vsel %vm278_vm0, %v6687_v33, %v2750_v36 }
 0x2e1   : >> { %v2637_v30 = vpop.permute.xlu1 %2636 }
 0x2e2   : >> { %v2784_v28 = vpop.permute.xlu0 %2783  ;;  %v2862_v26 = vsel %vm278_vm0, %v6526_v55, %v2637_v30 }
 0x2e3   : >> { %v2958_v54 = vsel %vm278_vm0, %v6440_v24, %v2784_v28  ;;  %v7305_v28 = vld [vmem:[#allocation8_spill] sm:$0xff] }
 0x2e4   : >> { %3484 = vmatmul.mubr.bf16.gmra.mrb[124].mxu1 %v2954_v32 }
 0x2e5   : >> { %3355 = vmatmul.mubr.bf16.gmra.mrb[108].mxu0 %v2850_v47  ;;  %3491 = vmatprep.mubr.bf16.mxu1 %v2847_v1  ;;  %v2752_v2 = vpop.permute.xlu1 %2751 }
 0x2e6   : >> { %3362 = vmatprep.mubr.bf16.mxu0 %v2910_v31  ;;  %v2639_v51 = vpop.permute.xlu0 %2638  ;;  %v7306_v31 = vld [vmem:[#allocation10_spill] sm:$0xff] }
 0x2e7   : >> { %v2865_v8 = vsel %vm278_vm0, %v6545_v27, %v2639_v51 }
 0x2e9   : >> { %v2786_v29 = vpop.permute.xlu1 %2785 }
 0x2ea   : >> { %v2754_v46 = vpop.permute.xlu0 %2753  ;;  %v2962_v21 = vsel %vm278_vm0, %v6457_v34, %v2786_v29 }
 0x2ec   : >> { %3492 = vmatmul.mubr.bf16.gmra.mrb[128].mxu1 %v2958_v54 }
 0x2ed   : >> { %3363 = vmatmul.mubr.bf16.gmra.mrb[112].mxu0 %v2853_v25  ;;  %3499 = vmatprep.mubr.bf16.mxu1 %v2850_v47  ;;  %v2641_v13 = vpop.permute.xlu1 %2640 }
 0x2ee   : >> { %3370 = vmatprep.mubr.bf16.mxu0 %v2914_v49  ;;  %v2788_v24 = vpop.permute.xlu0 %2787  ;;  %v2868_v19 = vsel %vm278_vm0, %v6572_v41, %v2641_v13 }
 0x2ef   : >> { %v2966_v38 = vsel %vm278_vm0, %v6486_v43, %v2788_v24  ;;  %v2926_v43 = vsel %vm278_vm0, %v6697_v7, %v2752_v2 }
 0x2f1   : >> { %v2756_v57 = vpop.permute.xlu1 %2755 }
 0x2f2   : >> { %v2643_v34 = vpop.permute.xlu0 %2642 }
 0x2f3   : >> { %v2871_v36 = vsel %vm278_vm0, %v6591_v61, %v2643_v34 }
 0x2f4   : >> { %3500 = vmatmul.mubr.bf16.gmra.mrb[132].mxu1 %v2962_v21 }
 0x2f5   : >> { %3371 = vmatmul.mubr.bf16.gmra.mrb[116].mxu0 %v2856_v60  ;;  %3507 = vmatprep.mubr.bf16.mxu1 %v2853_v25  ;;  %v2790_v22 = vpop.permute.xlu1 %2789 }
 0x2f6   : >> { %3378 = vmatprep.mubr.bf16.mxu0 %v2918_v11  ;;  %v2758_v20 = vpop.permute.xlu0 %2757  ;;  %v2970_v37 = vsel %vm278_vm0, %v6504_v58, %v2790_v22  ;;  %v2930_v58 = vsel %vm278_vm0, %v6704_v4, %v2754_v46 }
 0x2f9   : >> { %v2645_v48 = vpop.permute.xlu1 %2644 }
 0x2fa   : >> { %v2792_v35 = vpop.permute.xlu0 %2791  ;;  %v2874_v32 = vsel %vm278_vm0, %v6614_v59, %v2645_v48 }
 0x2fb   : >> { %v2974_v50 = vsel %vm278_vm0, %v6535_v16, %v2792_v35  ;;  %v2934_v16 = vsel %vm278_vm0, %v6709_v44, %v2756_v57 }
 0x2fc   : >> { %3508 = vmatmul.mubr.bf16.gmra.mrb[136].mxu1 %v2966_v38 }
 0x2fd   : >> { %3379 = vmatmul.mubr.bf16.gmra.mrb[120].mxu0 %v2859_v5  ;;  %3515 = vmatprep.mubr.bf16.mxu1 %v2856_v60  ;;  %v2794_v55 = vpop.permute.xlu1 %2793 }
 0x2fe   : >> { %3386 = vmatprep.mubr.bf16.mxu0 %v2922_v40  ;;  %v2978_v1 = vsel %vm278_vm0, %v6560_v15, %v2794_v55  ;;  %v2796_v27 = vpop.permute.xlu0 %2795  ;;  %v2938_v15 = vsel %vm278_vm0, %v6722_v52, %v2758_v20  ;;  %v6877_v40 = vld [vmem:[%s610_s15] ss:$0 sm:$0xff]  ;;  %s5013_s15 = scalar_lea.vmem (%p455_p11), %s5012_s14, 8192 }
 0x2ff   : >> { %v2982_v45 = vsel %vm278_vm0, %v6583_v18, %v2796_v27  ;;  %p5015_p2 = scmp.lt.s32.totalorder (%p455_p11), %s5013_s15, %s5007_s9 }
 0x301   : >> { %v2798_v41 = vpop.permute.xlu1 %2797  ;;  %p5016_p3 = por (%p455_p11), %p5015_p2, %p5014_p1 }
 0x302   : >> { %v2986_v30 = vsel %vm278_vm0, %v6602_v14, %v2798_v41  ;;  %v2800_v18 = vpop.permute.xlu0 %2799 }
 0x303   : >> { %v2990_v61 = vsel %vm278_vm0, %v6625_v62, %v2800_v18  ;;  %p5017_p4 = pnand (%p455_p11), %p5016_p3, %p5010_p0 }
 0x304   : >> { %3516 = vmatmul.mubr.bf16.gmra.mrb[140].mxu1 %v2970_v37 }
 0x305   : >> { %3387 = vmatmul.mubr.bf16.gmra.mrb[124].mxu0 %v2862_v26  ;;  %3523 = vmatprep.mubr.bf16.mxu1 %v2859_v5  ;;  %v2802_v14 = vpop.permute.xlu1 %2801 }
 0x306   : >> { %3394 = vmatprep.mubr.bf16.mxu0 %v2926_v43  ;;  %v2820_v59 = vpop.permute.xlu0 %2819  ;;  %v2994_v47 = vsel %vm278_vm0, %v6642_v6, %v2802_v14 }
 0x309   : >> { %v2804_v62 = vpop.permute.xlu1 %2803 }
 0x30a   : >> { %v2998_v2 = vsel %vm278_vm0, %v7306_v31, %v2804_v62 }
 0x30c   : >> { %3524 = vmatmul.mubr.bf16.gmra.mrb[144].mxu1 %v2974_v50 }
 0x30d   : >> { %3395 = vmatmul.mubr.bf16.gmra.mrb[128].mxu0 %v2865_v8  ;;  %3531 = vmatprep.mubr.bf16.mxu1 %v2862_v26  ;;  %v2806_v6 = vpop.permute.xlu1 %2805 }
 0x30e   : >> { %3402 = vmatprep.mubr.bf16.mxu0 %v2930_v58 }
 0x314   : >> { %3532 = vmatmul.mubr.bf16.gmra.mrb[148].mxu1 %v2978_v1 }
 0x315   : >> { %3403 = vmatmul.mubr.bf16.gmra.mrb[132].mxu0 %v2868_v19  ;;  %3539 = vmatprep.mubr.bf16.mxu1 %v2865_v8 }
 0x316   : >> { %3410 = vmatprep.mubr.bf16.mxu0 %v2934_v16 }
 0x31c   : >> { %3540 = vmatmul.mubr.bf16.gmra.mrb[152].mxu1 %v2982_v45 }
 0x31d   : >> { %3411 = vmatmul.mubr.bf16.gmra.mrb[136].mxu0 %v2871_v36  ;;  %3547 = vmatprep.mubr.bf16.mxu1 %v2868_v19 }
 0x31e   : >> { %3418 = vmatprep.mubr.bf16.mxu0 %v2938_v15 }
 0x324   : >> { %3548 = vmatmul.mubr.bf16.gmra.mrb[156].mxu1 %v2986_v30 }
 0x325   : >> { %3419 = vmatmul.mubr.bf16.gmra.mrb[140].mxu0 %v2874_v32  ;;  %3555 = vmatprep.mubr.bf16.mxu1 %v2871_v36 }
 0x326   : >> { %4743 = vmatprep.mubr.msk.bf16.mxu0 %vm278_vm0, %v6524_v12  ;;  %v3005_v12 = vsel %vm278_vm0, %v6651_v17, %v2820_v59 }
 0x32c   : >> { %3556 = vmatmul.mubr.bf16.gmra.mrb[160].mxu1 %v2990_v61 }
 0x32d   : >> { %3563 = vmatprep.mubr.bf16.mxu1 %v2874_v32  ;;  %4744 = vmatmul.mubr.msk.bf16.vlgmr.msra.gmra.mrb[0].mxu0 %vm278_vm0, %v6543_v53  ;;  %v2822_v53 = vpop.permute.xlu0 %2821 }
 0x32e   : >> { %4747 = vmatprep.mubr.msk.bf16.mxu0 %vm278_vm0, %v6570_v56  ;;  %v3008_v56 = vsel %vm278_vm0, %v7305_v28, %v2822_v53 }
 0x334   : >> { %3564 = vmatmul.mubr.bf16.gmra.mrb[164].mxu1 %v2994_v47 }
 0x335   : >> { %3571 = vmatprep.mubr.bf16.mxu1 %v3005_v12  ;;  %4748 = vmatmul.mubr.msk.bf16.gmra.mrb[4].mxu0 %vm278_vm0, %v6589_v39  ;;  %v3002_v39 = vsel %vm278_vm0, %v6716_v42, %v2806_v6 }
 0x336   : >> { %4751 = vmatprep.mubr.msk.bf16.mxu0 %vm278_vm0, %v6612_v0  ;;  %v2825_v0 = vrot.slane %v7305_v28, 1 }
 0x33c   : >> { %3572 = vmatmul.mubr.bf16.gmra.mrb[168].mxu1 %v2998_v2 }
 0x33d   : >> { %4752 = vmatmul.mubr.msk.bf16.gmra.mrb[8].mxu0 %vm278_vm0, %v6631_v9  ;;  %3579 = vmatprep.mubr.bf16.mxu1 %v3008_v56  ;;  %v7307_v9 = vld [vmem:[#allocation9_spill] sm:$0xff] }
 0x33e   : >> { %4755 = vmatprep.mubr.msk.bf16.mxu0 %vm278_vm0, %v6649_v63  ;;  %v2826_v63 = vrot.slane %v7307_v9, 1 }
 0x340   : >> { %v2827_v17 = vsel %vm972_vm3, %v2825_v0, %v2826_v63 }
 0x344   : >> { %3580 = vmatmul.mubr.bf16.gmra.mrb[172].mxu1 %v3002_v39 }
 0x345   : >> { %4756 = vmatmul.mubr.msk.bf16.gmra.mrb[12].mxu0 %vm278_vm0, %v6669_v23 }
 0x346   : >> { %4759 = vmatprep.mubr.msk.bf16.mxu0 %vm278_vm0, %v6680_v3 }
 0x34d   : >> { %4760 = vmatmul.mubr.msk.bf16.gmra.mrb[144].mxu0 %vm278_vm0, %v6687_v33 }
 0x34e   : >> { %4763 = vmatprep.mubr.msk.bf16.mxu0 %vm278_vm0, %v6697_v7 }
 0x355   : >> { %4764 = vmatmul.mubr.msk.bf16.gmra.mrb[148].mxu0 %vm278_vm0, %v6704_v4 }
 0x356   : >> { %4767 = vmatprep.mubr.msk.bf16.mxu0 %vm278_vm0, %v6709_v44 }
 0x35d   : >> { %4768 = vmatmul.mubr.msk.bf16.gmra.mrb[152].mxu0 %vm278_vm0, %v6722_v52 }
 0x35e   : >> { %4771 = vmatprep.mubr.msk.bf16.mxu0 %vm278_vm0, %v6729_v10 }
 0x365   : >> { %4772 = vmatmul.mubr.msk.bf16.gmra.mrb[156].mxu0 %vm278_vm0, %v2827_v17 }
 0x380   : >> { %v4427_v7 = vpop.f32.mrb[80].mxu0 }
 0x381   : >> { %v4428_v23 = vpop.f32.mrb[81].mxu0 }
 0x382   : >> { %v4429_v3 = vadd.f32 %v4428_v23, %v4427_v7  ;;  %v4430_v33 = vpop.f32.mrb[82].mxu0 }
 0x383   : >> { %v4431_v4 = vpop.f32.mrb[83].mxu0 }
 0x384   : >> { %v4432_v44 = vadd.f32 %v4431_v4, %v4430_v33  ;;  %v3301_v26 = vadd.f32 %v4429_v3, %v6877_v40 }
 0x386   : >> { %v3304_v55 = vadd.f32 %v4432_v44, %v6877_v40 }
 0x388   : >> { %v4433_v42 = vpop.f32.mrb[84].mxu0 }
 0x389   : >> { %v4434_v52 = vpop.f32.mrb[85].mxu0 }
 0x38a   : >> { %v4435_v51 = vadd.f32 %v4434_v52, %v4433_v42  ;;  %v4436_v54 = vpop.f32.mrb[86].mxu0 }
 0x38b   : >> { %v4437_v10 = vpop.f32.mrb[87].mxu0 }
 0x38c   : >> { %v4438_v25 = vadd.f32 %v4437_v10, %v4436_v54  ;;  %v3309_v30 = vadd.f32 %v4435_v51, %v6877_v40 }
 0x38e   : >> { %v3312_v12 = vadd.f32 %v4438_v25, %v6877_v40 }
 0x390   : >> { %v4439_v49 = vpop.f32.mrb[88].mxu0 }
 0x391   : >> { %v4440_v29 = vpop.f32.mrb[89].mxu0 }
 0x392   : >> { %v4441_v46 = vadd.f32 %v4440_v29, %v4439_v49  ;;  %v4442_v21 = vpop.f32.mrb[90].mxu0 }
 0x393   : >> { %v4443_v60 = vpop.f32.mrb[91].mxu0 }
 0x394   : >> { %v4444_v13 = vadd.f32 %v4443_v60, %v4442_v21  ;;  %v3317_v0 = vadd.f32 %v4441_v46, %v6877_v40 }
 0x396   : >> { %v3320_v33 = vadd.f32 %v4444_v13, %v6877_v40 }
 0x398   : >> { %v4445_v11 = vpop.f32.mrb[92].mxu0 }
 0x399   : >> { %v4446_v24 = vpop.f32.mrb[93].mxu0 }
 0x39a   : >> { %v4447_v57 = vadd.f32 %v4446_v24, %v4445_v11  ;;  %v4448_v38 = vpop.f32.mrb[94].mxu0 }
 0x39b   : >> { %v4449_v5 = vpop.f32.mrb[95].mxu0 }
 0x39c   : >> { %v4450_v34 = vadd.f32 %v4449_v5, %v4448_v38  ;;  %v3325_v49 = vadd.f32 %v4447_v57, %v6877_v40 }
 0x39e   : >> { %v3328_v13 = vadd.f32 %v4450_v34, %v6877_v40 }
 0x39f   : >> { %v4539_v22 = vpop.f32.mrb[112].mxu1 }
 0x3a0   : >> { %v4451_v20 = vpop.f32.mrb[96].mxu0  ;;  %v4540_v37 = vpop.f32.mrb[113].mxu1 }
 0x3a1   : >> { %v4541_v43 = vadd.f32 %v4540_v37, %v4539_v22  ;;  %v4452_v35 = vpop.f32.mrb[97].mxu0  ;;  %v4542_v48 = vpop.f32.mrb[114].mxu1 }
 0x3a2   : >> { %v4453_v50 = vadd.f32 %v4452_v35, %v4451_v20  ;;  %v4454_v8 = vpop.f32.mrb[98].mxu0  ;;  %v4543_v58 = vpop.f32.mrb[115].mxu1 }
 0x3a3   : >> { %v6881_v1 = vadd.f32 %v4541_v43, %v3301_v26  ;;  %v4544_v19 = vadd.f32 %v4543_v58, %v4542_v48  ;;  %v4455_v16 = vpop.f32.mrb[99].mxu0 }
 0x3a4   : >> { %v4456_v27 = vadd.f32 %v4455_v16, %v4454_v8  ;;  %v3333_v57 = vadd.f32 %v4453_v50, %v6877_v40 }
 0x3a5   : >> { %v6883_v45 = vadd.f32 %v4544_v19, %v3304_v55 }
 0x3a6   : >> { %v3336_v34 = vadd.f32 %v4456_v27, %v6877_v40 }
 0x3a7   : >> { %v4545_v36 = vpop.f32.mrb[116].mxu1 }
 0x3a8   : >> { %v4457_v15 = vpop.f32.mrb[100].mxu0  ;;  %v4546_v41 = vpop.f32.mrb[117].mxu1 }
 0x3a9   : >> { %v4547_v32 = vadd.f32 %v4546_v41, %v4545_v36  ;;  %v4458_v18 = vpop.f32.mrb[101].mxu0  ;;  %v4548_v61 = vpop.f32.mrb[118].mxu1 }
 0x3aa   : >> { %v4459_v14 = vadd.f32 %v4458_v18, %v4457_v15  ;;  %v4460_v59 = vpop.f32.mrb[102].mxu0  ;;  %v4549_v47 = vpop.f32.mrb[119].mxu1 }
 0x3ab   : >> { %v6887_v53 = vadd.f32 %v4547_v32, %v3309_v30  ;;  %v4550_v62 = vadd.f32 %v4549_v47, %v4548_v61  ;;  %v4461_v28 = vpop.f32.mrb[103].mxu0 }
 0x3ac   : >> { %v4462_v56 = vadd.f32 %v4461_v28, %v4460_v59  ;;  %v3341_v50 = vadd.f32 %v4459_v14, %v6877_v40 }
 0x3ad   : >> { %v6889_v31 = vadd.f32 %v4550_v62, %v3312_v12 }
 0x3af   : >> { %v4551_v2 = vpop.f32.mrb[120].mxu1 }
 0x3b0   : >> { %v4463_v6 = vpop.f32.mrb[104].mxu0  ;;  %v4552_v39 = vpop.f32.mrb[121].mxu1 }
 0x3b1   : >> { %v4553_v9 = vadd.f32 %v4552_v39, %v4551_v2  ;;  %v4464_v63 = vpop.f32.mrb[105].mxu0  ;;  %v4554_v17 = vpop.f32.mrb[122].mxu1 }
 0x3b2   : >> { %v4465_v7 = vadd.f32 %v4464_v63, %v4463_v6  ;;  %v4466_v23 = vpop.f32.mrb[106].mxu0  ;;  %v4555_v3 = vpop.f32.mrb[123].mxu1  ;;  %v3344_v6 = vadd.f32 %v4462_v56, %v6877_v40 }
 0x3b3   : >> { %v6893_v4 = vadd.f32 %v4553_v9, %v3317_v0  ;;  %v4556_v44 = vadd.f32 %v4555_v3, %v4554_v17  ;;  %v4467_v42 = vpop.f32.mrb[107].mxu0 }
 0x3b4   : >> { %v4468_v52 = vadd.f32 %v4467_v42, %v4466_v23 }
 0x3b5   : >> { %v6895_v51 = vadd.f32 %v4556_v44, %v3320_v33  ;;  %v3349_v33 = vadd.f32 %v4465_v7, %v6877_v40 }
 0x3b7   : >> { %v4557_v54 = vpop.f32.mrb[124].mxu1 }
 0x3b8   : >> { %v4469_v10 = vpop.f32.mrb[108].mxu0  ;;  %v4558_v25 = vpop.f32.mrb[125].mxu1 }
 0x3b9   : >> { %v4559_v29 = vadd.f32 %v4558_v25, %v4557_v54  ;;  %v4470_v46 = vpop.f32.mrb[109].mxu0  ;;  %v4560_v21 = vpop.f32.mrb[126].mxu1 }
 0x3ba   : >> { %v4471_v60 = vadd.f32 %v4470_v46, %v4469_v10  ;;  %v4472_v11 = vpop.f32.mrb[110].mxu0  ;;  %v4561_v24 = vpop.f32.mrb[127].mxu1 }
 0x3bb   : >> { %v6899_v38 = vadd.f32 %v4559_v29, %v3325_v49  ;;  %v4562_v5 = vadd.f32 %v4561_v24, %v4560_v21  ;;  %v4473_v22 = vpop.f32.mrb[111].mxu0  ;;  %v3352_v49 = vadd.f32 %v4468_v52, %v6877_v40 }
 0x3bc   : >> { %v4474_v20 = vadd.f32 %v4473_v22, %v4472_v11  ;;  %v3357_v22 = vadd.f32 %v4471_v60, %v6877_v40 }
 0x3bd   : >> { %v6901_v37 = vadd.f32 %v4562_v5, %v3328_v13 }
 0x3bf   : >> { %v4563_v26 = vpop.f32.mrb[128].mxu1 }
 0x3c0   : >> { %v4475_v43 = vpop.f32.mrb[112].mxu0  ;;  %v4564_v35 = vpop.f32.mrb[129].mxu1 }
 0x3c1   : >> { %v4565_v48 = vadd.f32 %v4564_v35, %v4563_v26  ;;  %v4476_v8 = vpop.f32.mrb[113].mxu0  ;;  %v4566_v58 = vpop.f32.mrb[130].mxu1 }
 0x3c2   : >> { %v4477_v55 = vadd.f32 %v4476_v8, %v4475_v43  ;;  %v4478_v19 = vpop.f32.mrb[114].mxu0  ;;  %v4567_v16 = vpop.f32.mrb[131].mxu1  ;;  %v3360_v8 = vadd.f32 %v4474_v20, %v6877_v40 }
 0x3c3   : >> { %v6905_v36 = vadd.f32 %v4565_v48, %v3333_v57  ;;  %v4568_v15 = vadd.f32 %v4567_v16, %v4566_v58  ;;  %v4479_v41 = vpop.f32.mrb[115].mxu0 }
 0x3c4   : >> { %v6907_v30 = vadd.f32 %v4479_v41, %v4478_v19  ;;  %v6945_v41 = vld [vmem:[%s623_s18] ss:$0 sm:$0xff] }
 0x3c5   : >> { %v6909_v32 = vadd.f32 %v4568_v15, %v3336_v34 }
 0x3c7   : >> { %v4569_v18 = vpop.f32.mrb[132].mxu1 }
 0x3c8   : >> { %v4481_v61 = vpop.f32.mrb[116].mxu0  ;;  %v4570_v59 = vpop.f32.mrb[133].mxu1 }
 0x3c9   : >> { %v4571_v47 = vadd.f32 %v4570_v59, %v4569_v18  ;;  %v4482_v12 = vpop.f32.mrb[117].mxu0  ;;  %v4572_v62 = vpop.f32.mrb[134].mxu1  ;;  %v3365_v59 = vadd.f32 %v4477_v55, %v6877_v40 }
 0x3ca   : >> { %v6912_v28 = vadd.f32 %v4482_v12, %v4481_v61  ;;  %v4484_v2 = vpop.f32.mrb[118].mxu0  ;;  %v4573_v27 = vpop.f32.mrb[135].mxu1 }
 0x3cb   : >> { %v6915_v39 = vadd.f32 %v4571_v47, %v3341_v50  ;;  %v4574_v0 = vadd.f32 %v4573_v27, %v4572_v62  ;;  %v4485_v9 = vpop.f32.mrb[119].mxu0  ;;  %v7308_v27 = vld [vmem:[#allocation7_spill] sm:$0xff] }
 0x3cc   : >> { %v6917_v63 = vadd.f32 %v4485_v9, %v4484_v2 }
 0x3cd   : >> { %v6919_v17 = vadd.f32 %v4574_v0, %v3344_v6  ;;  %v1466_v6 = vadd.f32 %v6945_v41, %v7308_v27  ;;  %v3368_v0 = vadd.f32 %v6907_v30, %v6877_v40 }
 0x3cf   : >> { %v4575_v23 = vpop.f32.mrb[136].mxu1 }
 0x3d0   : >> { %v4487_v3 = vpop.f32.mrb[120].mxu0  ;;  %v4576_v14 = vpop.f32.mrb[137].mxu1 }
 0x3d1   : >> { %v4577_v44 = vadd.f32 %v4576_v14, %v4575_v23  ;;  %v4488_v42 = vpop.f32.mrb[121].mxu0  ;;  %v4578_v54 = vpop.f32.mrb[138].mxu1 }
 0x3d2   : >> { %v6922_v10 = vadd.f32 %v4488_v42, %v4487_v3  ;;  %v4490_v25 = vpop.f32.mrb[122].mxu0  ;;  %v4579_v56 = vpop.f32.mrb[139].mxu1 }
 0x3d3   : >> { %v6925_v29 = vadd.f32 %v4577_v44, %v3349_v33  ;;  %v4580_v46 = vadd.f32 %v4579_v56, %v4578_v54  ;;  %v4491_v21 = vpop.f32.mrb[123].mxu0  ;;  %v7309_v33 = vld [vmem:[#allocation15_spill] sm:$0xff] }
 0x3d4   : >> { %v6927_v11 = vadd.f32 %v4491_v21, %v4490_v25  ;;  %v1469_v55 = vadd.f32 %v6945_v41, %v7309_v33 }
 0x3d5   : >> { %v6929_v24 = vadd.f32 %v4580_v46, %v3352_v49  ;;  %v3373_v46 = vadd.f32 %v6912_v28, %v6877_v40  ;;  %v7311_v28 = vld [vmem:[#allocation14_spill] sm:$0xff] }
 0x3d7   : >> { %v4581_v13 = vpop.f32.mrb[140].mxu1 }
 0x3d8   : >> { %v4493_v7 = vpop.f32.mrb[124].mxu0  ;;  %v4582_v5 = vpop.f32.mrb[141].mxu1 }
 0x3d9   : >> { %v4583_v26 = vadd.f32 %v4582_v5, %v4581_v13  ;;  %v4494_v43 = vpop.f32.mrb[125].mxu0  ;;  %v4584_v35 = vpop.f32.mrb[142].mxu1 }
 0x3da   : >> { %v6932_v57 = vadd.f32 %v4494_v43, %v4493_v7  ;;  %v4496_v52 = vpop.f32.mrb[126].mxu0  ;;  %v4585_v48 = vpop.f32.mrb[143].mxu1 }
 0x3db   : >> { %v6935_v58 = vadd.f32 %v4583_v26, %v3357_v22  ;;  %v4586_v19 = vadd.f32 %v4585_v48, %v4584_v35  ;;  %v4497_v16 = vpop.f32.mrb[127].mxu0  ;;  %v7310_v26 = vld [vmem:[#allocation13_spill] sm:$0xff]  ;;  %v3376_v35 = vadd.f32 %v6917_v63, %v6877_v40 }
 0x3dc   : >> { %v6937_v34 = vadd.f32 %v4497_v16, %v4496_v52  ;;  %v1474_v43 = vadd.f32 %v7310_v26, %v6945_v41  ;;  %v1477_v16 = vadd.f32 %v7311_v28, %v6945_v41 }
 0x3dd   : >> { %v6943_v60 = vadd.f32 %v4586_v19, %v3360_v8 }
 0x3df   : >> { %v4587_v15 = vpop.f32.mrb[144].mxu1 }
 0x3e0   : >> { %v4499_v18 = vpop.f32.mrb[128].mxu0  ;;  %v4588_v61 = vpop.f32.mrb[145].mxu1 }
 0x3e1   : >> { %v4589_v20 = vadd.f32 %v4588_v61, %v4587_v15  ;;  %v4500_v50 = vpop.f32.mrb[129].mxu0  ;;  %v4590_v47 = vpop.f32.mrb[146].mxu1 }
 0x3e2   : >> { %v6948_v12 = vadd.f32 %v4500_v50, %v4499_v18  ;;  %v4502_v62 = vpop.f32.mrb[130].mxu0  ;;  %v4591_v2 = vpop.f32.mrb[147].mxu1 }
 0x3e3   : >> { %v3526_v9 = vadd.f32 %v4589_v20, %v3365_v59  ;;  %v4592_v23 = vadd.f32 %v4591_v2, %v4590_v47  ;;  %v4503_v3 = vpop.f32.mrb[131].mxu0  ;;  %v3381_v47 = vadd.f32 %v6922_v10, %v6877_v40 }
 0x3e4   : >> { %v6954_v14 = vadd.f32 %v4503_v3, %v4502_v62  ;;  %v3384_v3 = vadd.f32 %v6927_v11, %v6877_v40 }
 0x3e5   : >> { %v3529_v44 = vadd.f32 %v4592_v23, %v3368_v0  ;;  %v6958_v42 = vadd.f32 %v3526_v9, %v1466_v6  ;;  %v7312_v9 = vld [vmem:[#allocation17_spill] sm:$0xff] }
 0x3e6   : >> { %v1482_v23 = vadd.f32 %v6945_v41, %v7312_v9 }
 0x3e7   : >> { %v4593_v54 = vpop.f32.mrb[148].mxu1  ;;  %v6960_v25 = vadd.f32 %v3529_v44, %v1469_v55 }
 0x3e8   : >> { %v4505_v56 = vpop.f32.mrb[132].mxu0  ;;  %v4594_v49 = vpop.f32.mrb[149].mxu1 }
 0x3e9   : >> { %v4595_v30 = vadd.f32 %v4594_v49, %v4593_v54  ;;  %v4506_v21 = vpop.f32.mrb[133].mxu0  ;;  %v4596_v13 = vpop.f32.mrb[150].mxu1 }
 0x3ea   : >> { %v6964_v7 = vadd.f32 %v4506_v21, %v4505_v56  ;;  %v4508_v5 = vpop.f32.mrb[134].mxu0  ;;  %v4597_v22 = vpop.f32.mrb[151].mxu1  ;;  %v7313_v56 = vld [vmem:[#allocation19_spill] sm:$0xff] }
 0x3eb   : >> { %v3534_v52 = vadd.f32 %v4595_v30, %v3373_v46  ;;  %v4598_v48 = vadd.f32 %v4597_v22, %v4596_v13  ;;  %v4509_v8 = vpop.f32.mrb[135].mxu0  ;;  %v1485_v10 = vadd.f32 %v6945_v41, %v7313_v56  ;;  %v3389_v22 = vadd.f32 %v6932_v57, %v6877_v40  ;;  %v7315_v57 = vld [vmem:[#allocation18_spill] sm:$0xff] }
 0x3ec   : >> { %v6970_v19 = vadd.f32 %v4509_v8, %v4508_v5  ;;  %v7314_v8 = vld [vmem:[#allocation16_spill] sm:$0xff] }
 0x3ed   : >> { %v3537_v15 = vadd.f32 %v4598_v48, %v3376_v35  ;;  %v6974_v18 = vadd.f32 %v3534_v52, %v1474_v43  ;;  %v1490_v28 = vadd.f32 %v7314_v8, %v6945_v41 }
 0x3ef   : >> { %v4599_v61 = vpop.f32.mrb[152].mxu1  ;;  %v6976_v59 = vadd.f32 %v3537_v15, %v1477_v16  ;;  %v3392_v16 = vadd.f32 %v6937_v34, %v6877_v40  ;;  %v4785_v34 = vadd.f32 %v6945_v41, %v6881_v1  ;;  %v4789_v1 = vadd.f32 %v6945_v41, %v6883_v45 }
 0x3f0   : >> { %v4511_v20 = vpop.f32.mrb[136].mxu0  ;;  %v4600_v50 = vpop.f32.mrb[153].mxu1 }
 0x3f1   : >> { %v4601_v63 = vadd.f32 %v4600_v50, %v4599_v61  ;;  %v4512_v62 = vpop.f32.mrb[137].mxu0  ;;  %v4602_v2 = vpop.f32.mrb[154].mxu1 }
 0x3f2   : >> { %v6980_v27 = vadd.f32 %v4512_v62, %v4511_v20  ;;  %v4514_v6 = vpop.f32.mrb[138].mxu0  ;;  %v4603_v0 = vpop.f32.mrb[155].mxu1 }
 0x3f3   : >> { %v3542_v33 = vadd.f32 %v4601_v63, %v3381_v47  ;;  %v4604_v55 = vadd.f32 %v4603_v0, %v4602_v2  ;;  %v4515_v44 = vpop.f32.mrb[139].mxu0  ;;  %v1493_v47 = vadd.f32 %v7315_v57, %v6945_v41 }
 0x3f4   : >> { %v6986_v54 = vadd.f32 %v4515_v44, %v4514_v6  ;;  %v4783_v6 = vadd.f32 %v6945_v41, %v6887_v53 }
 0x3f5   : >> { %v3545_v49 = vadd.f32 %v4604_v55, %v3384_v3  ;;  %v6990_v46 = vadd.f32 %v3542_v33, %v1482_v23  ;;  %v3397_v3 = vadd.f32 %v6948_v12, %v6877_v40 }
 0x3f7   : >> { %v4605_v30 = vpop.f32.mrb[156].mxu1  ;;  %v6992_v21 = vadd.f32 %v3545_v49, %v1485_v10  ;;  %v4787_v10 = vadd.f32 %v6945_v41, %v6889_v31  ;;  %v7316_v49 = vld [vmem:[#allocation21_spill] sm:$0xff]  ;;  %v7317_v31 = vld [vmem:[#allocation23_spill] sm:$0xff] }
 0x3f8   : >> { %v4517_v13 = vpop.f32.mrb[140].mxu0  ;;  %v4606_v5 = vpop.f32.mrb[157].mxu1  ;;  %v1498_v53 = vadd.f32 %v6945_v41, %v7316_v49 }
 0x3f9   : >> { %v4607_v11 = vadd.f32 %v4606_v5, %v4605_v30  ;;  %v4518_v26 = vpop.f32.mrb[141].mxu0  ;;  %v4608_v43 = vpop.f32.mrb[158].mxu1  ;;  %v3400_v30 = vadd.f32 %v6954_v14, %v6877_v40 }
 0x3fa   : >> { %v6996_v35 = vadd.f32 %v4518_v26, %v4517_v13  ;;  %v4520_v52 = vpop.f32.mrb[142].mxu0  ;;  %v4609_v48 = vpop.f32.mrb[159].mxu1 }
 0x3fb   : >> { %v3550_v15 = vadd.f32 %v4607_v11, %v3389_v22  ;;  %v4610_v61 = vadd.f32 %v4609_v48, %v4608_v43  ;;  %v4521_v20 = vpop.f32.mrb[143].mxu0 }
 0x3fc   : >> { %v7002_v50 = vadd.f32 %v4521_v20, %v4520_v52  ;;  %v4791_v20 = vadd.f32 %v6945_v41, %v6899_v38  ;;  %v7318_v38 = vld [vmem:[#allocation20_spill] sm:$0xff] }
 0x3fd   : >> { %v3553_v63 = vadd.f32 %v4610_v61, %v3392_v16  ;;  %v7006_v62 = vadd.f32 %v3550_v15, %v1490_v28  ;;  %v1501_v28 = vadd.f32 %v6945_v41, %v7317_v31 }
 0x3ff   : >> { %v4611_v2 = vpop.f32.mrb[160].mxu1  ;;  %v7010_v0 = vadd.f32 %v3553_v63, %v1493_v47 }
 0x400   : >> { %v4612_v9 = vpop.f32.mrb[161].mxu1  ;;  %v4745_v23 = vpop.f32.mrb[0].mxu0 }
 0x401   : >> { %v4613_v33 = vadd.f32 %v4612_v9, %v4611_v2  ;;  %v4784_v55 = vadd.f32 %v4783_v6, %v4745_v23  ;;  %v4614_v44 = vpop.f32.mrb[162].mxu1  ;;  %v3622_v56 = vpop.f32.mrb[1].mxu0  ;;  %v4793_v2 = vadd.f32 %v6945_v41, %v6893_v4  ;;  %v3405_v6 = vadd.f32 %v6964_v7, %v6877_v40 }
 0x402   : >> { %v4786_v13 = vadd.f32 %v4785_v34, %v3622_v56  ;;  %v4615_v5 = vpop.f32.mrb[163].mxu1  ;;  %v4746_v22 = vpop.f32.mrb[2].mxu0  ;;  %v4797_v4 = vadd.f32 %v6945_v41, %v6895_v51 }
 0x403   : >> { %v3558_v12 = vadd.f32 %v4613_v33, %v3397_v3  ;;  %v3783_v11 = vmax.f32 %v4784_v55, 0.0  ;;  %v4616_v26 = vadd.f32 %v4615_v5, %v4614_v44  ;;  %v4788_v43 = vadd.f32 %v4787_v10, %v4746_v22  ;;  %v3625_v52 = vpop.f32.mrb[3].mxu0 }
 0x404   : >> { %v3781_v48 = vmax.f32 %v4786_v13, 0.0  ;;  %v4790_v8 = vadd.f32 %v4789_v1, %v3625_v52  ;;  %v4795_v33 = vadd.f32 %v6945_v41, %v6901_v37  ;;  %v1506_v55 = vadd.f32 %v7318_v38, %v6945_v41  ;;  %v7319_v37 = vld [vmem:[#allocation22_spill] sm:$0xff] }
 0x405   : >> { %3815 = vst.msk [vmem:[#allocation2 + $0x31] sm:$0xff] %vm278_vm0, %v3783_v11  ;;  %v3561_v16 = vadd.f32 %v4616_v26, %v3400_v30  ;;  %v3784_v14 = vmax.f32 %v4788_v43, 0.0  ;;  %v7027_v15 = vadd.f32 %v3558_v12, %v1498_v53  ;;  %v3408_v44 = vadd.f32 %v6970_v19, %v6877_v40 }
 0x406   : >> { %3813 = vst.msk [vmem:[#allocation2 + $0x19] sm:$0xff] %vm278_vm0, %v3781_v48  ;;  %v3782_v61 = vmax.f32 %v4790_v8, 0.0  ;;  %v1509_v12 = vadd.f32 %v7319_v37, %v6945_v41  ;;  %v4799_v52 = vadd.f32 %v6945_v41, %v6915_v39  ;;  %v7320_v39 = vld [vmem:[#allocation25_spill] sm:$0xff] }
 0x407   : >> { %3816 = vst.msk [vmem:[#allocation2 + $0x39] sm:$0xff] %vm278_vm0, %v3784_v14  ;;  %v4617_v45 = vpop.f32.mrb[164].mxu1  ;;  %v7033_v57 = vadd.f32 %v3561_v16, %v1501_v28  ;;  %v4801_v28 = vadd.f32 %v6945_v41, %v6905_v36  ;;  %v3413_v16 = vadd.f32 %v6980_v27, %v6877_v40  ;;  %v4805_v36 = vadd.f32 %v6945_v41, %v6909_v32 }
 0x408   : >> { %3814 = vst.msk [vmem:[#allocation2 + $0x21] sm:$0xff] %vm278_vm0, %v3782_v61  ;;  %v4618_v47 = vpop.f32.mrb[165].mxu1  ;;  %v4749_v63 = vpop.f32.mrb[4].mxu0 }
 0x409   : >> { %v4619_v9 = vadd.f32 %v4618_v47, %v4617_v45  ;;  %v4792_v23 = vadd.f32 %v4791_v20, %v4749_v63  ;;  %v4620_v34 = vpop.f32.mrb[166].mxu1  ;;  %v3638_v3 = vpop.f32.mrb[5].mxu0  ;;  %v4803_v47 = vadd.f32 %v6945_v41, %v6919_v17  ;;  %v1514_v63 = vadd.f32 %v6945_v41, %v7320_v39  ;;  %v7321_v17 = vld [vmem:[#allocation27_spill] sm:$0xff] }
 0x40a   : >> { %v4794_v56 = vadd.f32 %v4793_v2, %v3638_v3  ;;  %v4621_v10 = vpop.f32.mrb[167].mxu1  ;;  %v4750_v49 = vpop.f32.mrb[6].mxu0  ;;  %v3416_v2 = vadd.f32 %v6986_v54, %v6877_v40 }
 0x40b   : >> { %v3566_v7 = vadd.f32 %v4619_v9, %v3405_v6  ;;  %v3787_v53 = vmax.f32 %v4792_v23, 0.0  ;;  %v4622_v30 = vadd.f32 %v4621_v10, %v4620_v34  ;;  %v4796_v13 = vadd.f32 %v4795_v33, %v4750_v49  ;;  %v3641_v5 = vpop.f32.mrb[7].mxu0 }
 0x40c   : >> { %v3785_v22 = vmax.f32 %v4794_v56, 0.0  ;;  %v4798_v1 = vadd.f32 %v4797_v4, %v3641_v5  ;;  %v1517_v56 = vadd.f32 %v6945_v41, %v7321_v17  ;;  %v4809_v5 = vadd.f32 %v6945_v41, %v6925_v29 }
 0x40d   : >> { %3819 = vst.msk [vmem:[#allocation2 + $0x61] sm:$0xff] %vm278_vm0, %v3787_v53  ;;  %v3569_v11 = vadd.f32 %v4622_v30, %v3408_v44  ;;  %v3788_v19 = vmax.f32 %v4796_v13, 0.0  ;;  %v7051_v26 = vadd.f32 %v3566_v7, %v1506_v55  ;;  %v4807_v7 = vadd.f32 %v6945_v41, %v6935_v58  ;;  %v7322_v58 = vld [vmem:[#allocation24_spill] sm:$0xff] }
 0x40e   : >> { %3817 = vst.msk [vmem:[#allocation2 + $0x49] sm:$0xff] %vm278_vm0, %v3785_v22  ;;  %v3786_v43 = vmax.f32 %v4798_v1, 0.0  ;;  %v3421_v22 = vadd.f32 %v6996_v35, %v6877_v40  ;;  %v4813_v29 = vadd.f32 %v6945_v41, %v6929_v24 }
 0x40f   : >> { %3820 = vst.msk [vmem:[#allocation2 + $0x69] sm:$0xff] %vm278_vm0, %v3788_v19  ;;  %v4623_v51 = vpop.f32.mrb[168].mxu1  ;;  %v7057_v48 = vadd.f32 %v3569_v11, %v1509_v12  ;;  %v4811_v19 = vadd.f32 %v6945_v41, %v6943_v60  ;;  %v7323_v60 = vld [vmem:[#allocation26_spill] sm:$0xff] }
 0x410   : >> { %3818 = vst.msk [vmem:[#allocation2 + $0x51] sm:$0xff] %vm278_vm0, %v3786_v43  ;;  %v4624_v8 = vpop.f32.mrb[169].mxu1  ;;  %v4753_v31 = vpop.f32.mrb[8].mxu0  ;;  %v1522_v43 = vadd.f32 %v7322_v58, %v6945_v41 }
 0x411   : >> { %v4625_v14 = vadd.f32 %v4624_v8, %v4623_v51  ;;  %v4800_v61 = vadd.f32 %v4799_v52, %v4753_v31  ;;  %v4626_v45 = vpop.f32.mrb[170].mxu1  ;;  %v3654_v20 = vpop.f32.mrb[9].mxu0  ;;  %v3424_v51 = vadd.f32 %v7002_v50, %v6877_v40 }
 0x412   : >> { %v4802_v6 = vadd.f32 %v4801_v28, %v3654_v20  ;;  %v4627_v9 = vpop.f32.mrb[171].mxu1  ;;  %v4754_v23 = vpop.f32.mrb[10].mxu0 }
 0x413   : >> { %v3574_v27 = vadd.f32 %v4625_v14, %v3413_v16  ;;  %v3791_v34 = vmax.f32 %v4800_v61, 0.0  ;;  %v4628_v3 = vadd.f32 %v4627_v9, %v4626_v45  ;;  %v4804_v33 = vadd.f32 %v4803_v47, %v4754_v23  ;;  %v3657_v38 = vpop.f32.mrb[11].mxu0 }
 0x414   : >> { %v3789_v55 = vmax.f32 %v4802_v6, 0.0  ;;  %v4806_v44 = vadd.f32 %v4805_v36, %v3657_v38  ;;  %v1525_v47 = vadd.f32 %v7323_v60, %v6945_v41 }
 0x415   : >> { %3823 = vst.msk [vmem:[#allocation2 + $0x91] sm:$0xff] %vm278_vm0, %v3791_v34  ;;  %v3577_v10 = vadd.f32 %v4628_v3, %v3416_v2  ;;  %v3792_v54 = vmax.f32 %v4804_v33, 0.0  ;;  %v7075_v49 = vadd.f32 %v3574_v27, %v1514_v63 }
 0x416   : >> { %3821 = vst.msk [vmem:[#allocation2 + $0x79] sm:$0xff] %vm278_vm0, %v3789_v55  ;;  %v3790_v4 = vmax.f32 %v4806_v44, 0.0 }
 0x417   : >> { %3824 = vst.msk [vmem:[#allocation2 + $0x99] sm:$0xff] %vm278_vm0, %v3792_v54  ;;  %v4629_v32 = vpop.f32.mrb[172].mxu1  ;;  %v7081_v53 = vadd.f32 %v3577_v10, %v1517_v56 }
 0x418   : >> { %3822 = vst.msk [vmem:[#allocation2 + $0x81] sm:$0xff] %vm278_vm0, %v3790_v4  ;;  %v4630_v30 = vpop.f32.mrb[173].mxu1  ;;  %v4757_v13 = vpop.f32.mrb[12].mxu0 }
 0x419   : >> { %v4631_v1 = vadd.f32 %v4630_v30, %v4629_v32  ;;  %v4808_v37 = vadd.f32 %v4807_v7, %v4757_v13  ;;  %v4632_v12 = vpop.f32.mrb[174].mxu1  ;;  %v3670_v11 = vpop.f32.mrb[13].mxu0 }
 0x41a   : >> { %v4810_v52 = vadd.f32 %v4809_v5, %v3670_v11  ;;  %v4633_v8 = vpop.f32.mrb[175].mxu1  ;;  %v4758_v31 = vpop.f32.mrb[14].mxu0 }
 0x41b   : >> { %v3582_v35 = vadd.f32 %v4631_v1, %v3421_v22  ;;  %v3795_v28 = vmax.f32 %v4808_v37, 0.0  ;;  %v4634_v16 = vadd.f32 %v4633_v8, %v4632_v12  ;;  %v4812_v14 = vadd.f32 %v4811_v19, %v4758_v31  ;;  %v3673_v61 = vpop.f32.mrb[15].mxu0 }
 0x41c   : >> { %v3793_v45 = vmax.f32 %v4810_v52, 0.0  ;;  %v4814_v20 = vadd.f32 %v4813_v29, %v3673_v61  ;;  %v3851_v61 = vld [vmem:[#allocation2 + $0x61] sm:$0xff] (%p455_p11) }
 0x41d   : >> { %3827 = vst.msk [vmem:[#allocation2 + $0xc1] sm:$0xff] %vm278_vm0, %v3795_v28  ;;  %v3585_v39 = vadd.f32 %v4634_v16, %v3424_v51  ;;  %v3796_v40 = vmax.f32 %v4812_v14, 0.0  ;;  %v4852_v50 = vadd.f32 %v3582_v35, %v1522_v43  ;;  %v3847_v35 = vld [vmem:[#allocation2 + $0x31] sm:$0xff] (%p455_p11)  ;;  %v3848_v28 = vld [vmem:[#allocation2 + $0x39] sm:$0xff] (%p455_p11)  ;;  %v3849_v16 = vld [vmem:[#allocation2 + $0x49] sm:$0xff] (%p455_p11) }
 0x41e   : >> { %3825 = vst.msk [vmem:[#allocation2 + $0xa9] sm:$0xff] %vm278_vm0, %v3793_v45  ;;  %v3794_v63 = vmax.f32 %v4814_v20, 0.0  ;;  %3879 = vst.msk [vmem:[%s5467_s20 + $0x10] sm:$0xff] (%p455_p11), %vm278_vm0, %v3847_v35  ;;  %v3850_v14 = vld [vmem:[#allocation2 + $0x51] sm:$0xff] (%p455_p11)  ;;  %v3852_v45 = vld [vmem:[#allocation2 + $0x69] sm:$0xff] (%p455_p11) }
 0x41f   : >> { %3828 = vst.msk [vmem:[#allocation2 + $0xc9] sm:$0xff] %vm278_vm0, %v3796_v40  ;;  %v4858_v24 = vadd.f32 %v3585_v39, %v1525_v47  ;;  %3880 = vst.msk [vmem:[%s5467_s20 + $0x18] sm:$0xff] (%p455_p11), %vm278_vm0, %v3848_v28  ;;  %v3853_v20 = vld [vmem:[#allocation2 + $0x79] sm:$0xff] (%p455_p11)  ;;  %v3854_v60 = vld [vmem:[#allocation2 + $0x81] sm:$0xff] (%p455_p11) }
 0x420   : >> { %3826 = vst.msk [vmem:[#allocation2 + $0xb1] sm:$0xff] %vm278_vm0, %v3794_v63  ;;  %v4761_v2 = vpop.f32.mrb[144].mxu0  ;;  %3881 = vst.msk [vmem:[%s5467_s20 + $0x20] sm:$0xff] (%p455_p11), %vm278_vm0, %v3849_v16  ;;  %v3855_v47 = vld [vmem:[#allocation2 + $0x91] sm:$0xff] (%p455_p11)  ;;  %v3856_v39 = vld [vmem:[#allocation2 + $0x99] sm:$0xff] (%p455_p11) }
 0x421   : >> { %v4817_v6 = vadd.f32 %v6974_v18, %v4761_v2  ;;  %v3686_v9 = vpop.f32.mrb[145].mxu0  ;;  %3882 = vst.msk [vmem:[%s5467_s20 + $0x28] sm:$0xff] (%p455_p11), %vm278_vm0, %v3850_v14  ;;  %3883 = vst.msk [vmem:[%s5467_s20 + $0x30] sm:$0xff] (%p455_p11), %vm278_vm0, %v3851_v61 }
 0x422   : >> { %v4820_v23 = vadd.f32 %v6958_v42, %v3686_v9  ;;  %v4762_v41 = vpop.f32.mrb[146].mxu0  ;;  %3884 = vst.msk [vmem:[%s5467_s20 + $0x38] sm:$0xff] (%p455_p11), %vm278_vm0, %v3852_v45  ;;  %3885 = vst.msk [vmem:[%s5467_s20 + $0x40] sm:$0xff] (%p455_p11), %vm278_vm0, %v3853_v20 }
 0x423   : >> { %v3799_v36 = vmax.f32 %v4817_v6, 0.0  ;;  %v4823_v27 = vadd.f32 %v6976_v59, %v4762_v41  ;;  %v3689_v34 = vpop.f32.mrb[147].mxu0  ;;  %3886 = vst.msk [vmem:[%s5467_s20 + $0x48] sm:$0xff] (%p455_p11), %vm278_vm0, %v3854_v60  ;;  %3887 = vst.msk [vmem:[%s5467_s20 + $0x50] sm:$0xff] (%p455_p11), %vm278_vm0, %v3855_v47 }
 0x424   : >> { %v3797_v3 = vmax.f32 %v4820_v23, 0.0  ;;  %v4826_v33 = vadd.f32 %v6960_v25, %v3689_v34  ;;  %3888 = vst.msk [vmem:[%s5467_s20 + $0x58] sm:$0xff] (%p455_p11), %vm278_vm0, %v3856_v39  ;;  %v3859_v63 = vld [vmem:[#allocation2 + $0xc1] sm:$0xff] (%p455_p11) }
 0x425   : >> { %3831 = vst.msk [vmem:[#allocation2 + $0xf1] sm:$0xff] %vm278_vm0, %v3799_v36  ;;  %v3800_v38 = vmax.f32 %v4823_v27, 0.0  ;;  %v3857_v40 = vld [vmem:[#allocation2 + $0xa9] sm:$0xff] (%p455_p11)  ;;  %3891 = vst.msk [vmem:[%s5467_s20 + $0x70] sm:$0xff] (%p455_p11), %vm278_vm0, %v3859_v63 }
 0x426   : >> { %3829 = vst.msk [vmem:[#allocation2 + $0xd9] sm:$0xff] %vm278_vm0, %v3797_v3  ;;  %v3798_v55 = vmax.f32 %v4826_v33, 0.0  ;;  %3889 = vst.msk [vmem:[%s5467_s20 + $0x60] sm:$0xff] (%p455_p11), %vm278_vm0, %v3857_v40 }
 0x427   : >> { %3832 = vst.msk [vmem:[#allocation2 + $0xf9] sm:$0xff] %vm278_vm0, %v3800_v38 }
 0x428   : >> { %3830 = vst.msk [vmem:[#allocation2 + $0xe1] sm:$0xff] %vm278_vm0, %v3798_v55  ;;  %v4765_v18 = vpop.f32.mrb[148].mxu0 }
 0x429   : >> { %v4829_v42 = vadd.f32 %v7006_v62, %v4765_v18  ;;  %v3702_v44 = vpop.f32.mrb[149].mxu0 }
 0x42a   : >> { %v4832_v59 = vadd.f32 %v6990_v46, %v3702_v44  ;;  %v4766_v17 = vpop.f32.mrb[150].mxu0 }
 0x42b   : >> { %v3803_v56 = vmax.f32 %v4829_v42, 0.0  ;;  %v4835_v25 = vadd.f32 %v7010_v0, %v4766_v17  ;;  %v3705_v10 = vpop.f32.mrb[151].mxu0 }
 0x42c   : >> { %v3801_v54 = vmax.f32 %v4832_v59, 0.0  ;;  %v4838_v4 = vadd.f32 %v6992_v21, %v3705_v10  ;;  %v3863_v9 = vld [vmem:[#allocation2 + $0xf1] sm:$0xff] (%p455_p11) }
 0x42d   : >> { %3835 = vst.msk [vmem:[#allocation2 + $0x121] sm:$0xff] %vm278_vm0, %v3803_v56  ;;  %v3804_v32 = vmax.f32 %v4835_v25, 0.0  ;;  %v3861_v2 = vld [vmem:[#allocation2 + $0xd9] sm:$0xff] (%p455_p11)  ;;  %3895 = vst.msk [vmem:[%s5467_s20 + $0x90] sm:$0xff] (%p455_p11), %vm278_vm0, %v3863_v9 }
 0x42e   : >> { %3833 = vst.msk [vmem:[#allocation2 + $0x109] sm:$0xff] %vm278_vm0, %v3801_v54  ;;  %v3802_v7 = vmax.f32 %v4838_v4, 0.0  ;;  %3893 = vst.msk [vmem:[%s5467_s20 + $0x80] sm:$0xff] (%p455_p11), %vm278_vm0, %v3861_v2  ;;  %v3864_v23 = vld [vmem:[#allocation2 + $0xf9] sm:$0xff] (%p455_p11) }
 0x42f   : >> { %3836 = vst.msk [vmem:[#allocation2 + $0x129] sm:$0xff] %vm278_vm0, %v3804_v32  ;;  %v3862_v6 = vld [vmem:[#allocation2 + $0xe1] sm:$0xff] (%p455_p11)  ;;  %3896 = vst.msk [vmem:[%s5467_s20 + $0x98] sm:$0xff] (%p455_p11), %vm278_vm0, %v3864_v23 }
 0x430   : >> { %3834 = vst.msk [vmem:[#allocation2 + $0x111] sm:$0xff] %vm278_vm0, %v3802_v7  ;;  %v4769_v62 = vpop.f32.mrb[152].mxu0  ;;  %3894 = vst.msk [vmem:[%s5467_s20 + $0x88] sm:$0xff] (%p455_p11), %vm278_vm0, %v3862_v6 }
 0x431   : >> { %v4841_v46 = vadd.f32 %v7051_v26, %v4769_v62  ;;  %v3718_v30 = vpop.f32.mrb[153].mxu0 }
 0x432   : >> { %v4844_v0 = vadd.f32 %v7027_v15, %v3718_v30  ;;  %v4770_v13 = vpop.f32.mrb[154].mxu0 }
 0x433   : >> { %v3807_v5 = vmax.f32 %v4841_v46, 0.0  ;;  %v4847_v21 = vadd.f32 %v7057_v48, %v4770_v13  ;;  %v3721_v22 = vpop.f32.mrb[155].mxu0 }
 0x434   : >> { %v3805_v1 = vmax.f32 %v4844_v0, 0.0  ;;  %v4850_v37 = vadd.f32 %v7033_v57, %v3721_v22  ;;  %v3867_v27 = vld [vmem:[#allocation2 + $0x121] sm:$0xff] (%p455_p11) }
 0x435   : >> { %3839 = vst.msk [vmem:[#allocation2 + $0x151] sm:$0xff] %vm278_vm0, %v3807_v5  ;;  %v3808_v12 = vmax.f32 %v4847_v21, 0.0  ;;  %v3865_v41 = vld [vmem:[#allocation2 + $0x109] sm:$0xff] (%p455_p11)  ;;  %3899 = vst.msk [vmem:[%s5467_s20 + $0xb0] sm:$0xff] (%p455_p11), %vm278_vm0, %v3867_v27 }
 0x436   : >> { %3837 = vst.msk [vmem:[#allocation2 + $0x139] sm:$0xff] %vm278_vm0, %v3805_v1  ;;  %v3806_v11 = vmax.f32 %v4850_v37, 0.0  ;;  %3897 = vst.msk [vmem:[%s5467_s20 + $0xa0] sm:$0xff] (%p455_p11), %vm278_vm0, %v3865_v41  ;;  %v3868_v34 = vld [vmem:[#allocation2 + $0x129] sm:$0xff] (%p455_p11) }
 0x437   : >> { %3840 = vst.msk [vmem:[#allocation2 + $0x159] sm:$0xff] %vm278_vm0, %v3808_v12  ;;  %v3866_v36 = vld [vmem:[#allocation2 + $0x111] sm:$0xff] (%p455_p11)  ;;  %3900 = vst.msk [vmem:[%s5467_s20 + $0xb8] sm:$0xff] (%p455_p11), %vm278_vm0, %v3868_v34 }
 0x438   : >> { %3838 = vst.msk [vmem:[#allocation2 + $0x141] sm:$0xff] %vm278_vm0, %v3806_v11  ;;  %v4773_v26 = vpop.f32.mrb[156].mxu0  ;;  %3898 = vst.msk [vmem:[%s5467_s20 + $0xa8] sm:$0xff] (%p455_p11), %vm278_vm0, %v3866_v36 }
 0x439   : >> { %v4853_v15 = vadd.f32 %v4852_v50, %v4773_v26  ;;  %v3734_v19 = vpop.f32.mrb[157].mxu0  ;;  %v3858_v50 = vld [vmem:[#allocation2 + $0xb1] sm:$0xff] (%p455_p11) }
 0x43a   : >> { %v4856_v58 = vadd.f32 %v7075_v49, %v3734_v19  ;;  %v4774_v48 = vpop.f32.mrb[158].mxu0  ;;  %457 = sbr.rel (!%p455_p11) target bundleno = 84 (0x54), region = 98  ;;  %v3845_v49 = vld [vmem:[#allocation2 + $0x19] sm:$0xff] (%p455_p11)  ;;  %3890 = vst.msk [vmem:[%s5467_s20 + $0x68] sm:$0xff] (%p455_p11), %vm278_vm0, %v3858_v50 }
 0x43b   : >> { %v3811_v43 = vmax.f32 %v4853_v15, 0.0  ;;  %v4859_v51 = vadd.f32 %v4858_v24, %v4774_v48  ;;  %v3737_v52 = vpop.f32.mrb[159].mxu0  ;;  %3877 = vst.msk [vmem:[%s5467_s20] sm:$0xff] (%p455_p11), %vm278_vm0, %v3845_v49  ;;  %v3860_v24 = vld [vmem:[#allocation2 + $0xc9] sm:$0xff] (%p455_p11) }
 0x43c   : >> { %v3809_v57 = vmax.f32 %v4856_v58, 0.0  ;;  %v4862_v8 = vadd.f32 %v7081_v53, %v3737_v52  ;;  %v3846_v53 = vld [vmem:[#allocation2 + $0x21] sm:$0xff] (%p455_p11)  ;;  %3892 = vst.msk [vmem:[%s5467_s20 + $0x78] sm:$0xff] (%p455_p11), %vm278_vm0, %v3860_v24  ;;  %v3871_v38 = vld [vmem:[#allocation2 + $0x151] sm:$0xff] (%p455_p11) }
 0x43d   : >> { %3843 = vst.msk [vmem:[#allocation2 + $0x181] sm:$0xff] %vm278_vm0, %v3811_v43  ;;  %v3812_v31 = vmax.f32 %v4859_v51, 0.0  ;;  %3878 = vst.msk [vmem:[%s5467_s20 + $0x8] sm:$0xff] (%p455_p11), %vm278_vm0, %v3846_v53  ;;  %v3869_v3 = vld [vmem:[#allocation2 + $0x139] sm:$0xff] (%p455_p11) }
 0x43e   : >> { %3841 = vst.msk [vmem:[#allocation2 + $0x169] sm:$0xff] %vm278_vm0, %v3809_v57  ;;  %v3810_v29 = vmax.f32 %v4862_v8, 0.0  ;;  %3901 = vst.msk [vmem:[%s5467_s20 + $0xc0] sm:$0xff] (%p455_p11), %vm278_vm0, %v3869_v3  ;;  %v3872_v55 = vld [vmem:[#allocation2 + $0x159] sm:$0xff] (%p455_p11) }
 0x43f   : >> { %3844 = vst.msk [vmem:[#allocation2 + $0x189] sm:$0xff] %vm278_vm0, %v3812_v31  ;;  %v3870_v33 = vld [vmem:[#allocation2 + $0x141] sm:$0xff] (%p455_p11)  ;;  %3903 = vst.msk [vmem:[%s5467_s20 + $0xd0] sm:$0xff] (%p455_p11), %vm278_vm0, %v3871_v38 }
 0x440   : >> { %3842 = vst.msk [vmem:[#allocation2 + $0x171] sm:$0xff] %vm278_vm0, %v3810_v29  ;;  %3902 = vst.msk [vmem:[%s5467_s20 + $0xc8] sm:$0xff] (%p455_p11), %vm278_vm0, %v3870_v33 }
 0x441   : > { %3904 = vst.msk [vmem:[%s5467_s20 + $0xd8] sm:$0xff] %vm278_vm0, %v3872_v55 }
 0x444   : > { %v3875_v44 = vld [vmem:[#allocation2 + $0x181] sm:$0xff] }
 0x445   : > { %v3873_v18 = vld [vmem:[#allocation2 + $0x169] sm:$0xff]  ;;  %3907 = vst.msk [vmem:[%s5467_s20 + $0xf0] sm:$0xff] %vm278_vm0, %v3875_v44 }
 0x446   : > { %3905 = vst.msk [vmem:[%s5467_s20 + $0xe0] sm:$0xff] %vm278_vm0, %v3873_v18  ;;  %v3876_v59 = vld [vmem:[#allocation2 + $0x189] sm:$0xff] }
 0x447   : > { %v3874_v42 = vld [vmem:[#allocation2 + $0x171] sm:$0xff]  ;;  %3908 = vst.msk [vmem:[%s5467_s20 + $0xf8] sm:$0xff] %vm278_vm0, %v3876_v59 }
 0x448   : > { %3906 = vst.msk [vmem:[%s5467_s20 + $0xe8] sm:$0xff] %vm278_vm0, %v3874_v42 }
 0x449   : > { %5020 = shalt.err (!%p5017_p4)
}
 0x44a   : > { %s5021_s13 = scalar_lea.hbm %s7188_s29, 4096  ;;  %s5025_s17 = scalar_lea.hbm %s7258_s7, 8192 }
 0x44b   : > { %p5022_p7 = scmp.ne.s32.totalorder %s7188_s29, %s5021_s13  ;;  %p5026_p10 = scmp.lt.u32.totalorder %s7188_s29, %s7258_s7 }
 0x44c   : > { %p5027_p11 = scmp.lt.u32.totalorder %s5025_s17, %s5021_s13  ;;  %p5029_p13 = scmp.lt.u32.totalorder %s5021_s13, %s7188_s29 }
 0x44d   : > { %p5023_p8 = pnand %p5022_p7, %p5162_p5 }
 0x44e   : > { %p5028_p12 = por %p5027_p11, %p5026_p10 }
 0x44f   : > { %p5024_p9 = pneg %p5023_p8 }
 0x450   : > { %p5030_p0 = por %p5029_p13, %p5028_p12 }
 0x452   : > { %p5031_p1 = pnand %p5030_p0, %p5024_p9 }
 0x454   : > { %5034 = shalt.err (!%p5031_p1)
}
 0x455   : > { %s5082_s28 = smov 128   ;;  %s5083_s23 = smov 8  }
 0x456   : > { %4879 = dma.vmem_to_hbm [thread:$0]  (%p5162_p5), %s7190_s19, 4096, %s7188_s29, %s7210_s8, %s5082_s28, %s5082_s28, %s5083_s23  }
 0x457 PF: > { %p4885_p2 = scmp.ge.s32.totalorder %s5073_s27, 2  ;;  %s3938_s9 = sand.u32 1, %s5061_s24  }
 0x458   : > { %s3939_s22 = scalar_lea.sflag [#allocation5], %s3938_s9 }
 0x459   : > { %p4882_p3 = pnand %p4885_p2, %p5166_p6 }
 0x45b   : > { %5056 = dma.done.wait (!%p4882_p3), %s3939_s22, 4096  }
 0x45c   : > { %5058 = vsyncadd (!%p4882_p3), %s3939_s22, 4294963200  ;;  %p17_p4 = scmp.ge.s32.totalorder %s5149_s30, 4   ;;  %s7324_s24 = smov %s5065_s25 }
 0x45d   : > { %s7325_s25 = smov %s5069_s26  ;;  %s7326_s26 = smov %s5160_s10 }
 0x45e   : > { %s7327_s27 = smov %s5149_s30  ;;  %19 = sbr.rel (!%p17_p4) target bundleno = 3 (0x3), region = 109 }
 0x465   :  { %3944 = vsyncpa [#allocation5], 1 }
 0x466   :  { %3946 = vsyncpa [#allocation5 + $0x1], 1 }

</bundles_post_ra>
